<compile_context>
chip_gen: v7x
topology: tpu7x:2x2x1
jax: 0.10.0
libtpu: 0.0.40
codegen_flags: <defaults>
</compile_context>

<pallas_src>
import numpy as np
import jax
import jax.numpy as jnp
from jax import lax
from jax.experimental import pallas as pl
from jax.experimental.pallas import tpu as pltpu

BN_EPS = 1e-5
_BN_INV = float(1.0 / np.sqrt(1.0 + BN_EPS))  # eval-mode BatchNorm1d, default params

_COMPILER_PARAMS = pltpu.CompilerParams(
    dimension_semantics=("parallel", "arbitrary"),  # rows // 2 TCs on v7x; K = reduction
    vmem_limit_bytes=32 * 1024 * 1024,              # tiles are small; safe on 64 MiB v7x
)


def _round_up(x, m):
    return ((x + m - 1) // m) * m


# ---------------------------------------------------------------------------
# Kernel 1: one spectral stage   o = diag(v) * (M @ T)
#   M is a (Np, Np) bf16 matrix (U or U^T), T is (Np, F) f32, v is (Np, 1) f32
#   (pass ones for an unscaled stage).  Grid = (row tiles, K tiles); f32
#   accumulator in VMEM, scaled + stored on the last K step.
# ---------------------------------------------------------------------------
def _spectral_stage_kernel(m_ref, t_ref, v_ref, o_ref, acc_ref):
    k = pl.program_id(1)

    @pl.when(k == 0)
    def _():
        acc_ref[...] = jnp.zeros_like(acc_ref)

    acc_ref[...] += jnp.dot(m_ref[...], t_ref[...].astype(jnp.bfloat16),
                            preferred_element_type=jnp.float32)

    @pl.when(k == pl.num_programs(1) - 1)
    def _():
        o_ref[...] = v_ref[...] * acc_ref[...]


def _spectral_stage(m_bf, t, v_col, *, bm, bk):
    n = m_bf.shape[0]
    f = t.shape[1]
    return pl.pallas_call(
        _spectral_stage_kernel,
        out_shape=jax.ShapeDtypeStruct((n, f), jnp.float32),
        grid_spec=pltpu.PrefetchScalarGridSpec(
            num_scalar_prefetch=0,
            grid=(n // bm, n // bk),
            in_specs=[
                pl.BlockSpec((bm, bk), lambda i, k: (i, k)),   # U / U^T tile (bf16)
                pl.BlockSpec((bk, f), lambda i, k: (k, 0)),    # carried features
                pl.BlockSpec((bm, 1), lambda i, k: (i, 0)),    # per-row spectral scale
            ],
            out_specs=pl.BlockSpec((bm, f), lambda i, k: (i, 0)),
            scratch_shapes=[pltpu.VMEM((bm, f), jnp.float32)],
        ),
        compiler_params=_COMPILER_PARAMS,
    )(m_bf, t, v_col)


# ---------------------------------------------------------------------------
# Kernel 2: last U-apply of a residual layer, fused epilogue
#   acc = U @ T (accumulated over K)
#   hidden = acc @ W + b          (SLOG_B .W; hidden_emd)
#   h      = relu(bns1(hidden))   (dropout = identity)
#   X'     = bns2(relu(h + X @ Wl + bl))
# ---------------------------------------------------------------------------
def _layer_residual_kernel(m_ref, t_ref, x_ref, w_ref, b_ref, wl_ref, bl_ref,
                           o_ref, acc_ref):
    k = pl.program_id(1)

    @pl.when(k == 0)
    def _():
        acc_ref[...] = jnp.zeros_like(acc_ref)

    acc_ref[...] += jnp.dot(m_ref[...], t_ref[...].astype(jnp.bfloat16),
                            preferred_element_type=jnp.float32)

    @pl.when(k == pl.num_programs(1) - 1)
    def _():
        hidden = (jnp.dot(acc_ref[...], w_ref[...],
                          preferred_element_type=jnp.float32) + b_ref[...])
        h = jnp.maximum(hidden * _BN_INV, 0.0)
        lin = (jnp.dot(x_ref[...], wl_ref[...],
                       preferred_element_type=jnp.float32) + bl_ref[...])
        o_ref[...] = jnp.maximum(h + lin, 0.0) * _BN_INV


def _layer_residual(u_bf, t, x, w, b, wl, bl, *, bm, bk):
    n = u_bf.shape[0]
    c_in = t.shape[1]
    h_dim = w.shape[1]
    return pl.pallas_call(
        _layer_residual_kernel,
        out_shape=jax.ShapeDtypeStruct((n, h_dim), jnp.float32),
        grid_spec=pltpu.PrefetchScalarGridSpec(
            num_scalar_prefetch=0,
            grid=(n // bm, n // bk),
            in_specs=[
                pl.BlockSpec((bm, bk), lambda i, k: (i, k)),     # U tile (bf16)
                pl.BlockSpec((bk, c_in), lambda i, k: (k, 0)),   # t
                pl.BlockSpec((bm, c_in), lambda i, k: (i, 0)),   # X (residual)
                pl.BlockSpec((c_in, h_dim), lambda i, k: (0, 0)),
                pl.BlockSpec((1, h_dim), lambda i, k: (0, 0)),
                pl.BlockSpec((c_in, h_dim), lambda i, k: (0, 0)),
                pl.BlockSpec((1, h_dim), lambda i, k: (0, 0)),
            ],
            out_specs=pl.BlockSpec((bm, h_dim), lambda i, k: (i, 0)),
            scratch_shapes=[pltpu.VMEM((bm, c_in), jnp.float32)],
        ),
        compiler_params=_COMPILER_PARAMS,
    )(u_bf, t, x, w, b.reshape(1, h_dim), wl, bl.reshape(1, h_dim))


# ---------------------------------------------------------------------------
# Kernel 3: last U-apply of the final layer, fused head
#   hidden = acc @ W + b;  h = relu(bns1(hidden))
#   z = sigmoid(h @ Wmlp + bmlp) + X @ Wl + bl
#   out = log_softmax(z, dim=1)
# ---------------------------------------------------------------------------
def _layer_final_kernel(m_ref, t_ref, x_ref, w_ref, b_ref, wmlp_ref, bmlp_ref,
                        wl_ref, bl_ref, o_ref, acc_ref):
    k = pl.program_id(1)

    @pl.when(k == 0)
    def _():
        acc_ref[...] = jnp.zeros_like(acc_ref)

    acc_ref[...] += jnp.dot(m_ref[...], t_ref[...].astype(jnp.bfloat16),
                            preferred_element_type=jnp.float32)

    @pl.when(k == pl.num_programs(1) - 1)
    def _():
        hidden = (jnp.dot(acc_ref[...], w_ref[...],
                          preferred_element_type=jnp.float32) + b_ref[...])
        h = jnp.maximum(hidden * _BN_INV, 0.0)
        mlp = (jnp.dot(h, wmlp_ref[...],
                       preferred_element_type=jnp.float32) + bmlp_ref[...])
        lin = (jnp.dot(x_ref[...], wl_ref[...],
                       preferred_element_type=jnp.float32) + bl_ref[...])
        z = jax.nn.sigmoid(mlp) + lin
        zmax = jnp.max(z, axis=-1, keepdims=True)
        e = jnp.exp(z - zmax)
        o_ref[...] = (z - zmax) - jnp.log(jnp.sum(e, axis=-1, keepdims=True))


def _layer_final(u_bf, t, x, w, b, wmlp, bmlp, wl, bl, *, bm, bk):
    n = u_bf.shape[0]
    c_in = t.shape[1]
    h_dim = w.shape[1]
    out_dim = wmlp.shape[1]
    return pl.pallas_call(
        _layer_final_kernel,
        out_shape=jax.ShapeDtypeStruct((n, out_dim), jnp.float32),
        grid_spec=pltpu.PrefetchScalarGridSpec(
            num_scalar_prefetch=0,
            grid=(n // bm, n // bk),
            in_specs=[
                pl.BlockSpec((bm, bk), lambda i, k: (i, k)),      # U tile (bf16)
                pl.BlockSpec((bk, c_in), lambda i, k: (k, 0)),    # t
                pl.BlockSpec((bm, c_in), lambda i, k: (i, 0)),    # X (lines[-1] input)
                pl.BlockSpec((c_in, h_dim), lambda i, k: (0, 0)),
                pl.BlockSpec((1, h_dim), lambda i, k: (0, 0)),
                pl.BlockSpec((h_dim, out_dim), lambda i, k: (0, 0)),
                pl.BlockSpec((1, out_dim), lambda i, k: (0, 0)),
                pl.BlockSpec((c_in, out_dim), lambda i, k: (0, 0)),
                pl.BlockSpec((1, out_dim), lambda i, k: (0, 0)),
            ],
            out_specs=pl.BlockSpec((bm, out_dim), lambda i, k: (i, 0)),
            scratch_shapes=[pltpu.VMEM((bm, c_in), jnp.float32)],
        ),
        compiler_params=_COMPILER_PARAMS,
    )(u_bf, t, x, w, b.reshape(1, h_dim), wmlp, bmlp.reshape(1, out_dim),
      wl, bl.reshape(1, out_dim))


# ---------------------------------------------------------------------------
# SLOG_N forward (res=True, softmax=True), composing the kernels.
# ---------------------------------------------------------------------------
def slog_n_forward(params, X, La, U, *, block=256):
    N = X.shape[0]
    B = block if N >= block else max(8, _round_up(N, 8))
    Np = _round_up(N, B)
    pad = Np - N

    Xc = jnp.pad(X.astype(jnp.float32), ((0, pad), (0, 0)))
    Up = jnp.pad(U.astype(jnp.float32), ((0, pad), (0, pad)))
    # Streamed MXU operands in bf16 (f32 accumulation); U^T precomputed once and
    # reused twice per layer so no in-kernel (N,N) transposes are needed.
    U_bf = Up.astype(jnp.bfloat16)
    Ut_bf = Up.T.astype(jnp.bfloat16)
    ones_col = jnp.ones((Np, 1), jnp.float32)

    def vcol(v):
        return jnp.pad(v.astype(jnp.float32)[:, None], ((0, pad), (0, 0)))

    layer_num = len(params["Wb"])
    out = None
    for i in range(layer_num):
        ve = params["ve"][i]
        # Spectral filter coefficients, hoisted out of the kernels.
        v1 = vcol(jnp.power(La, ve[0]))
        v2 = vcol(jnp.power((2.0 * (La - 1e-8) - 1.0) ** 2 + 1.0, ve[1]))
        # hidden = U diag(v2) U^T U diag(v1) U^T X W + b, right-to-left so no
        # (N,N) intermediate is ever formed (O(N^2 F) instead of O(N^3)).
        # NOTE: if C_in > hidden_dim one should pre-project (X @ W) before the
        # spectral chain (matrix-product associativity); not needed here.
        t = _spectral_stage(Ut_bf, Xc, v1, bm=B, bk=B)       # diag(v1) (U^T X)
        t = _spectral_stage(U_bf, t, ones_col, bm=B, bk=B)   # U ...
        t = _spectral_stage(Ut_bf, t, v2, bm=B, bk=B)        # diag(v2) (U^T ...)
        if i < layer_num - 1:
            Xc = _layer_residual(U_bf, t, Xc,
                                 params["Wb"][i], params["bb"][i],
                                 params["Wl"][i], params["bl"][i], bm=B, bk=B)
        else:
            out = _layer_final(U_bf, t, Xc,
                               params["Wb"][i], params["bb"][i],
                               params["Wmlp"], params["bmlp"],
                               params["Wl"][i], params["bl"][i], bm=B, bk=B)
    return out[:N], None


# ---------------------------------------------------------------------------
# Pure-JAX reference (same eval-mode semantics).
#   matmul_dtype=bf16 mirrors the kernels' MXU-operand precision (tight check);
#   matmul_dtype=f32 is the full-precision semantics of the torch module.
# ---------------------------------------------------------------------------
def _ref_forward(params, X, La, U, *, matmul_dtype=jnp.float32):
    hp = lax.Precision.HIGHEST
    prec = hp if matmul_dtype == jnp.float32 else lax.Precision.DEFAULT
    Uc = U.astype(matmul_dtype)
    Utc = U.T.astype(matmul_dtype)

    def spectral(v1, v2, t):
        t = jnp.dot(Utc, t.astype(matmul_dtype),
                    preferred_element_type=jnp.float32, precision=prec)
        t = v1[:, None] * t
        t = jnp.dot(Uc, t.astype(matmul_dtype),
                    preferred_element_type=jnp.float32, precision=prec)
        t = jnp.dot(Utc, t.astype(matmul_dtype),
                    preferred_element_type=jnp.float32, precision=prec)
        t = v2[:, None] * t
        t = jnp.dot(Uc, t.astype(matmul_dtype),
                    preferred_element_type=jnp.float32, precision=prec)
        return t

    layer_num = len(params["Wb"])
    Xc = X.astype(jnp.float32)
    for i in range(layer_num):
        ve = params["ve"][i]
        v1 = jnp.power(La, ve[0])
        v2 = jnp.power((2.0 * (La - 1e-8) - 1.0) ** 2 + 1.0, ve[1])
        hidden = (jnp.dot(spectral(v1, v2, Xc), params["Wb"][i], precision=hp)
                  + params["bb"][i][None, :])
        h = jnp.maximum(hidden * _BN_INV, 0.0)
        lin = jnp.dot(Xc, params["Wl"][i], precision=hp) + params["bl"][i][None, :]
        if i < layer_num - 1:
            Xc = jnp.maximum(h + lin, 0.0) * _BN_INV
        else:
            z = (jax.nn.sigmoid(jnp.dot(h, params["Wmlp"], precision=hp)
                                + params["bmlp"][None, :]) + lin)
            return jax.nn.log_softmax(z, axis=1)


# ---------------------------------------------------------------------------
if __name__ == "__main__":
    # Small but non-trivial sizes: with a 128-row/col block this gives a real
    # (3, 3) grid per spectral stage plus row padding (N=320 -> Np=384).
    N, IN, HID, OUT = 320, 16, 32, 4
    LAYER_NUM = 3
    BLOCK = 128

    key = jax.random.PRNGKey(0)
    ks = jax.random.split(key, 16)

    X = jax.random.normal(ks[0], (N, IN), dtype=jnp.float32)
    # Orthonormal eigenvectors and eigenvalues in [0, 1.2] (including the exact
    # lambda=0 mode every graph Laplacian has) -- realistic, well-scaled inputs.
    U, _ = jnp.linalg.qr(jax.random.normal(ks[1], (N, N), dtype=jnp.float32))
    La = jax.random.uniform(ks[2], (N,), minval=0.0, maxval=1.2, dtype=jnp.float32)
    La = La.at[0].set(0.0)

    def lin(k, din, dout):
        kw, kb = jax.random.split(k)
        return (0.1 * jax.random.normal(kw, (din, dout), dtype=jnp.float32),
                0.05 * jax.random.normal(kb, (dout,), dtype=jnp.float32))

    b_dims = [(IN, HID), (HID, HID), (HID, HID)]     # SLOG_B .W per layer
    l_dims = [(IN, HID), (HID, HID), (HID, OUT)]     # SLOG_N .lines per layer
    # Velocity params per layer: module init (7, 0), plus a 0-exponent case
    # (exercises pow(0, 0) == 1) and non-trivial second filters.
    ve_init = [(7.0, 0.0), (0.0, 0.5), (6.0, 0.25)]

    params = {"ve": [], "Wb": [], "bb": [], "Wl": [], "bl": []}
    kidx = 3
    for i in range(LAYER_NUM):
        params["ve"].append(jnp.array(ve_init[i], dtype=jnp.float32))
        W, b = lin(ks[kidx], *b_dims[i]); kidx += 1
        params["Wb"].append(W); params["bb"].append(b)
        W, b = lin(ks[kidx], *l_dims[i]); kidx += 1
        params["Wl"].append(W); params["bl"].append(b)
    params["Wmlp"], params["bmlp"] = lin(ks[kidx], HID, OUT)

    fwd = jax.jit(slog_n_forward, static_argnames=("block",))
    out, _ = fwd(params, X, La, U, block=BLOCK)
    out = np.asarray(jax.block_until_ready(out))

    # Tight check against a reference using the same bf16 MXU-operand precision
    # (proves the kernels compute exactly the intended math).
    ref_bf16 = np.asarray(_ref_forward(params, X, La, U, matmul_dtype=jnp.bfloat16))
    np.testing.assert_allclose(out, ref_bf16, rtol=5e-3, atol=5e-3)

    # Loose sanity check against the full-f32 semantics of the torch module
    # (only difference is bf16 rounding of the streamed U / carried features).
    ref_f32 = np.asarray(_ref_forward(params, X, La, U, matmul_dtype=jnp.float32))
    np.testing.assert_allclose(out, ref_f32, rtol=1e-1, atol=1e-1)

    print("KERNEL_OK")
</pallas_src>

<mosaic_0001>
module attributes {stable_mosaic.version = 11 : i64} {
  func.func @_spectral_stage_kernel(%arg0: i32, %arg1: i32, %arg2: memref<128x128xbf16, #tpu.memory_space<vmem>>, %arg3: memref<128x16xf32, #tpu.memory_space<vmem>>, %arg4: memref<128x1xf32, #tpu.memory_space<vmem>>, %arg5: memref<128x16xf32, #tpu.memory_space<vmem>>, %arg6: memref<128x16xf32, #tpu.memory_space<vmem>>) attributes {dimension_semantics = [#tpu.dimension_semantics<parallel>, #tpu.dimension_semantics<arbitrary>], iteration_bounds = array<i64: 3, 3>, scalar_prefetch = 0 : i64, scratch_operands = 1 : i64, tpu.core_type = #tpu.core_type<tc>, window_params = [{transform_indices = @transform_0, window_bounds = array<i64: 128, 128>}, {transform_indices = @transform_1, window_bounds = array<i64: 128, 16>}, {transform_indices = @transform_2, window_bounds = array<i64: 128, 1>}, {transform_indices = @transform_3, window_bounds = array<i64: 128, 16>}]} {
    %c0_i32 = arith.constant 0 : i32
    %0 = arith.cmpi eq, %arg1, %c0_i32 : i32
    %1 = arith.extui %0 : i1 to i32
    %c0_i32_0 = arith.constant 0 : i32
    %2 = arith.cmpi ne, %1, %c0_i32_0 : i32
    scf.if %2 {
      %cst_9 = arith.constant 0.000000e+00 : f32
      %13 = vector.broadcast %cst_9 : f32 to vector<128x16xf32>
      %c0_10 = arith.constant 0 : index
      %c0_11 = arith.constant 0 : index
      %14 = vector.load %arg6[%c0_10, %c0_11] : memref<128x16xf32, #tpu.memory_space<vmem>>, vector<128x16xf32>
      tpu.vector_store %arg6[%c0_10, %c0_11], %13 {strides = array<i32>} : memref<128x16xf32, #tpu.memory_space<vmem>>, vector<128x16xf32>,
    } else {
    }
    %c0 = arith.constant 0 : index
    %c0_1 = arith.constant 0 : index
    %3 = vector.load %arg6[%c0, %c0_1] : memref<128x16xf32, #tpu.memory_space<vmem>>, vector<128x16xf32>
    %c0_2 = arith.constant 0 : index
    %c0_3 = arith.constant 0 : index
    %4 = vector.load %arg2[%c0_2, %c0_3] : memref<128x128xbf16, #tpu.memory_space<vmem>>, vector<128x128xbf16>
    %c0_4 = arith.constant 0 : index
    %c0_5 = arith.constant 0 : index
    %5 = vector.load %arg3[%c0_4, %c0_5] : memref<128x16xf32, #tpu.memory_space<vmem>>, vector<128x16xf32>
    %6 = arith.truncf %5 : vector<128x16xf32> to vector<128x16xbf16>
    %cst = arith.constant dense<0.000000e+00> : vector<128x16xf32>
    %7 = tpu.matmul %4, %6, %cst {dimension_numbers = #tpu.dot_dimension_numbers<[1], [0], [0], [1], [0, 0, 1, 1], [], []>} : vector<128x128xbf16>, vector<128x16xbf16>, vector<128x16xf32> -> vector<128x16xf32>
    %8 = arith.addf %3, %7 : vector<128x16xf32>
    %c0_6 = arith.constant 0 : index
    %c0_7 = arith.constant 0 : index
    %9 = vector.load %arg6[%c0_6, %c0_7] : memref<128x16xf32, #tpu.memory_space<vmem>>, vector<128x16xf32>
    tpu.vector_store %arg6[%c0_6, %c0_7], %8 {strides = array<i32>} : memref<128x16xf32, #tpu.memory_space<vmem>>, vector<128x16xf32>,
    %c2_i32 = arith.constant 2 : i32
    %10 = arith.cmpi eq, %arg1, %c2_i32 : i32
    %11 = arith.extui %10 : i1 to i32
    %c0_i32_8 = arith.constant 0 : i32
    %12 = arith.cmpi ne, %11, %c0_i32_8 : i32
    scf.if %12 {
      %c0_9 = arith.constant 0 : index
      %c0_10 = arith.constant 0 : index
      %13 = vector.load %arg4[%c0_9, %c0_10] : memref<128x1xf32, #tpu.memory_space<vmem>>, vector<128x1xf32>
      %c0_11 = arith.constant 0 : index
      %c0_12 = arith.constant 0 : index
      %14 = vector.load %arg6[%c0_11, %c0_12] : memref<128x16xf32, #tpu.memory_space<vmem>>, vector<128x16xf32>
      %15 = vector.broadcast %13 : vector<128x1xf32> to vector<128x16xf32>
      %16 = arith.mulf %15, %14 : vector<128x16xf32>
      %c0_13 = arith.constant 0 : index
      %c0_14 = arith.constant 0 : index
      %17 = vector.load %arg5[%c0_13, %c0_14] : memref<128x16xf32, #tpu.memory_space<vmem>>, vector<128x16xf32>
      tpu.vector_store %arg5[%c0_13, %c0_14], %16 {strides = array<i32>} : memref<128x16xf32, #tpu.memory_space<vmem>>, vector<128x16xf32>,
    } else {
    }
    return
  }
  func.func @transform_0(%arg0: i32, %arg1: i32) -> (i32, i32) {
    %c0_i32 = arith.constant 0 : i32
    return %arg0, %arg1 : i32, i32
  }
  func.func @transform_1(%arg0: i32, %arg1: i32) -> (i32, i32) {
    %c0_i32 = arith.constant 0 : i32
    %c0_i32_0 = arith.constant 0 : i32
    return %arg1, %c0_i32 : i32, i32
  }
  func.func @transform_2(%arg0: i32, %arg1: i32) -> (i32, i32) {
    %c0_i32 = arith.constant 0 : i32
    %c0_i32_0 = arith.constant 0 : i32
    return %arg0, %c0_i32 : i32, i32
  }
  func.func @transform_3(%arg0: i32, %arg1: i32) -> (i32, i32) {
    %c0_i32 = arith.constant 0 : i32
    %c0_i32_0 = arith.constant 0 : i32
    return %arg0, %c0_i32 : i32, i32
  }
}

module attributes {stable_mosaic.version = 11 : i64} {
  func.func @_layer_residual_kernel(%arg0: i32, %arg1: i32, %arg2: memref<128x128xbf16, #tpu.memory_space<vmem>>, %arg3: memref<128x16xf32, #tpu.memory_space<vmem>>, %arg4: memref<128x16xf32, #tpu.memory_space<vmem>>, %arg5: memref<16x32xf32, #tpu.memory_space<vmem>>, %arg6: memref<1x32xf32, #tpu.memory_space<vmem>>, %arg7: memref<16x32xf32, #tpu.memory_space<vmem>>, %arg8: memref<1x32xf32, #tpu.memory_space<vmem>>, %arg9: memref<128x32xf32, #tpu.memory_space<vmem>>, %arg10: memref<128x16xf32, #tpu.memory_space<vmem>>) attributes {dimension_semantics = [#tpu.dimension_semantics<parallel>, #tpu.dimension_semantics<arbitrary>], iteration_bounds = array<i64: 3, 3>, scalar_prefetch = 0 : i64, scratch_operands = 1 : i64, tpu.core_type = #tpu.core_type<tc>, window_params = [{transform_indices = @transform_0, window_bounds = array<i64: 128, 128>}, {transform_indices = @transform_1, window_bounds = array<i64: 128, 16>}, {transform_indices = @transform_2, window_bounds = array<i64: 128, 16>}, {pipeline_mode = #tpu.pipeline_mode<synchronous>, transform_indices = @transform_3, window_bounds = array<i64: 16, 32>}, {pipeline_mode = #tpu.pipeline_mode<synchronous>, transform_indices = @transform_4, window_bounds = array<i64: 1, 32>}, {pipeline_mode = #tpu.pipeline_mode<synchronous>, transform_indices = @transform_5, window_bounds = array<i64: 16, 32>}, {pipeline_mode = #tpu.pipeline_mode<synchronous>, transform_indices = @transform_6, window_bounds = array<i64: 1, 32>}, {transform_indices = @transform_7, window_bounds = array<i64: 128, 32>}]} {
    %c0_i32 = arith.constant 0 : i32
    %0 = arith.cmpi eq, %arg1, %c0_i32 : i32
    %1 = arith.extui %0 : i1 to i32
    %c0_i32_0 = arith.constant 0 : i32
    %2 = arith.cmpi ne, %1, %c0_i32_0 : i32
    scf.if %2 {
      %cst_9 = arith.constant 0.000000e+00 : f32
      %13 = vector.broadcast %cst_9 : f32 to vector<128x16xf32>
      %c0_10 = arith.constant 0 : index
      %c0_11 = arith.constant 0 : index
      %14 = vector.load %arg10[%c0_10, %c0_11] : memref<128x16xf32, #tpu.memory_space<vmem>>, vector<128x16xf32>
      tpu.vector_store %arg10[%c0_10, %c0_11], %13 {strides = array<i32>} : memref<128x16xf32, #tpu.memory_space<vmem>>, vector<128x16xf32>,
    } else {
    }
    %c0 = arith.constant 0 : index
    %c0_1 = arith.constant 0 : index
    %3 = vector.load %arg10[%c0, %c0_1] : memref<128x16xf32, #tpu.memory_space<vmem>>, vector<128x16xf32>
    %c0_2 = arith.constant 0 : index
    %c0_3 = arith.constant 0 : index
    %4 = vector.load %arg2[%c0_2, %c0_3] : memref<128x128xbf16, #tpu.memory_space<vmem>>, vector<128x128xbf16>
    %c0_4 = arith.constant 0 : index
    %c0_5 = arith.constant 0 : index
    %5 = vector.load %arg3[%c0_4, %c0_5] : memref<128x16xf32, #tpu.memory_space<vmem>>, vector<128x16xf32>
    %6 = arith.truncf %5 : vector<128x16xf32> to vector<128x16xbf16>
    %cst = arith.constant dense<0.000000e+00> : vector<128x16xf32>
    %7 = tpu.matmul %4, %6, %cst {dimension_numbers = #tpu.dot_dimension_numbers<[1], [0], [0], [1], [0, 0, 1, 1], [], []>} : vector<128x128xbf16>, vector<128x16xbf16>, vector<128x16xf32> -> vector<128x16xf32>
    %8 = arith.addf %3, %7 : vector<128x16xf32>
    %c0_6 = arith.constant 0 : index
    %c0_7 = arith.constant 0 : index
    %9 = vector.load %arg10[%c0_6, %c0_7] : memref<128x16xf32, #tpu.memory_space<vmem>>, vector<128x16xf32>
    tpu.vector_store %arg10[%c0_6, %c0_7], %8 {strides = array<i32>} : memref<128x16xf32, #tpu.memory_space<vmem>>, vector<128x16xf32>,
    %c2_i32 = arith.constant 2 : i32
    %10 = arith.cmpi eq, %arg1, %c2_i32 : i32
    %11 = arith.extui %10 : i1 to i32
    %c0_i32_8 = arith.constant 0 : i32
    %12 = arith.cmpi ne, %11, %c0_i32_8 : i32
    scf.if %12 {
      %c0_9 = arith.constant 0 : index
      %c0_10 = arith.constant 0 : index
      %13 = vector.load %arg10[%c0_9, %c0_10] : memref<128x16xf32, #tpu.memory_space<vmem>>, vector<128x16xf32>
      %c0_11 = arith.constant 0 : index
      %c0_12 = arith.constant 0 : index
      %14 = vector.load %arg5[%c0_11, %c0_12] : memref<16x32xf32, #tpu.memory_space<vmem>>, vector<16x32xf32>
      %cst_13 = arith.constant dense<0.000000e+00> : vector<128x32xf32>
      %15 = tpu.matmul %13, %14, %cst_13 {dimension_numbers = #tpu.dot_dimension_numbers<[1], [0], [0], [1], [0, 0, 1, 1], [], []>} : vector<128x16xf32>, vector<16x32xf32>, vector<128x32xf32> -> vector<128x32xf32>
      %c0_14 = arith.constant 0 : index
      %c0_15 = arith.constant 0 : index
      %16 = vector.load %arg6[%c0_14, %c0_15] : memref<1x32xf32, #tpu.memory_space<vmem>>, vector<1x32xf32>
      %17 = vector.broadcast %16 : vector<1x32xf32> to vector<128x32xf32>
      %18 = arith.addf %15, %17 : vector<128x32xf32>
      %cst_16 = arith.constant 0.999994993 : f32
      %19 = vector.broadcast %cst_16 : f32 to vector<128x32xf32>
      %20 = arith.mulf %18, %19 : vector<128x32xf32>
      %cst_17 = arith.constant 0.000000e+00 : f32
      %21 = vector.broadcast %cst_17 : f32 to vector<128x32xf32>
      %22 = arith.maximumf %20, %21 : vector<128x32xf32>
      %c0_18 = arith.constant 0 : index
      %c0_19 = arith.constant 0 : index
      %23 = vector.load %arg4[%c0_18, %c0_19] : memref<128x16xf32, #tpu.memory_space<vmem>>, vector<128x16xf32>
      %c0_20 = arith.constant 0 : index
      %c0_21 = arith.constant 0 : index
      %24 = vector.load %arg7[%c0_20, %c0_21] : memref<16x32xf32, #tpu.memory_space<vmem>>, vector<16x32xf32>
      %cst_22 = arith.constant dense<0.000000e+00> : vector<128x32xf32>
      %25 = tpu.matmul %23, %24, %cst_22 {dimension_numbers = #tpu.dot_dimension_numbers<[1], [0], [0], [1], [0, 0, 1, 1], [], []>} : vector<128x16xf32>, vector<16x32xf32>, vector<128x32xf32> -> vector<128x32xf32>
      %c0_23 = arith.constant 0 : index
      %c0_24 = arith.constant 0 : index
      %26 = vector.load %arg8[%c0_23, %c0_24] : memref<1x32xf32, #tpu.memory_space<vmem>>, vector<1x32xf32>
      %27 = vector.broadcast %26 : vector<1x32xf32> to vector<128x32xf32>
      %28 = arith.addf %25, %27 : vector<128x32xf32>
      %29 = arith.addf %22, %28 : vector<128x32xf32>
      %cst_25 = arith.constant 0.000000e+00 : f32
      %30 = vector.broadcast %cst_25 : f32 to vector<128x32xf32>
      %31 = arith.maximumf %29, %30 : vector<128x32xf32>
      %cst_26 = arith.constant 0.999994993 : f32
      %32 = vector.broadcast %cst_26 : f32 to vector<128x32xf32>
      %33 = arith.mulf %31, %32 : vector<128x32xf32>
      %c0_27 = arith.constant 0 : index
      %c0_28 = arith.constant 0 : index
      %34 = vector.load %arg9[%c0_27, %c0_28] : memref<128x32xf32, #tpu.memory_space<vmem>>, vector<128x32xf32>
      tpu.vector_store %arg9[%c0_27, %c0_28], %33 {strides = array<i32>} : memref<128x32xf32, #tpu.memory_space<vmem>>, vector<128x32xf32>,
    } else {
    }
    return
  }
  func.func @transform_0(%arg0: i32, %arg1: i32) -> (i32, i32) {
    %c0_i32 = arith.constant 0 : i32
    return %arg0, %arg1 : i32, i32
  }
  func.func @transform_1(%arg0: i32, %arg1: i32) -> (i32, i32) {
    %c0_i32 = arith.constant 0 : i32
    %c0_i32_0 = arith.constant 0 : i32
    return %arg1, %c0_i32 : i32, i32
  }
  func.func @transform_2(%arg0: i32, %arg1: i32) -> (i32, i32) {
    %c0_i32 = arith.constant 0 : i32
    %c0_i32_0 = arith.constant 0 : i32
    return %arg0, %c0_i32 : i32, i32
  }
  func.func @transform_3(%arg0: i32, %arg1: i32) -> (i32, i32) {
    %c0_i32 = arith.constant 0 : i32
    %c0_i32_0 = arith.constant 0 : i32
    %c0_i32_1 = arith.constant 0 : i32
    return %c0_i32, %c0_i32_0 : i32, i32
  }
  func.func @transform_4(%arg0: i32, %arg1: i32) -> (i32, i32) {
    %c0_i32 = arith.constant 0 : i32
    %c0_i32_0 = arith.constant 0 : i32
    %c0_i32_1 = arith.constant 0 : i32
    return %c0_i32, %c0_i32_0 : i32, i32
  }
  func.func @transform_5(%arg0: i32, %arg1: i32) -> (i32, i32) {
    %c0_i32 = arith.constant 0 : i32
    %c0_i32_0 = arith.constant 0 : i32
    %c0_i32_1 = arith.constant 0 : i32
    return %c0_i32, %c0_i32_0 : i32, i32
  }
  func.func @transform_6(%arg0: i32, %arg1: i32) -> (i32, i32) {
    %c0_i32 = arith.constant 0 : i32
    %c0_i32_0 = arith.constant 0 : i32
    %c0_i32_1 = arith.constant 0 : i32
    return %c0_i32, %c0_i32_0 : i32, i32
  }
  func.func @transform_7(%arg0: i32, %arg1: i32) -> (i32, i32) {
    %c0_i32 = arith.constant 0 : i32
    %c0_i32_0 = arith.constant 0 : i32
    return %arg0, %c0_i32 : i32, i32
  }
}

module attributes {stable_mosaic.version = 11 : i64} {
  func.func @_spectral_stage_kernel(%arg0: i32, %arg1: i32, %arg2: memref<128x128xbf16, #tpu.memory_space<vmem>>, %arg3: memref<128x32xf32, #tpu.memory_space<vmem>>, %arg4: memref<128x1xf32, #tpu.memory_space<vmem>>, %arg5: memref<128x32xf32, #tpu.memory_space<vmem>>, %arg6: memref<128x32xf32, #tpu.memory_space<vmem>>) attributes {dimension_semantics = [#tpu.dimension_semantics<parallel>, #tpu.dimension_semantics<arbitrary>], iteration_bounds = array<i64: 3, 3>, scalar_prefetch = 0 : i64, scratch_operands = 1 : i64, tpu.core_type = #tpu.core_type<tc>, window_params = [{transform_indices = @transform_0, window_bounds = array<i64: 128, 128>}, {transform_indices = @transform_1, window_bounds = array<i64: 128, 32>}, {transform_indices = @transform_2, window_bounds = array<i64: 128, 1>}, {transform_indices = @transform_3, window_bounds = array<i64: 128, 32>}]} {
    %c0_i32 = arith.constant 0 : i32
    %0 = arith.cmpi eq, %arg1, %c0_i32 : i32
    %1 = arith.extui %0 : i1 to i32
    %c0_i32_0 = arith.constant 0 : i32
    %2 = arith.cmpi ne, %1, %c0_i32_0 : i32
    scf.if %2 {
      %cst_9 = arith.constant 0.000000e+00 : f32
      %13 = vector.broadcast %cst_9 : f32 to vector<128x32xf32>
      %c0_10 = arith.constant 0 : index
      %c0_11 = arith.constant 0 : index
      %14 = vector.load %arg6[%c0_10, %c0_11] : memref<128x32xf32, #tpu.memory_space<vmem>>, vector<128x32xf32>
      tpu.vector_store %arg6[%c0_10, %c0_11], %13 {strides = array<i32>} : memref<128x32xf32, #tpu.memory_space<vmem>>, vector<128x32xf32>,
    } else {
    }
    %c0 = arith.constant 0 : index
    %c0_1 = arith.constant 0 : index
    %3 = vector.load %arg6[%c0, %c0_1] : memref<128x32xf32, #tpu.memory_space<vmem>>, vector<128x32xf32>
    %c0_2 = arith.constant 0 : index
    %c0_3 = arith.constant 0 : index
    %4 = vector.load %arg2[%c0_2, %c0_3] : memref<128x128xbf16, #tpu.memory_space<vmem>>, vector<128x128xbf16>
    %c0_4 = arith.constant 0 : index
    %c0_5 = arith.constant 0 : index
    %5 = vector.load %arg3[%c0_4, %c0_5] : memref<128x32xf32, #tpu.memory_space<vmem>>, vector<128x32xf32>
    %6 = arith.truncf %5 : vector<128x32xf32> to vector<128x32xbf16>
    %cst = arith.constant dense<0.000000e+00> : vector<128x32xf32>
    %7 = tpu.matmul %4, %6, %cst {dimension_numbers = #tpu.dot_dimension_numbers<[1], [0], [0], [1], [0, 0, 1, 1], [], []>} : vector<128x128xbf16>, vector<128x32xbf16>, vector<128x32xf32> -> vector<128x32xf32>
    %8 = arith.addf %3, %7 : vector<128x32xf32>
    %c0_6 = arith.constant 0 : index
    %c0_7 = arith.constant 0 : index
    %9 = vector.load %arg6[%c0_6, %c0_7] : memref<128x32xf32, #tpu.memory_space<vmem>>, vector<128x32xf32>
    tpu.vector_store %arg6[%c0_6, %c0_7], %8 {strides = array<i32>} : memref<128x32xf32, #tpu.memory_space<vmem>>, vector<128x32xf32>,
    %c2_i32 = arith.constant 2 : i32
    %10 = arith.cmpi eq, %arg1, %c2_i32 : i32
    %11 = arith.extui %10 : i1 to i32
    %c0_i32_8 = arith.constant 0 : i32
    %12 = arith.cmpi ne, %11, %c0_i32_8 : i32
    scf.if %12 {
      %c0_9 = arith.constant 0 : index
      %c0_10 = arith.constant 0 : index
      %13 = vector.load %arg4[%c0_9, %c0_10] : memref<128x1xf32, #tpu.memory_space<vmem>>, vector<128x1xf32>
      %c0_11 = arith.constant 0 : index
      %c0_12 = arith.constant 0 : index
      %14 = vector.load %arg6[%c0_11, %c0_12] : memref<128x32xf32, #tpu.memory_space<vmem>>, vector<128x32xf32>
      %15 = vector.broadcast %13 : vector<128x1xf32> to vector<128x32xf32>
      %16 = arith.mulf %15, %14 : vector<128x32xf32>
      %c0_13 = arith.constant 0 : index
      %c0_14 = arith.constant 0 : index
      %17 = vector.load %arg5[%c0_13, %c0_14] : memref<128x32xf32, #tpu.memory_space<vmem>>, vector<128x32xf32>
      tpu.vector_store %arg5[%c0_13, %c0_14], %16 {strides = array<i32>} : memref<128x32xf32, #tpu.memory_space<vmem>>, vector<128x32xf32>,
    } else {
    }
    return
  }
  func.func @transform_0(%arg0: i32, %arg1: i32) -> (i32, i32) {
    %c0_i32 = arith.constant 0 : i32
    return %arg0, %arg1 : i32, i32
  }
  func.func @transform_1(%arg0: i32, %arg1: i32) -> (i32, i32) {
    %c0_i32 = arith.constant 0 : i32
    %c0_i32_0 = arith.constant 0 : i32
    return %arg1, %c0_i32 : i32, i32
  }
  func.func @transform_2(%arg0: i32, %arg1: i32) -> (i32, i32) {
    %c0_i32 = arith.constant 0 : i32
    %c0_i32_0 = arith.constant 0 : i32
    return %arg0, %c0_i32 : i32, i32
  }
  func.func @transform_3(%arg0: i32, %arg1: i32) -> (i32, i32) {
    %c0_i32 = arith.constant 0 : i32
    %c0_i32_0 = arith.constant 0 : i32
    return %arg0, %c0_i32 : i32, i32
  }
}

module attributes {stable_mosaic.version = 11 : i64} {
  func.func @_layer_residual_kernel(%arg0: i32, %arg1: i32, %arg2: memref<128x128xbf16, #tpu.memory_space<vmem>>, %arg3: memref<128x32xf32, #tpu.memory_space<vmem>>, %arg4: memref<128x32xf32, #tpu.memory_space<vmem>>, %arg5: memref<32x32xf32, #tpu.memory_space<vmem>>, %arg6: memref<1x32xf32, #tpu.memory_space<vmem>>, %arg7: memref<32x32xf32, #tpu.memory_space<vmem>>, %arg8: memref<1x32xf32, #tpu.memory_space<vmem>>, %arg9: memref<128x32xf32, #tpu.memory_space<vmem>>, %arg10: memref<128x32xf32, #tpu.memory_space<vmem>>) attributes {dimension_semantics = [#tpu.dimension_semantics<parallel>, #tpu.dimension_semantics<arbitrary>], iteration_bounds = array<i64: 3, 3>, scalar_prefetch = 0 : i64, scratch_operands = 1 : i64, tpu.core_type = #tpu.core_type<tc>, window_params = [{transform_indices = @transform_0, window_bounds = array<i64: 128, 128>}, {transform_indices = @transform_1, window_bounds = array<i64: 128, 32>}, {transform_indices = @transform_2, window_bounds = array<i64: 128, 32>}, {pipeline_mode = #tpu.pipeline_mode<synchronous>, transform_indices = @transform_3, window_bounds = array<i64: 32, 32>}, {pipeline_mode = #tpu.pipeline_mode<synchronous>, transform_indices = @transform_4, window_bounds = array<i64: 1, 32>}, {pipeline_mode = #tpu.pipeline_mode<synchronous>, transform_indices = @transform_5, window_bounds = array<i64: 32, 32>}, {pipeline_mode = #tpu.pipeline_mode<synchronous>, transform_indices = @transform_6, window_bounds = array<i64: 1, 32>}, {transform_indices = @transform_7, window_bounds = array<i64: 128, 32>}]} {
    %c0_i32 = arith.constant 0 : i32
    %0 = arith.cmpi eq, %arg1, %c0_i32 : i32
    %1 = arith.extui %0 : i1 to i32
    %c0_i32_0 = arith.constant 0 : i32
    %2 = arith.cmpi ne, %1, %c0_i32_0 : i32
    scf.if %2 {
      %cst_9 = arith.constant 0.000000e+00 : f32
      %13 = vector.broadcast %cst_9 : f32 to vector<128x32xf32>
      %c0_10 = arith.constant 0 : index
      %c0_11 = arith.constant 0 : index
      %14 = vector.load %arg10[%c0_10, %c0_11] : memref<128x32xf32, #tpu.memory_space<vmem>>, vector<128x32xf32>
      tpu.vector_store %arg10[%c0_10, %c0_11], %13 {strides = array<i32>} : memref<128x32xf32, #tpu.memory_space<vmem>>, vector<128x32xf32>,
    } else {
    }
    %c0 = arith.constant 0 : index
    %c0_1 = arith.constant 0 : index
    %3 = vector.load %arg10[%c0, %c0_1] : memref<128x32xf32, #tpu.memory_space<vmem>>, vector<128x32xf32>
    %c0_2 = arith.constant 0 : index
    %c0_3 = arith.constant 0 : index
    %4 = vector.load %arg2[%c0_2, %c0_3] : memref<128x128xbf16, #tpu.memory_space<vmem>>, vector<128x128xbf16>
    %c0_4 = arith.constant 0 : index
    %c0_5 = arith.constant 0 : index
    %5 = vector.load %arg3[%c0_4, %c0_5] : memref<128x32xf32, #tpu.memory_space<vmem>>, vector<128x32xf32>
    %6 = arith.truncf %5 : vector<128x32xf32> to vector<128x32xbf16>
    %cst = arith.constant dense<0.000000e+00> : vector<128x32xf32>
    %7 = tpu.matmul %4, %6, %cst {dimension_numbers = #tpu.dot_dimension_numbers<[1], [0], [0], [1], [0, 0, 1, 1], [], []>} : vector<128x128xbf16>, vector<128x32xbf16>, vector<128x32xf32> -> vector<128x32xf32>
    %8 = arith.addf %3, %7 : vector<128x32xf32>
    %c0_6 = arith.constant 0 : index
    %c0_7 = arith.constant 0 : index
    %9 = vector.load %arg10[%c0_6, %c0_7] : memref<128x32xf32, #tpu.memory_space<vmem>>, vector<128x32xf32>
    tpu.vector_store %arg10[%c0_6, %c0_7], %8 {strides = array<i32>} : memref<128x32xf32, #tpu.memory_space<vmem>>, vector<128x32xf32>,
    %c2_i32 = arith.constant 2 : i32
    %10 = arith.cmpi eq, %arg1, %c2_i32 : i32
    %11 = arith.extui %10 : i1 to i32
    %c0_i32_8 = arith.constant 0 : i32
    %12 = arith.cmpi ne, %11, %c0_i32_8 : i32
    scf.if %12 {
      %c0_9 = arith.constant 0 : index
      %c0_10 = arith.constant 0 : index
      %13 = vector.load %arg10[%c0_9, %c0_10] : memref<128x32xf32, #tpu.memory_space<vmem>>, vector<128x32xf32>
      %c0_11 = arith.constant 0 : index
      %c0_12 = arith.constant 0 : index
      %14 = vector.load %arg5[%c0_11, %c0_12] : memref<32x32xf32, #tpu.memory_space<vmem>>, vector<32x32xf32>
      %cst_13 = arith.constant dense<0.000000e+00> : vector<128x32xf32>
      %15 = tpu.matmul %13, %14, %cst_13 {dimension_numbers = #tpu.dot_dimension_numbers<[1], [0], [0], [1], [0, 0, 1, 1], [], []>} : vector<128x32xf32>, vector<32x32xf32>, vector<128x32xf32> -> vector<128x32xf32>
      %c0_14 = arith.constant 0 : index
      %c0_15 = arith.constant 0 : index
      %16 = vector.load %arg6[%c0_14, %c0_15] : memref<1x32xf32, #tpu.memory_space<vmem>>, vector<1x32xf32>
      %17 = vector.broadcast %16 : vector<1x32xf32> to vector<128x32xf32>
      %18 = arith.addf %15, %17 : vector<128x32xf32>
      %cst_16 = arith.constant 0.999994993 : f32
      %19 = vector.broadcast %cst_16 : f32 to vector<128x32xf32>
      %20 = arith.mulf %18, %19 : vector<128x32xf32>
      %cst_17 = arith.constant 0.000000e+00 : f32
      %21 = vector.broadcast %cst_17 : f32 to vector<128x32xf32>
      %22 = arith.maximumf %20, %21 : vector<128x32xf32>
      %c0_18 = arith.constant 0 : index
      %c0_19 = arith.constant 0 : index
      %23 = vector.load %arg4[%c0_18, %c0_19] : memref<128x32xf32, #tpu.memory_space<vmem>>, vector<128x32xf32>
      %c0_20 = arith.constant 0 : index
      %c0_21 = arith.constant 0 : index
      %24 = vector.load %arg7[%c0_20, %c0_21] : memref<32x32xf32, #tpu.memory_space<vmem>>, vector<32x32xf32>
      %cst_22 = arith.constant dense<0.000000e+00> : vector<128x32xf32>
      %25 = tpu.matmul %23, %24, %cst_22 {dimension_numbers = #tpu.dot_dimension_numbers<[1], [0], [0], [1], [0, 0, 1, 1], [], []>} : vector<128x32xf32>, vector<32x32xf32>, vector<128x32xf32> -> vector<128x32xf32>
      %c0_23 = arith.constant 0 : index
      %c0_24 = arith.constant 0 : index
      %26 = vector.load %arg8[%c0_23, %c0_24] : memref<1x32xf32, #tpu.memory_space<vmem>>, vector<1x32xf32>
      %27 = vector.broadcast %26 : vector<1x32xf32> to vector<128x32xf32>
      %28 = arith.addf %25, %27 : vector<128x32xf32>
      %29 = arith.addf %22, %28 : vector<128x32xf32>
      %cst_25 = arith.constant 0.000000e+00 : f32
      %30 = vector.broadcast %cst_25 : f32 to vector<128x32xf32>
      %31 = arith.maximumf %29, %30 : vector<128x32xf32>
      %cst_26 = arith.constant 0.999994993 : f32
      %32 = vector.broadcast %cst_26 : f32 to vector<128x32xf32>
      %33 = arith.mulf %31, %32 : vector<128x32xf32>
      %c0_27 = arith.constant 0 : index
      %c0_28 = arith.constant 0 : index
      %34 = vector.load %arg9[%c0_27, %c0_28] : memref<128x32xf32, #tpu.memory_space<vmem>>, vector<128x32xf32>
      tpu.vector_store %arg9[%c0_27, %c0_28], %33 {strides = array<i32>} : memref<128x32xf32, #tpu.memory_space<vmem>>, vector<128x32xf32>,
    } else {
    }
    return
  }
  func.func @transform_0(%arg0: i32, %arg1: i32) -> (i32, i32) {
    %c0_i32 = arith.constant 0 : i32
    return %arg0, %arg1 : i32, i32
  }
  func.func @transform_1(%arg0: i32, %arg1: i32) -> (i32, i32) {
    %c0_i32 = arith.constant 0 : i32
    %c0_i32_0 = arith.constant 0 : i32
    return %arg1, %c0_i32 : i32, i32
  }
  func.func @transform_2(%arg0: i32, %arg1: i32) -> (i32, i32) {
    %c0_i32 = arith.constant 0 : i32
    %c0_i32_0 = arith.constant 0 : i32
    return %arg0, %c0_i32 : i32, i32
  }
  func.func @transform_3(%arg0: i32, %arg1: i32) -> (i32, i32) {
    %c0_i32 = arith.constant 0 : i32
    %c0_i32_0 = arith.constant 0 : i32
    %c0_i32_1 = arith.constant 0 : i32
    return %c0_i32, %c0_i32_0 : i32, i32
  }
  func.func @transform_4(%arg0: i32, %arg1: i32) -> (i32, i32) {
    %c0_i32 = arith.constant 0 : i32
    %c0_i32_0 = arith.constant 0 : i32
    %c0_i32_1 = arith.constant 0 : i32
    return %c0_i32, %c0_i32_0 : i32, i32
  }
  func.func @transform_5(%arg0: i32, %arg1: i32) -> (i32, i32) {
    %c0_i32 = arith.constant 0 : i32
    %c0_i32_0 = arith.constant 0 : i32
    %c0_i32_1 = arith.constant 0 : i32
    return %c0_i32, %c0_i32_0 : i32, i32
  }
  func.func @transform_6(%arg0: i32, %arg1: i32) -> (i32, i32) {
    %c0_i32 = arith.constant 0 : i32
    %c0_i32_0 = arith.constant 0 : i32
    %c0_i32_1 = arith.constant 0 : i32
    return %c0_i32, %c0_i32_0 : i32, i32
  }
  func.func @transform_7(%arg0: i32, %arg1: i32) -> (i32, i32) {
    %c0_i32 = arith.constant 0 : i32
    %c0_i32_0 = arith.constant 0 : i32
    return %arg0, %c0_i32 : i32, i32
  }
}

module attributes {stable_mosaic.version = 11 : i64} {
  func.func @_layer_final_kernel(%arg0: i32, %arg1: i32, %arg2: memref<128x128xbf16, #tpu.memory_space<vmem>>, %arg3: memref<128x32xf32, #tpu.memory_space<vmem>>, %arg4: memref<128x32xf32, #tpu.memory_space<vmem>>, %arg5: memref<32x32xf32, #tpu.memory_space<vmem>>, %arg6: memref<1x32xf32, #tpu.memory_space<vmem>>, %arg7: memref<32x4xf32, #tpu.memory_space<vmem>>, %arg8: memref<1x4xf32, #tpu.memory_space<vmem>>, %arg9: memref<32x4xf32, #tpu.memory_space<vmem>>, %arg10: memref<1x4xf32, #tpu.memory_space<vmem>>, %arg11: memref<128x4xf32, #tpu.memory_space<vmem>>, %arg12: memref<128x32xf32, #tpu.memory_space<vmem>>) attributes {dimension_semantics = [#tpu.dimension_semantics<parallel>, #tpu.dimension_semantics<arbitrary>], iteration_bounds = array<i64: 3, 3>, scalar_prefetch = 0 : i64, scratch_operands = 1 : i64, tpu.core_type = #tpu.core_type<tc>, window_params = [{transform_indices = @transform_0, window_bounds = array<i64: 128, 128>}, {transform_indices = @transform_1, window_bounds = array<i64: 128, 32>}, {transform_indices = @transform_2, window_bounds = array<i64: 128, 32>}, {pipeline_mode = #tpu.pipeline_mode<synchronous>, transform_indices = @transform_3, window_bounds = array<i64: 32, 32>}, {pipeline_mode = #tpu.pipeline_mode<synchronous>, transform_indices = @transform_4, window_bounds = array<i64: 1, 32>}, {pipeline_mode = #tpu.pipeline_mode<synchronous>, transform_indices = @transform_5, window_bounds = array<i64: 32, 4>}, {pipeline_mode = #tpu.pipeline_mode<synchronous>, transform_indices = @transform_6, window_bounds = array<i64: 1, 4>}, {pipeline_mode = #tpu.pipeline_mode<synchronous>, transform_indices = @transform_7, window_bounds = array<i64: 32, 4>}, {pipeline_mode = #tpu.pipeline_mode<synchronous>, transform_indices = @transform_8, window_bounds = array<i64: 1, 4>}, {transform_indices = @transform_9, window_bounds = array<i64: 128, 4>}]} {
    %c0_i32 = arith.constant 0 : i32
    %0 = arith.cmpi eq, %arg1, %c0_i32 : i32
    %1 = arith.extui %0 : i1 to i32
    %c0_i32_0 = arith.constant 0 : i32
    %2 = arith.cmpi ne, %1, %c0_i32_0 : i32
    scf.if %2 {
      %cst_9 = arith.constant 0.000000e+00 : f32
      %13 = vector.broadcast %cst_9 : f32 to vector<128x32xf32>
      %c0_10 = arith.constant 0 : index
      %c0_11 = arith.constant 0 : index
      %14 = vector.load %arg12[%c0_10, %c0_11] : memref<128x32xf32, #tpu.memory_space<vmem>>, vector<128x32xf32>
      tpu.vector_store %arg12[%c0_10, %c0_11], %13 {strides = array<i32>} : memref<128x32xf32, #tpu.memory_space<vmem>>, vector<128x32xf32>,
    } else {
    }
    %c0 = arith.constant 0 : index
    %c0_1 = arith.constant 0 : index
    %3 = vector.load %arg12[%c0, %c0_1] : memref<128x32xf32, #tpu.memory_space<vmem>>, vector<128x32xf32>
    %c0_2 = arith.constant 0 : index
    %c0_3 = arith.constant 0 : index
    %4 = vector.load %arg2[%c0_2, %c0_3] : memref<128x128xbf16, #tpu.memory_space<vmem>>, vector<128x128xbf16>
    %c0_4 = arith.constant 0 : index
    %c0_5 = arith.constant 0 : index
    %5 = vector.load %arg3[%c0_4, %c0_5] : memref<128x32xf32, #tpu.memory_space<vmem>>, vector<128x32xf32>
    %6 = arith.truncf %5 : vector<128x32xf32> to vector<128x32xbf16>
    %cst = arith.constant dense<0.000000e+00> : vector<128x32xf32>
    %7 = tpu.matmul %4, %6, %cst {dimension_numbers = #tpu.dot_dimension_numbers<[1], [0], [0], [1], [0, 0, 1, 1], [], []>} : vector<128x128xbf16>, vector<128x32xbf16>, vector<128x32xf32> -> vector<128x32xf32>
    %8 = arith.addf %3, %7 : vector<128x32xf32>
    %c0_6 = arith.constant 0 : index
    %c0_7 = arith.constant 0 : index
    %9 = vector.load %arg12[%c0_6, %c0_7] : memref<128x32xf32, #tpu.memory_space<vmem>>, vector<128x32xf32>
    tpu.vector_store %arg12[%c0_6, %c0_7], %8 {strides = array<i32>} : memref<128x32xf32, #tpu.memory_space<vmem>>, vector<128x32xf32>,
    %c2_i32 = arith.constant 2 : i32
    %10 = arith.cmpi eq, %arg1, %c2_i32 : i32
    %11 = arith.extui %10 : i1 to i32
    %c0_i32_8 = arith.constant 0 : i32
    %12 = arith.cmpi ne, %11, %c0_i32_8 : i32
    scf.if %12 {
      %c0_9 = arith.constant 0 : index
      %c0_10 = arith.constant 0 : index
      %13 = vector.load %arg12[%c0_9, %c0_10] : memref<128x32xf32, #tpu.memory_space<vmem>>, vector<128x32xf32>
      %c0_11 = arith.constant 0 : index
      %c0_12 = arith.constant 0 : index
      %14 = vector.load %arg5[%c0_11, %c0_12] : memref<32x32xf32, #tpu.memory_space<vmem>>, vector<32x32xf32>
      %cst_13 = arith.constant dense<0.000000e+00> : vector<128x32xf32>
      %15 = tpu.matmul %13, %14, %cst_13 {dimension_numbers = #tpu.dot_dimension_numbers<[1], [0], [0], [1], [0, 0, 1, 1], [], []>} : vector<128x32xf32>, vector<32x32xf32>, vector<128x32xf32> -> vector<128x32xf32>
      %c0_14 = arith.constant 0 : index
      %c0_15 = arith.constant 0 : index
      %16 = vector.load %arg6[%c0_14, %c0_15] : memref<1x32xf32, #tpu.memory_space<vmem>>, vector<1x32xf32>
      %17 = vector.broadcast %16 : vector<1x32xf32> to vector<128x32xf32>
      %18 = arith.addf %15, %17 : vector<128x32xf32>
      %cst_16 = arith.constant 0.999994993 : f32
      %19 = vector.broadcast %cst_16 : f32 to vector<128x32xf32>
      %20 = arith.mulf %18, %19 : vector<128x32xf32>
      %cst_17 = arith.constant 0.000000e+00 : f32
      %21 = vector.broadcast %cst_17 : f32 to vector<128x32xf32>
      %22 = arith.maximumf %20, %21 : vector<128x32xf32>
      %c0_18 = arith.constant 0 : index
      %c0_19 = arith.constant 0 : index
      %23 = vector.load %arg7[%c0_18, %c0_19] : memref<32x4xf32, #tpu.memory_space<vmem>>, vector<32x4xf32>
      %cst_20 = arith.constant dense<0.000000e+00> : vector<128x4xf32>
      %24 = tpu.matmul %22, %23, %cst_20 {dimension_numbers = #tpu.dot_dimension_numbers<[1], [0], [0], [1], [0, 0, 1, 1], [], []>} : vector<128x32xf32>, vector<32x4xf32>, vector<128x4xf32> -> vector<128x4xf32>
      %c0_21 = arith.constant 0 : index
      %c0_22 = arith.constant 0 : index
      %25 = vector.load %arg8[%c0_21, %c0_22] : memref<1x4xf32, #tpu.memory_space<vmem>>, vector<1x4xf32>
      %26 = vector.broadcast %25 : vector<1x4xf32> to vector<128x4xf32>
      %27 = arith.addf %24, %26 : vector<128x4xf32>
      %c0_23 = arith.constant 0 : index
      %c0_24 = arith.constant 0 : index
      %28 = vector.load %arg4[%c0_23, %c0_24] : memref<128x32xf32, #tpu.memory_space<vmem>>, vector<128x32xf32>
      %c0_25 = arith.constant 0 : index
      %c0_26 = arith.constant 0 : index
      %29 = vector.load %arg9[%c0_25, %c0_26] : memref<32x4xf32, #tpu.memory_space<vmem>>, vector<32x4xf32>
      %cst_27 = arith.constant dense<0.000000e+00> : vector<128x4xf32>
      %30 = tpu.matmul %28, %29, %cst_27 {dimension_numbers = #tpu.dot_dimension_numbers<[1], [0], [0], [1], [0, 0, 1, 1], [], []>} : vector<128x32xf32>, vector<32x4xf32>, vector<128x4xf32> -> vector<128x4xf32>
      %c0_28 = arith.constant 0 : index
      %c0_29 = arith.constant 0 : index
      %31 = vector.load %arg10[%c0_28, %c0_29] : memref<1x4xf32, #tpu.memory_space<vmem>>, vector<1x4xf32>
      %32 = vector.broadcast %31 : vector<1x4xf32> to vector<128x4xf32>
      %33 = arith.addf %30, %32 : vector<128x4xf32>
      %34 = arith.negf %27 : vector<128x4xf32>
      %35 = math.exp %34 : vector<128x4xf32>
      %cst_30 = arith.constant 1.000000e+00 : f32
      %36 = vector.broadcast %cst_30 : f32 to vector<128x4xf32>
      %37 = arith.addf %36, %35 : vector<128x4xf32>
      %38 = arith.divf %36, %37 : vector<128x4xf32>
      %39 = arith.addf %38, %33 : vector<128x4xf32>
      %cst_31 = arith.constant dense<0xFF800000> : vector<128xf32>
      %40 = vector.multi_reduction <maximumf>, %39, %cst_31 [1] : vector<128x4xf32> to vector<128xf32>
      %41 = vector.shape_cast %40 : vector<128xf32> to vector<128x1xf32>
      %42 = vector.broadcast %41 : vector<128x1xf32> to vector<128x4xf32>
      %43 = arith.subf %39, %42 : vector<128x4xf32>
      %44 = math.exp %43 : vector<128x4xf32>
      %45 = vector.broadcast %41 : vector<128x1xf32> to vector<128x4xf32>
      %46 = arith.subf %39, %45 : vector<128x4xf32>
      %cst_32 = arith.constant dense<0.000000e+00> : vector<128xf32>
      %47 = vector.multi_reduction <add>, %44, %cst_32 [1] : vector<128x4xf32> to vector<128xf32>
      %48 = vector.shape_cast %47 : vector<128xf32> to vector<128x1xf32>
      %49 = math.log %48 : vector<128x1xf32>
      %50 = vector.broadcast %49 : vector<128x1xf32> to vector<128x4xf32>
      %51 = arith.subf %46, %50 : vector<128x4xf32>
      %c0_33 = arith.constant 0 : index
      %c0_34 = arith.constant 0 : index
      %52 = vector.load %arg11[%c0_33, %c0_34] : memref<128x4xf32, #tpu.memory_space<vmem>>, vector<128x4xf32>
      tpu.vector_store %arg11[%c0_33, %c0_34], %51 {strides = array<i32>} : memref<128x4xf32, #tpu.memory_space<vmem>>, vector<128x4xf32>,
    } else {
    }
    return
  }
  func.func @transform_0(%arg0: i32, %arg1: i32) -> (i32, i32) {
    %c0_i32 = arith.constant 0 : i32
    return %arg0, %arg1 : i32, i32
  }
  func.func @transform_1(%arg0: i32, %arg1: i32) -> (i32, i32) {
    %c0_i32 = arith.constant 0 : i32
    %c0_i32_0 = arith.constant 0 : i32
    return %arg1, %c0_i32 : i32, i32
  }
  func.func @transform_2(%arg0: i32, %arg1: i32) -> (i32, i32) {
    %c0_i32 = arith.constant 0 : i32
    %c0_i32_0 = arith.constant 0 : i32
    return %arg0, %c0_i32 : i32, i32
  }
  func.func @transform_3(%arg0: i32, %arg1: i32) -> (i32, i32) {
    %c0_i32 = arith.constant 0 : i32
    %c0_i32_0 = arith.constant 0 : i32
    %c0_i32_1 = arith.constant 0 : i32
    return %c0_i32, %c0_i32_0 : i32, i32
  }
  func.func @transform_4(%arg0: i32, %arg1: i32) -> (i32, i32) {
    %c0_i32 = arith.constant 0 : i32
    %c0_i32_0 = arith.constant 0 : i32
    %c0_i32_1 = arith.constant 0 : i32
    return %c0_i32, %c0_i32_0 : i32, i32
  }
  func.func @transform_5(%arg0: i32, %arg1: i32) -> (i32, i32) {
    %c0_i32 = arith.constant 0 : i32
    %c0_i32_0 = arith.constant 0 : i32
    %c0_i32_1 = arith.constant 0 : i32
    return %c0_i32, %c0_i32_0 : i32, i32
  }
  func.func @transform_6(%arg0: i32, %arg1: i32) -> (i32, i32) {
    %c0_i32 = arith.constant 0 : i32
    %c0_i32_0 = arith.constant 0 : i32
    %c0_i32_1 = arith.constant 0 : i32
    return %c0_i32, %c0_i32_0 : i32, i32
  }
  func.func @transform_7(%arg0: i32, %arg1: i32) -> (i32, i32) {
    %c0_i32 = arith.constant 0 : i32
    %c0_i32_0 = arith.constant 0 : i32
    %c0_i32_1 = arith.constant 0 : i32
    return %c0_i32, %c0_i32_0 : i32, i32
  }
  func.func @transform_8(%arg0: i32, %arg1: i32) -> (i32, i32) {
    %c0_i32 = arith.constant 0 : i32
    %c0_i32_0 = arith.constant 0 : i32
    %c0_i32_1 = arith.constant 0 : i32
    return %c0_i32, %c0_i32_0 : i32, i32
  }
  func.func @transform_9(%arg0: i32, %arg1: i32) -> (i32, i32) {
    %c0_i32 = arith.constant 0 : i32
    %c0_i32_0 = arith.constant 0 : i32
    return %arg0, %c0_i32 : i32, i32
  }
}

</mosaic_0001>

<bundles_post_ra>
// kernel: slog_n_forward.12
= control target key start
LH: loop header
LB: loop body
LE: loop exit
PB: predicated region body
PF: predicated region fallthrough
CT: control target
= control target key end

     0   :  { %s1078_s12 = smov 0   ;;  %s1080_s13 = smov 0   ;;  %s1305_s0 = inlined_call_operand.vmem [shape: bf16[384,384], index: 0, kind: input, shape index: {}]   ;;  %s1306_s1 = inlined_call_operand.vmem [shape: f32[384,16], index: 1, kind: input, shape index: {}]   ;;  %s1307_s2 = inlined_call_operand.vmem [shape: f32[384,1], index: 2, kind: input, shape index: {}]   ;;  %s1308_s3 = inlined_call_operand.vmem [shape: f32[384,16], index: 3, kind: output, shape index: {}]  }
   0x1   :  { %s1082_s14 = smov 0   ;;  %s1084_s15 = smov 0  }
   0x2   :  { %s1086_s16 = smov 0   ;;  %s1088_s17 = smov 0  }
   0x3   :  { %s1090_s18 = smov 0  }
   0x4 LB: > { %s22_s19 = sadd.s32 1, %s1046_s16  ;;  %s25_s20 = sadd.s32 1, %s1050_s17  ;;  %s1054_s18 = sphi %s1090_s18, %s13_s18   ;;  %s1050_s17 = sphi %s1088_s17, %s1314_s17   ;;  %s1046_s16 = sphi %s1086_s16, %s1313_s16   ;;  %s1042_s15 = sphi %s1084_s15, %s1312_s15   ;;  %s1038_s14 = sphi %s1082_s14, %s1311_s14   ;;  %s1034_s13 = sphi %s1080_s13, %s1310_s13   ;;  %s1030_s12 = sphi %s1078_s12, %s1309_s12  }
   0x5   : > { %p23_p0 = scmp.ge.s32.totalorder %s22_s19, 3  ;;  %p41_p1 = scmp.ne.s32.totalorder %s1034_s13, %s1030_s12 }
   0x6   : > { %p42_p2 = scmp.eq.s32.totalorder %s1054_s18, 0  ;;  %s34_s24 = sadd.s32 1, %s1034_s13 }
   0x7   : > { %s1316_s19 = smov (%p23_p0, %s22_s19), 0  ;;  %s1318_s20 = smov (!%p23_p0, %s25_s20), %s1050_s17 }
   0x8   : > { %p43_p3 = por %p42_p2, %p41_p1  ;;  %p27_p4 = scmp.ge.s32.totalorder %s1318_s20, 3 }
   0x9   : > { %s30_s21 = ssub.s32 %s1046_s16, %s1316_s19  ;;  %p842_p6 = scmp.ge.s32.totalorder %s1054_s18, 9 }
   0xa   : > { %s1320_s20 = smov (%p27_p4, %s1318_s20), 0 }
   0xb   : > { %s29_s22 = ssub.s32 %s1050_s17, %s1320_s20  ;;  %145 = sbr.rel (%p842_p6) target bundleno = 35 (0x23), region = 16 }
   0xc   : > { %s31_s23 = sor.u32 %s30_s21, %s29_s22 }
   0xd   : > { %p32_p5 = scmp.eq.s32.totalorder %s31_s23, 0 }
   0xf   : > { %s1129_s25 = scalar_select %p32_p5, %s1034_s13, %s34_s24  }
  0x12   : > { %148 = sbr.rel (!%p43_p3) target bundleno = 35 (0x23), region = 20  ;;  %s150_s26 = sand.u32 (%p43_p3), 1, %s1034_s13  }
  0x13   : > { %s931_s27 = smul.u32 (%p43_p3), 48, %s1050_s17  ;;  %s843_s28 = sshll.u32 (%p43_p3), %s150_s26, 6 }
  0x14   : > { %s152_s7 = scalar_lea.vmem (%p43_p3), [#allocation3], %s843_s28 }
  0x15   : > { %s155_s29 = sadd.s32 (%p43_p3), %s1046_s16, %s931_s27 }
  0x16   : > { %s846_s30 = sshll.u32 (%p43_p3), %s155_s29, 2 }
  0x17   : > { %s1138_s6 = scalar_lea.vmem (%p43_p3), %s1305_s0, %s846_s30 }
  0x18   : > { %v173_v0 = vld [vmem:[%s1138_s6] sm:$0xf] (%p43_p3)  ;;  %v175_v1 = vld [vmem:[%s1138_s6 + $0xc] sm:$0xf] (%p43_p3)  ;;  %v177_v2 = vld [vmem:[%s1138_s6 + $0x18] sm:$0xf] (%p43_p3) }
  0x19   : > { %174 = vst [vmem:[%s152_s7] sm:$0xf] %v173_v0  ;;  %176 = vst [vmem:[%s152_s7 + $0x4] sm:$0xf] %v175_v1  ;;  %v179_v3 = vld [vmem:[%s1138_s6 + $0x24] sm:$0xf] }
  0x1a   : > { %178 = vst [vmem:[%s152_s7 + $0x8] sm:$0xf] %v177_v2  ;;  %v181_v4 = vld [vmem:[%s1138_s6 + $0x30] sm:$0xf]  ;;  %v183_v5 = vld [vmem:[%s1138_s6 + $0x3c] sm:$0xf] }
  0x1b   : > { %180 = vst [vmem:[%s152_s7 + $0xc] sm:$0xf] %v179_v3  ;;  %182 = vst [vmem:[%s152_s7 + $0x10] sm:$0xf] %v181_v4  ;;  %v185_v6 = vld [vmem:[%s1138_s6 + $0x48] sm:$0xf] }
  0x1c   : > { %184 = vst [vmem:[%s152_s7 + $0x14] sm:$0xf] %v183_v5  ;;  %v187_v7 = vld [vmem:[%s1138_s6 + $0x54] sm:$0xf]  ;;  %v189_v8 = vld [vmem:[%s1138_s6 + $0x60] sm:$0xf] }
  0x1d   : > { %186 = vst [vmem:[%s152_s7 + $0x18] sm:$0xf] %v185_v6  ;;  %188 = vst [vmem:[%s152_s7 + $0x1c] sm:$0xf] %v187_v7  ;;  %v191_v9 = vld [vmem:[%s1138_s6 + $0x6c] sm:$0xf] }
  0x1e   : > { %190 = vst [vmem:[%s152_s7 + $0x20] sm:$0xf] %v189_v8  ;;  %v193_v10 = vld [vmem:[%s1138_s6 + $0x78] sm:$0xf]  ;;  %v195_v11 = vld [vmem:[%s1138_s6 + $0x84] sm:$0xf] }
  0x1f   : > { %192 = vst [vmem:[%s152_s7 + $0x24] sm:$0xf] %v191_v9  ;;  %194 = vst [vmem:[%s152_s7 + $0x28] sm:$0xf] %v193_v10  ;;  %v197_v12 = vld [vmem:[%s1138_s6 + $0x90] sm:$0xf] }
  0x20   : > { %196 = vst [vmem:[%s152_s7 + $0x2c] sm:$0xf] %v195_v11  ;;  %v199_v13 = vld [vmem:[%s1138_s6 + $0x9c] sm:$0xf]  ;;  %v201_v14 = vld [vmem:[%s1138_s6 + $0xa8] sm:$0xf] }
  0x21   : > { %198 = vst [vmem:[%s152_s7 + $0x30] sm:$0xf] %v197_v12  ;;  %200 = vst [vmem:[%s152_s7 + $0x34] sm:$0xf] %v199_v13  ;;  %v203_v15 = vld [vmem:[%s1138_s6 + $0xb4] sm:$0xf] }
  0x22   : > { %202 = vst [vmem:[%s152_s7 + $0x38] sm:$0xf] %v201_v14  ;;  %204 = vst [vmem:[%s152_s7 + $0x3c] sm:$0xf] %v203_v15 }
  0x23 PF: > { %p847_p7 = scmp.ge.s32.totalorder %s1054_s18, 1  ;;  %p276_p8 = scmp.lt.s32.totalorder %s1054_s18, 10 }
  0x25   : > { %p277_p9 = pnand %p847_p7, %p276_p8 }
  0x26   : > { %s283_s8 = sand.u32 (!%p277_p9), 1, %s1030_s12   ;;  %s849_s9 = sshll.u32 (!%p277_p9), %s1038_s14, 4 }
  0x27   : > { %280 = sbr.rel (%p277_p9) target bundleno = 435 (0x1b3), region = 69  ;;  %s848_s10 = sshll.u32 (!%p277_p9), %s283_s8, 6 }
  0x28   : > { %p318_p10 = scmp.lt.s32.totalorder (!%p277_p9), %s849_s9, 47  ;;  %s851_s11 = sshll.u32 (!%p277_p9), %s1042_s15, 4 }
  0x29   : > { %p324_p11 = scmp.lt.s32.totalorder (!%p277_p9), %s851_s11, 47  ;;  %s1176_s15 = scalar_lea.vmem (!%p277_p9), [#allocation3], %s848_s10 }
  0x2a   : > { %p855_p12 = scmp.ne.s32.totalorder (!%p277_p9), %s1038_s14, 0 }
  0x2e   : > { %s1322_s9 = smov (!%p318_p10, %s849_s9), 47  ;;  %s1324_s11 = smov (!%p324_p11, %s851_s11), 47 }
  0x2f   : > { %s850_s21 = sshll.u32 %s1322_s9, 3  ;;  %s852_s26 = sshll.u32 %s1324_s11, 3  ;;  %vm340_vm0 = vcmask (!%p855_p12), 130048   ;;  %v1056_v16 = vmov (!%p855_p12), 0.0  }
  0x30   : > { %s1164_s24 = scalar_lea.vmem %s1306_s1, %s850_s21  ;;  %s1169_s29 = scalar_lea.vmem %s1307_s2, %s852_s26  ;;  %341 = vst.msk [vmem:[#allocation2] sm:$0xff] (!%p855_p12), %vm340_vm0, %v1056_v16  ;;  %342 = vst.msk [vmem:[#allocation2 + $0x8] sm:$0xff] (!%p855_p12), %vm340_vm0, %v1056_v16 }
  0x31   : > { %s1174_s4 = scalar_lea.vmem %s1308_s3, %s852_s26  ;;  %339 = sbr.rel (%p855_p12) target bundleno = 56 (0x38), region = 77  ;;  %343 = vst.msk [vmem:[#allocation2 + $0x10] sm:$0xff] (!%p855_p12), %vm340_vm0, %v1056_v16  ;;  %344 = vst.msk [vmem:[#allocation2 + $0x18] sm:$0xff] (!%p855_p12), %vm340_vm0, %v1056_v16 }
  0x32   : > { %345 = vst.msk [vmem:[#allocation2 + $0x20] sm:$0xff] (!%p855_p12), %vm340_vm0, %v1056_v16  ;;  %346 = vst.msk [vmem:[#allocation2 + $0x28] sm:$0xff] (!%p855_p12), %vm340_vm0, %v1056_v16 }
  0x33   : > { %347 = vst.msk [vmem:[#allocation2 + $0x30] sm:$0xff] (!%p855_p12), %vm340_vm0, %v1056_v16  ;;  %348 = vst.msk [vmem:[#allocation2 + $0x38] sm:$0xff] (!%p855_p12), %vm340_vm0, %v1056_v16 }
  0x34   : > { %349 = vst.msk [vmem:[#allocation2 + $0x40] sm:$0xff] (!%p855_p12), %vm340_vm0, %v1056_v16  ;;  %350 = vst.msk [vmem:[#allocation2 + $0x48] sm:$0xff] (!%p855_p12), %vm340_vm0, %v1056_v16 }
  0x35   : > { %351 = vst.msk [vmem:[#allocation2 + $0x50] sm:$0xff] (!%p855_p12), %vm340_vm0, %v1056_v16  ;;  %352 = vst.msk [vmem:[#allocation2 + $0x58] sm:$0xff] (!%p855_p12), %vm340_vm0, %v1056_v16 }
  0x36   : > { %353 = vst.msk [vmem:[#allocation2 + $0x60] sm:$0xff] (!%p855_p12), %vm340_vm0, %v1056_v16  ;;  %354 = vst.msk [vmem:[#allocation2 + $0x68] sm:$0xff] (!%p855_p12), %vm340_vm0, %v1056_v16 }
  0x37   : > { %355 = vst.msk [vmem:[#allocation2 + $0x70] sm:$0xff] (!%p855_p12), %vm340_vm0, %v1056_v16  ;;  %356 = vst.msk [vmem:[#allocation2 + $0x78] sm:$0xff] (!%p855_p12), %vm340_vm0, %v1056_v16 }
  0x38 PF: > { %v389_v17 = vld [vmem:[%s1164_s24] sm:$0xff]  ;;  %v390_v18 = vld [vmem:[%s1164_s24 + $0x8] sm:$0xff]  ;;  %v391_v19 = vld [vmem:[%s1164_s24 + $0x10] sm:$0xff]  ;;  %vm574_vm1 = vcmask 130048   ;;  %p864_p13 = scmp.ne.s32.totalorder %s1038_s14, 2 }
  0x39   : > { %v405_v20 = vpack.c.bf16 %v390_v18, %v389_v17  ;;  %v392_v21 = vld [vmem:[%s1164_s24 + $0x18] sm:$0xff]  ;;  %v393_v23 = vld [vmem:[%s1164_s24 + $0x20] sm:$0xff]  ;;  %v394_v24 = vld [vmem:[%s1164_s24 + $0x28] sm:$0xff] }
  0x3a   : > { %v406_v22 = vpack.c.bf16 %v392_v21, %v391_v19  ;;  %v395_v25 = vld [vmem:[%s1164_s24 + $0x30] sm:$0xff]  ;;  %v407_v26 = vpack.c.bf16 %v394_v24, %v393_v23  ;;  %v396_v27 = vld [vmem:[%s1164_s24 + $0x38] sm:$0xff]  ;;  %v990_v28 = vld [vmem:[%s1176_s15] sm:$0xff]  }
  0x3b   : > { %883 = vmatprep.subr.bf16.mxu0 %v405_v20  ;;  %915 = vmatprep.subr.bf16.mxu1 %v405_v20  ;;  %v991_v29 = vld [vmem:[%s1176_s15 + $0x20] sm:$0xff]   ;;  %v408_v30 = vpack.c.bf16 %v396_v27, %v395_v25  ;;  %v398_v32 = vld [vmem:[%s1164_s24 + $0x48] sm:$0xff]  ;;  %v399_v34 = vld [vmem:[%s1164_s24 + $0x50] sm:$0xff] }
  0x3c   : > { %884 = vmatpush3.bf16.msra.mxu0 %v405_v20  ;;  %923 = vmatpush3.bf16.msra.mxu1 %v405_v20  ;;  %v397_v31 = vld [vmem:[%s1164_s24 + $0x40] sm:$0xff]  ;;  %v400_v35 = vld [vmem:[%s1164_s24 + $0x58] sm:$0xff]  ;;  %v402_v38 = vld [vmem:[%s1164_s24 + $0x68] sm:$0xff] }
  0x3d   : > { %885 = vmatprep.subr.bf16.mxu0 %v406_v22  ;;  %916 = vmatprep.subr.bf16.mxu1 %v406_v22  ;;  %v409_v33 = vpack.c.bf16 %v398_v32, %v397_v31  ;;  %v410_v36 = vpack.c.bf16 %v400_v35, %v399_v34  ;;  %v401_v37 = vld [vmem:[%s1164_s24 + $0x60] sm:$0xff]  ;;  %v403_v40 = vld [vmem:[%s1164_s24 + $0x70] sm:$0xff]  ;;  %v404_v41 = vld [vmem:[%s1164_s24 + $0x78] sm:$0xff]  ;;  %v1057_v35 = vmov (!%p864_p13), 0  }
  0x3e   : > { %899 = vmatprep.mubr.bf16.mxu0 %v990_v28  ;;  %907 = vmatprep.mubr.bf16.mxu1 %v991_v29  ;;  %v411_v39 = vpack.c.bf16 %v402_v38, %v401_v37  ;;  %v412_v42 = vpack.c.bf16 %v404_v41, %v403_v40  ;;  %v992_v43 = vld [vmem:[%s1176_s15 + $0x8] sm:$0xff]   ;;  %v994_v45 = vld [vmem:[%s1176_s15 + $0x10] sm:$0xff]   ;;  %v996_v47 = vld [vmem:[%s1176_s15 + $0x18] sm:$0xff]  }
  0x3f   : > { %v993_v44 = vld [vmem:[%s1176_s15 + $0x28] sm:$0xff]   ;;  %v995_v46 = vld [vmem:[%s1176_s15 + $0x30] sm:$0xff]   ;;  %v997_v48 = vld [vmem:[%s1176_s15 + $0x38] sm:$0xff]   ;;  %999 = vset.pattern.permute.xlu1 (!%p864_p13), %v1057_v35  ;;  %998 = vset.pattern.permute.xlu0 (!%p864_p13), %v1057_v35 }
  0x40   : > { %886 = vmatpush3.bf16.msra.mxu0 %v406_v22  ;;  %924 = vmatpush3.bf16.msra.mxu1 %v406_v22  ;;  %v359_v49 = vld [vmem:[#allocation2 + $0x10] sm:$0xff]  ;;  %v357_v51 = vld [vmem:[#allocation2] sm:$0xff]  ;;  %v360_v55 = vld [vmem:[#allocation2 + $0x18] sm:$0xff] }
  0x41   : > { %887 = vmatprep.subr.bf16.mxu0 %v407_v26  ;;  %917 = vmatprep.subr.bf16.mxu1 %v407_v26  ;;  %v367_v50 = vld [vmem:[#allocation2 + $0x50] sm:$0xff]  ;;  %v365_v52 = vld [vmem:[#allocation2 + $0x40] sm:$0xff]  ;;  %v368_v56 = vld [vmem:[#allocation2 + $0x58] sm:$0xff] }
  0x42   : > { %v358_v61 = vld [vmem:[#allocation2 + $0x8] sm:$0xff]  ;;  %v363_v9 = vld [vmem:[#allocation2 + $0x30] sm:$0xff]  ;;  %v361_v11 = vld [vmem:[#allocation2 + $0x20] sm:$0xff] }
  0x43   : > { %v366_v62 = vld [vmem:[#allocation2 + $0x48] sm:$0xff]  ;;  %v371_v10 = vld [vmem:[#allocation2 + $0x70] sm:$0xff]  ;;  %v369_v12 = vld [vmem:[#allocation2 + $0x60] sm:$0xff] }
  0x44   : > { %888 = vmatpush3.bf16.msra.mxu0 %v407_v26  ;;  %925 = vmatpush3.bf16.msra.mxu1 %v407_v26  ;;  %v364_v15 = vld [vmem:[#allocation2 + $0x38] sm:$0xff]  ;;  %v362_v21 = vld [vmem:[#allocation2 + $0x28] sm:$0xff]  ;;  %v595_v34 = vld [vmem:[%s1169_s29] sm:$0xff] (!%p864_p13) }
  0x45   : > { %889 = vmatprep.subr.bf16.mxu0 %v408_v30  ;;  %918 = vmatprep.subr.bf16.mxu1 %v408_v30  ;;  %v372_v16 = vld [vmem:[#allocation2 + $0x78] sm:$0xff]  ;;  %v370_v22 = vld [vmem:[#allocation2 + $0x68] sm:$0xff]  ;;  %v601_v41 = vld [vmem:[%s1169_s29 + $0x30] sm:$0xff] (!%p864_p13) }
  0x46   : > { %629 = vperm.xlu0 (!%p864_p13), %998, %v595_v34   ;;  %v596_v37 = vld [vmem:[%s1169_s29 + $0x8] sm:$0xff] (!%p864_p13)  ;;  %v602_v40 = vld [vmem:[%s1169_s29 + $0x38] sm:$0xff] (!%p864_p13) }
  0x47   : > { %v600_v38 = vld [vmem:[%s1169_s29 + $0x28] sm:$0xff] (!%p864_p13) }
  0x48   : > { %890 = vmatpush3.bf16.msra.mxu0 %v408_v30  ;;  %926 = vmatpush3.bf16.msra.mxu1 %v408_v30 }
  0x49   : > { %891 = vmatprep.subr.bf16.mxu0 %v409_v33  ;;  %919 = vmatprep.subr.bf16.mxu1 %v409_v33 }
  0x4a   : > { %634 = vperm.xlu0 (!%p864_p13), %998, %v596_v37  }
  0x4c   : > { %892 = vmatpush3.bf16.msra.mxu0 %v409_v33  ;;  %927 = vmatpush3.bf16.msra.mxu1 %v409_v33  ;;  %v597_v33 = vld [vmem:[%s1169_s29 + $0x10] sm:$0xff] (!%p864_p13) }
  0x4d   : > { %893 = vmatprep.subr.bf16.mxu0 %v410_v36  ;;  %920 = vmatprep.subr.bf16.mxu1 %v410_v36 }
  0x4e   : > { %639 = vperm.xlu1 (!%p864_p13), %999, %v597_v33  }
  0x50   : > { %894 = vmatpush3.bf16.msra.mxu0 %v410_v36  ;;  %928 = vmatpush3.bf16.msra.mxu1 %v410_v36  ;;  %v598_v36 = vld [vmem:[%s1169_s29 + $0x18] sm:$0xff] (!%p864_p13) }
  0x51   : > { %895 = vmatprep.subr.bf16.mxu0 %v411_v39  ;;  %921 = vmatprep.subr.bf16.mxu1 %v411_v39 }
  0x52   : > { %644 = vperm.xlu1 (!%p864_p13), %999, %v598_v36  }
  0x54   : > { %896 = vmatpush3.bf16.msra.mxu0 %v411_v39  ;;  %929 = vmatpush3.bf16.msra.mxu1 %v411_v39  ;;  %v599_v39 = vld [vmem:[%s1169_s29 + $0x20] sm:$0xff] (!%p864_p13) }
  0x55   : > { %897 = vmatprep.subr.bf16.mxu0 %v412_v42  ;;  %922 = vmatprep.subr.bf16.mxu1 %v412_v42 }
  0x56   : > { %654 = vperm.xlu1 (!%p864_p13), %999, %v600_v38   ;;  %649 = vperm.xlu0 (!%p864_p13), %998, %v599_v39  }
  0x58   : > { %898 = vmatpush3.bf16.msra.mxu0 %v412_v42  ;;  %930 = vmatpush3.bf16.msra.mxu1 %v412_v42  ;;  %v604_v42 = vld [vmem:[%s1169_s29 + $0x48] sm:$0xff] (!%p864_p13) }
  0x5a   : > { %664 = vperm.xlu1 (!%p864_p13), %999, %v602_v40   ;;  %659 = vperm.xlu0 (!%p864_p13), %998, %v601_v41  }
  0x5b   : > { %900 = vmatmul.mubr.bf16.vlgmr.msra.gmra.mrb[0].mxu0 %v992_v43  ;;  %908 = vmatmul.mubr.bf16.vlgmr.msra.gmra.mrb[0].mxu1 %v993_v44  ;;  %v603_v43 = vld [vmem:[%s1169_s29 + $0x40] sm:$0xff] (!%p864_p13)  ;;  %v606_v44 = vld [vmem:[%s1169_s29 + $0x58] sm:$0xff] (!%p864_p13) }
  0x5c   : > { %903 = vmatprep.mubr.bf16.mxu0 %v994_v45  ;;  %911 = vmatprep.mubr.bf16.mxu1 %v995_v46  ;;  %v605_v45 = vld [vmem:[%s1169_s29 + $0x50] sm:$0xff] (!%p864_p13)  ;;  %v608_v46 = vld [vmem:[%s1169_s29 + $0x68] sm:$0xff] (!%p864_p13) }
  0x5e   : > { %674 = vperm.xlu1 (!%p864_p13), %999, %v604_v42   ;;  %669 = vperm.xlu0 (!%p864_p13), %998, %v603_v43  }
  0x62   : > { %684 = vperm.xlu1 (!%p864_p13), %999, %v606_v44   ;;  %679 = vperm.xlu0 (!%p864_p13), %998, %v605_v45  }
  0x63   : > { %904 = vmatmul.mubr.bf16.gmra.mrb[4].mxu0 %v996_v47  ;;  %912 = vmatmul.mubr.bf16.gmra.mrb[4].mxu1 %v997_v48  ;;  %v607_v47 = vld [vmem:[%s1169_s29 + $0x60] sm:$0xff] (!%p864_p13)  ;;  %v610_v48 = vld [vmem:[%s1169_s29 + $0x78] sm:$0xff] (!%p864_p13) }
  0x66   : > { %694 = vperm.xlu1 (!%p864_p13), %999, %v608_v46   ;;  %689 = vperm.xlu0 (!%p864_p13), %998, %v607_v47  }
  0x6a   : > { %704 = vperm.xlu1 (!%p864_p13), %999, %v610_v48  }
 0x12e   : > { %v901_v53 = vpop.f32.mrb[0].mxu0  ;;  %v909_v54 = vpop.f32.mrb[0].mxu1 }
 0x12f   : > { %v560_v57 = vadd.f32 %v901_v53, %v359_v49  ;;  %v568_v58 = vadd.f32 %v909_v54, %v367_v50  ;;  %v495_v59 = vpop.f32.mrb[1].mxu0  ;;  %v527_v60 = vpop.f32.mrb[1].mxu1  ;;  %v609_v49 = vld [vmem:[%s1169_s29 + $0x70] sm:$0xff] (!%p864_p13) }
 0x130   : > { %v558_v63 = vadd.f32 %v495_v59, %v357_v51  ;;  %v566_v0 = vadd.f32 %v527_v60, %v365_v52  ;;  %v902_v1 = vpop.f32.mrb[2].mxu0  ;;  %v910_v2 = vpop.f32.mrb[2].mxu1  ;;  %699 = vperm.xlu0 (!%p864_p13), %998, %v609_v49  }
 0x131   : > { %577 = vst.msk [vmem:[#allocation2 + $0x10] sm:$0xff] %vm574_vm1, %v560_v57  ;;  %585 = vst.msk [vmem:[#allocation2 + $0x50] sm:$0xff] %vm574_vm1, %v568_v58  ;;  %v561_v3 = vadd.f32 %v902_v1, %v360_v55  ;;  %v569_v4 = vadd.f32 %v910_v2, %v368_v56  ;;  %v498_v5 = vpop.f32.mrb[3].mxu0  ;;  %v530_v6 = vpop.f32.mrb[3].mxu1 }
 0x132   : > { %575 = vst.msk [vmem:[#allocation2] sm:$0xff] %vm574_vm1, %v558_v63  ;;  %583 = vst.msk [vmem:[#allocation2 + $0x40] sm:$0xff] %vm574_vm1, %v566_v0  ;;  %v559_v7 = vadd.f32 %v498_v5, %v358_v61  ;;  %v567_v8 = vadd.f32 %v530_v6, %v366_v62  ;;  %v640_v52 = vpop.permute.xlu1 (!%p864_p13), %639  ;;  %v630_v53 = vpop.permute.xlu0 (!%p864_p13), %629 }
 0x133   : > { %578 = vst.msk [vmem:[#allocation2 + $0x18] sm:$0xff] %vm574_vm1, %v561_v3  ;;  %586 = vst.msk [vmem:[#allocation2 + $0x58] sm:$0xff] %vm574_vm1, %v569_v4 }
 0x134   : > { %576 = vst.msk [vmem:[#allocation2 + $0x8] sm:$0xff] %vm574_vm1, %v559_v7  ;;  %584 = vst.msk [vmem:[#allocation2 + $0x48] sm:$0xff] %vm574_vm1, %v567_v8 }
 0x136   : > { %v905_v13 = vpop.f32.mrb[4].mxu0  ;;  %v913_v14 = vpop.f32.mrb[4].mxu1  ;;  %594 = sbr.rel (%p864_p13) target bundleno = 435 (0x1b3), region = 81 }
 0x137   : > { %v564_v17 = vadd.f32 %v905_v13, %v363_v9  ;;  %v572_v18 = vadd.f32 %v913_v14, %v371_v10  ;;  %v511_v19 = vpop.f32.mrb[5].mxu0  ;;  %v543_v20 = vpop.f32.mrb[5].mxu1 }
 0x138   : > { %v562_v23 = vadd.f32 %v511_v19, %v361_v11  ;;  %v570_v24 = vadd.f32 %v543_v20, %v369_v12  ;;  %v906_v25 = vpop.f32.mrb[6].mxu0  ;;  %v914_v26 = vpop.f32.mrb[6].mxu1  ;;  %v613_v50 = vld [vmem:[#allocation2 + $0x10] sm:$0xff] (!%p864_p13) }
 0x139   : > { %581 = vst.msk [vmem:[#allocation2 + $0x30] sm:$0xff] %vm574_vm1, %v564_v17  ;;  %589 = vst.msk [vmem:[#allocation2 + $0x70] sm:$0xff] %vm574_vm1, %v572_v18  ;;  %v565_v27 = vadd.f32 %v906_v25, %v364_v15  ;;  %v573_v28 = vadd.f32 %v914_v26, %v372_v16  ;;  %v514_v29 = vpop.f32.mrb[7].mxu0  ;;  %v546_v30 = vpop.f32.mrb[7].mxu1  ;;  %v611_v51 = vld [vmem:[#allocation2] sm:$0xff] (!%p864_p13)  ;;  %v709_v54 = vmul.f32 (!%p864_p13), %v640_v52, %v613_v50  ;;  %v621_v17 = vld [vmem:[#allocation2 + $0x50] sm:$0xff] (!%p864_p13) }
 0x13a   : > { %579 = vst.msk [vmem:[#allocation2 + $0x20] sm:$0xff] %vm574_vm1, %v562_v23  ;;  %587 = vst.msk [vmem:[#allocation2 + $0x60] sm:$0xff] %vm574_vm1, %v570_v24  ;;  %v563_v31 = vadd.f32 %v514_v29, %v362_v21  ;;  %v571_v32 = vadd.f32 %v546_v30, %v370_v22  ;;  %v707_v55 = vmul.f32 (!%p864_p13), %v630_v53, %v611_v51  ;;  %v614_v56 = vld [vmem:[#allocation2 + $0x18] sm:$0xff] (!%p864_p13)  ;;  %v645_v58 = vpop.permute.xlu1 (!%p864_p13), %644  ;;  %v635_v59 = vpop.permute.xlu0 (!%p864_p13), %634  ;;  %v619_v11 = vld [vmem:[#allocation2 + $0x40] sm:$0xff] (!%p864_p13) }
 0x13b   : > { %582 = vst.msk [vmem:[#allocation2 + $0x38] sm:$0xff] %vm574_vm1, %v565_v27  ;;  %590 = vst.msk [vmem:[#allocation2 + $0x78] sm:$0xff] %vm574_vm1, %v573_v28  ;;  %v612_v57 = vld [vmem:[#allocation2 + $0x8] sm:$0xff] (!%p864_p13)  ;;  %v710_v60 = vmul.f32 (!%p864_p13), %v645_v58, %v614_v56  ;;  %v622_v16 = vld [vmem:[#allocation2 + $0x58] sm:$0xff] (!%p864_p13) }
 0x13c   : > { %580 = vst.msk [vmem:[#allocation2 + $0x28] sm:$0xff] %vm574_vm1, %v563_v31  ;;  %588 = vst.msk [vmem:[#allocation2 + $0x68] sm:$0xff] %vm574_vm1, %v571_v32  ;;  %v708_v61 = vmul.f32 (!%p864_p13), %v635_v59, %v612_v57  ;;  %v620_v10 = vld [vmem:[#allocation2 + $0x48] sm:$0xff] (!%p864_p13) }
 0x13d   : > { %725 = vst.msk [vmem:[%s1174_s4 + $0x10] sm:$0xff] %vm574_vm1, %v709_v54  ;;  %723 = vst.msk [vmem:[%s1174_s4] sm:$0xff] %vm574_vm1, %v707_v55 }
 0x13e   : > { %726 = vst.msk [vmem:[%s1174_s4 + $0x18] sm:$0xff] %vm574_vm1, %v710_v60  ;;  %724 = vst.msk [vmem:[%s1174_s4 + $0x8] sm:$0xff] %vm574_vm1, %v708_v61  ;;  %v655_v0 = vpop.permute.xlu1 %654  ;;  %v650_v1 = vpop.permute.xlu0 %649 }
 0x140   : > { %v617_v5 = vld [vmem:[#allocation2 + $0x30] sm:$0xff] }
 0x141   : > { %v615_v63 = vld [vmem:[#allocation2 + $0x20] sm:$0xff]  ;;  %v625_v29 = vld [vmem:[#allocation2 + $0x70] sm:$0xff] }
 0x142   : > { %v711_v3 = vmul.f32 %v650_v1, %v615_v63  ;;  %v618_v4 = vld [vmem:[#allocation2 + $0x38] sm:$0xff]  ;;  %v665_v6 = vpop.permute.xlu1 %664  ;;  %v660_v7 = vpop.permute.xlu0 %659  ;;  %v623_v23 = vld [vmem:[#allocation2 + $0x60] sm:$0xff] }
 0x143   : > { %v616_v62 = vld [vmem:[#allocation2 + $0x28] sm:$0xff]  ;;  %v714_v8 = vmul.f32 %v665_v6, %v618_v4  ;;  %v713_v9 = vmul.f32 %v660_v7, %v617_v5  ;;  %v626_v28 = vld [vmem:[#allocation2 + $0x78] sm:$0xff] }
 0x144   : > { %v712_v2 = vmul.f32 %v655_v0, %v616_v62  ;;  %727 = vst.msk [vmem:[%s1174_s4 + $0x20] sm:$0xff] %vm574_vm1, %v711_v3  ;;  %v624_v22 = vld [vmem:[#allocation2 + $0x68] sm:$0xff] }
 0x145   : > { %730 = vst.msk [vmem:[%s1174_s4 + $0x38] sm:$0xff] %vm574_vm1, %v714_v8  ;;  %729 = vst.msk [vmem:[%s1174_s4 + $0x30] sm:$0xff] %vm574_vm1, %v713_v9 }
 0x146   : > { %728 = vst.msk [vmem:[%s1174_s4 + $0x28] sm:$0xff] %vm574_vm1, %v712_v2  ;;  %v675_v12 = vpop.permute.xlu1 %674  ;;  %v670_v13 = vpop.permute.xlu0 %669 }
 0x147   : > { %v716_v14 = vmul.f32 %v675_v12, %v620_v10  ;;  %v715_v15 = vmul.f32 %v670_v13, %v619_v11 }
 0x149   : > { %732 = vst.msk [vmem:[%s1174_s4 + $0x48] sm:$0xff] %vm574_vm1, %v716_v14  ;;  %731 = vst.msk [vmem:[%s1174_s4 + $0x40] sm:$0xff] %vm574_vm1, %v715_v15 }
 0x14a   : > { %v685_v18 = vpop.permute.xlu1 %684  ;;  %v680_v19 = vpop.permute.xlu0 %679 }
 0x14b   : > { %v718_v20 = vmul.f32 %v685_v18, %v622_v16  ;;  %v717_v21 = vmul.f32 %v680_v19, %v621_v17 }
 0x14d   : > { %734 = vst.msk [vmem:[%s1174_s4 + $0x58] sm:$0xff] %vm574_vm1, %v718_v20  ;;  %733 = vst.msk [vmem:[%s1174_s4 + $0x50] sm:$0xff] %vm574_vm1, %v717_v21 }
 0x14e   : > { %v695_v24 = vpop.permute.xlu1 %694  ;;  %v690_v25 = vpop.permute.xlu0 %689 }
 0x14f   : > { %v720_v26 = vmul.f32 %v695_v24, %v624_v22  ;;  %v719_v27 = vmul.f32 %v690_v25, %v623_v23 }
 0x151   : > { %736 = vst.msk [vmem:[%s1174_s4 + $0x68] sm:$0xff] %vm574_vm1, %v720_v26  ;;  %735 = vst.msk [vmem:[%s1174_s4 + $0x60] sm:$0xff] %vm574_vm1, %v719_v27 }
 0x152   : > { %v705_v30 = vpop.permute.xlu1 %704 }
 0x153   : > { %v722_v32 = vmul.f32 %v705_v30, %v626_v28 }
 0x155   : > { %738 = vst.msk [vmem:[%s1174_s4 + $0x78] sm:$0xff] %vm574_vm1, %v722_v32 }
 0x1af   : > { %v700_v31 = vpop.permute.xlu0 %699 }
 0x1b0   : > { %v721_v33 = vmul.f32 %v700_v31, %v625_v29 }
 0x1b2   : > { %737 = vst.msk [vmem:[%s1174_s4 + $0x70] sm:$0xff] %vm574_vm1, %v721_v33 }
 0x1b3 PF: > { %s13_s18 = sadd.s32 1, %s1054_s18   ;;  %s1309_s12 = smov %s1034_s13 }
 0x1b4   : > { %p10_p0 = scmp.ge.s32.totalorder %s13_s18, 11   ;;  %s1310_s13 = smov %s1129_s25 }
 0x1b5   : > { %s1311_s14 = smov %s1046_s16  ;;  %s1312_s15 = smov %s1050_s17 }
 0x1b6   : > { %s1313_s16 = smov %s1316_s19  ;;  %s1314_s17 = smov %s1320_s20 }
 0x1b7   :  { %12 = sbr.rel (!%p10_p0) target bundleno = 4 (0x4), region = 122 }

// kernel: slog_n_forward.16
= control target key start
LH: loop header
LB: loop body
LE: loop exit
PB: predicated region body
PF: predicated region fallthrough
CT: control target
= control target key end

     0   :  { %s1078_s12 = smov 0   ;;  %s1080_s13 = smov 0   ;;  %s1305_s0 = inlined_call_operand.vmem [shape: bf16[384,384], index: 0, kind: input, shape index: {}]   ;;  %s1306_s1 = inlined_call_operand.vmem [shape: f32[384,32], index: 1, kind: input, shape index: {}]   ;;  %s1307_s2 = inlined_call_operand.vmem [shape: f32[384,1], index: 2, kind: input, shape index: {}]   ;;  %s1308_s3 = inlined_call_operand.vmem [shape: f32[384,32], index: 3, kind: output, shape index: {}]  }
   0x1   :  { %s1082_s14 = smov 0   ;;  %s1084_s15 = smov 0  }
   0x2   :  { %s1086_s16 = smov 0   ;;  %s1088_s17 = smov 0  }
   0x3   :  { %s1090_s18 = smov 0  }
   0x4 LB: > { %s22_s19 = sadd.s32 1, %s1046_s16  ;;  %s25_s20 = sadd.s32 1, %s1050_s17  ;;  %s1054_s18 = sphi %s1090_s18, %s13_s18   ;;  %s1050_s17 = sphi %s1088_s17, %s1314_s17   ;;  %s1046_s16 = sphi %s1086_s16, %s1313_s16   ;;  %s1042_s15 = sphi %s1084_s15, %s1312_s15   ;;  %s1038_s14 = sphi %s1082_s14, %s1311_s14   ;;  %s1034_s13 = sphi %s1080_s13, %s1310_s13   ;;  %s1030_s12 = sphi %s1078_s12, %s1309_s12  }
   0x5   : > { %p23_p0 = scmp.ge.s32.totalorder %s22_s19, 3  ;;  %p41_p1 = scmp.ne.s32.totalorder %s1034_s13, %s1030_s12 }
   0x6   : > { %p42_p2 = scmp.eq.s32.totalorder %s1054_s18, 0  ;;  %s34_s24 = sadd.s32 1, %s1034_s13 }
   0x7   : > { %s1316_s19 = smov (%p23_p0, %s22_s19), 0  ;;  %s1318_s20 = smov (!%p23_p0, %s25_s20), %s1050_s17 }
   0x8   : > { %p43_p3 = por %p42_p2, %p41_p1  ;;  %p27_p4 = scmp.ge.s32.totalorder %s1318_s20, 3 }
   0x9   : > { %s30_s21 = ssub.s32 %s1046_s16, %s1316_s19  ;;  %p842_p6 = scmp.ge.s32.totalorder %s1054_s18, 9 }
   0xa   : > { %s1320_s20 = smov (%p27_p4, %s1318_s20), 0 }
   0xb   : > { %s29_s22 = ssub.s32 %s1050_s17, %s1320_s20  ;;  %145 = sbr.rel (%p842_p6) target bundleno = 35 (0x23), region = 16 }
   0xc   : > { %s31_s23 = sor.u32 %s30_s21, %s29_s22 }
   0xd   : > { %p32_p5 = scmp.eq.s32.totalorder %s31_s23, 0 }
   0xf   : > { %s1129_s25 = scalar_select %p32_p5, %s1034_s13, %s34_s24  }
  0x12   : > { %148 = sbr.rel (!%p43_p3) target bundleno = 35 (0x23), region = 20  ;;  %s150_s26 = sand.u32 (%p43_p3), 1, %s1034_s13  }
  0x13   : > { %s931_s27 = smul.u32 (%p43_p3), 48, %s1050_s17  ;;  %s843_s28 = sshll.u32 (%p43_p3), %s150_s26, 6 }
  0x14   : > { %s152_s7 = scalar_lea.vmem (%p43_p3), [#allocation3], %s843_s28 }
  0x15   : > { %s155_s29 = sadd.s32 (%p43_p3), %s1046_s16, %s931_s27 }
  0x16   : > { %s846_s30 = sshll.u32 (%p43_p3), %s155_s29, 2 }
  0x17   : > { %s1138_s6 = scalar_lea.vmem (%p43_p3), %s1305_s0, %s846_s30 }
  0x18   : > { %v173_v0 = vld [vmem:[%s1138_s6] sm:$0xf] (%p43_p3)  ;;  %v175_v1 = vld [vmem:[%s1138_s6 + $0xc] sm:$0xf] (%p43_p3)  ;;  %v177_v2 = vld [vmem:[%s1138_s6 + $0x18] sm:$0xf] (%p43_p3) }
  0x19   : > { %174 = vst [vmem:[%s152_s7] sm:$0xf] %v173_v0  ;;  %176 = vst [vmem:[%s152_s7 + $0x4] sm:$0xf] %v175_v1  ;;  %v179_v3 = vld [vmem:[%s1138_s6 + $0x24] sm:$0xf] }
  0x1a   : > { %178 = vst [vmem:[%s152_s7 + $0x8] sm:$0xf] %v177_v2  ;;  %v181_v4 = vld [vmem:[%s1138_s6 + $0x30] sm:$0xf]  ;;  %v183_v5 = vld [vmem:[%s1138_s6 + $0x3c] sm:$0xf] }
  0x1b   : > { %180 = vst [vmem:[%s152_s7 + $0xc] sm:$0xf] %v179_v3  ;;  %182 = vst [vmem:[%s152_s7 + $0x10] sm:$0xf] %v181_v4  ;;  %v185_v6 = vld [vmem:[%s1138_s6 + $0x48] sm:$0xf] }
  0x1c   : > { %184 = vst [vmem:[%s152_s7 + $0x14] sm:$0xf] %v183_v5  ;;  %v187_v7 = vld [vmem:[%s1138_s6 + $0x54] sm:$0xf]  ;;  %v189_v8 = vld [vmem:[%s1138_s6 + $0x60] sm:$0xf] }
  0x1d   : > { %186 = vst [vmem:[%s152_s7 + $0x18] sm:$0xf] %v185_v6  ;;  %188 = vst [vmem:[%s152_s7 + $0x1c] sm:$0xf] %v187_v7  ;;  %v191_v9 = vld [vmem:[%s1138_s6 + $0x6c] sm:$0xf] }
  0x1e   : > { %190 = vst [vmem:[%s152_s7 + $0x20] sm:$0xf] %v189_v8  ;;  %v193_v10 = vld [vmem:[%s1138_s6 + $0x78] sm:$0xf]  ;;  %v195_v11 = vld [vmem:[%s1138_s6 + $0x84] sm:$0xf] }
  0x1f   : > { %192 = vst [vmem:[%s152_s7 + $0x24] sm:$0xf] %v191_v9  ;;  %194 = vst [vmem:[%s152_s7 + $0x28] sm:$0xf] %v193_v10  ;;  %v197_v12 = vld [vmem:[%s1138_s6 + $0x90] sm:$0xf] }
  0x20   : > { %196 = vst [vmem:[%s152_s7 + $0x2c] sm:$0xf] %v195_v11  ;;  %v199_v13 = vld [vmem:[%s1138_s6 + $0x9c] sm:$0xf]  ;;  %v201_v14 = vld [vmem:[%s1138_s6 + $0xa8] sm:$0xf] }
  0x21   : > { %198 = vst [vmem:[%s152_s7 + $0x30] sm:$0xf] %v197_v12  ;;  %200 = vst [vmem:[%s152_s7 + $0x34] sm:$0xf] %v199_v13  ;;  %v203_v15 = vld [vmem:[%s1138_s6 + $0xb4] sm:$0xf] }
  0x22   : > { %202 = vst [vmem:[%s152_s7 + $0x38] sm:$0xf] %v201_v14  ;;  %204 = vst [vmem:[%s152_s7 + $0x3c] sm:$0xf] %v203_v15 }
  0x23 PF: > { %p847_p7 = scmp.ge.s32.totalorder %s1054_s18, 1  ;;  %p276_p8 = scmp.lt.s32.totalorder %s1054_s18, 10 }
  0x25   : > { %p277_p9 = pnand %p847_p7, %p276_p8 }
  0x26   : > { %s283_s8 = sand.u32 (!%p277_p9), 1, %s1030_s12   ;;  %s849_s9 = sshll.u32 (!%p277_p9), %s1038_s14, 4 }
  0x27   : > { %280 = sbr.rel (%p277_p9) target bundleno = 435 (0x1b3), region = 69  ;;  %s848_s10 = sshll.u32 (!%p277_p9), %s283_s8, 6 }
  0x28   : > { %p318_p10 = scmp.lt.s32.totalorder (!%p277_p9), %s849_s9, 47  ;;  %s851_s11 = sshll.u32 (!%p277_p9), %s1042_s15, 4 }
  0x29   : > { %p324_p11 = scmp.lt.s32.totalorder (!%p277_p9), %s851_s11, 47  ;;  %s1176_s15 = scalar_lea.vmem (!%p277_p9), [#allocation3], %s848_s10 }
  0x2a   : > { %p855_p12 = scmp.ne.s32.totalorder (!%p277_p9), %s1038_s14, 0 }
  0x2e   : > { %s1322_s9 = smov (!%p318_p10, %s849_s9), 47  ;;  %s1324_s11 = smov (!%p324_p11, %s851_s11), 47 }
  0x2f   : > { %s850_s21 = sshll.u32 %s1322_s9, 3  ;;  %s852_s26 = sshll.u32 %s1324_s11, 3  ;;  %vm340_vm0 = vcmask (!%p855_p12), 261120   ;;  %v1056_v16 = vmov (!%p855_p12), 0.0  }
  0x30   : > { %s1164_s24 = scalar_lea.vmem %s1306_s1, %s850_s21  ;;  %s1169_s29 = scalar_lea.vmem %s1307_s2, %s852_s26  ;;  %341 = vst.msk [vmem:[#allocation2] sm:$0xff] (!%p855_p12), %vm340_vm0, %v1056_v16  ;;  %342 = vst.msk [vmem:[#allocation2 + $0x8] sm:$0xff] (!%p855_p12), %vm340_vm0, %v1056_v16 }
  0x31   : > { %s1174_s4 = scalar_lea.vmem %s1308_s3, %s852_s26  ;;  %339 = sbr.rel (%p855_p12) target bundleno = 56 (0x38), region = 77  ;;  %343 = vst.msk [vmem:[#allocation2 + $0x10] sm:$0xff] (!%p855_p12), %vm340_vm0, %v1056_v16  ;;  %344 = vst.msk [vmem:[#allocation2 + $0x18] sm:$0xff] (!%p855_p12), %vm340_vm0, %v1056_v16 }
  0x32   : > { %345 = vst.msk [vmem:[#allocation2 + $0x20] sm:$0xff] (!%p855_p12), %vm340_vm0, %v1056_v16  ;;  %346 = vst.msk [vmem:[#allocation2 + $0x28] sm:$0xff] (!%p855_p12), %vm340_vm0, %v1056_v16 }
  0x33   : > { %347 = vst.msk [vmem:[#allocation2 + $0x30] sm:$0xff] (!%p855_p12), %vm340_vm0, %v1056_v16  ;;  %348 = vst.msk [vmem:[#allocation2 + $0x38] sm:$0xff] (!%p855_p12), %vm340_vm0, %v1056_v16 }
  0x34   : > { %349 = vst.msk [vmem:[#allocation2 + $0x40] sm:$0xff] (!%p855_p12), %vm340_vm0, %v1056_v16  ;;  %350 = vst.msk [vmem:[#allocation2 + $0x48] sm:$0xff] (!%p855_p12), %vm340_vm0, %v1056_v16 }
  0x35   : > { %351 = vst.msk [vmem:[#allocation2 + $0x50] sm:$0xff] (!%p855_p12), %vm340_vm0, %v1056_v16  ;;  %352 = vst.msk [vmem:[#allocation2 + $0x58] sm:$0xff] (!%p855_p12), %vm340_vm0, %v1056_v16 }
  0x36   : > { %353 = vst.msk [vmem:[#allocation2 + $0x60] sm:$0xff] (!%p855_p12), %vm340_vm0, %v1056_v16  ;;  %354 = vst.msk [vmem:[#allocation2 + $0x68] sm:$0xff] (!%p855_p12), %vm340_vm0, %v1056_v16 }
  0x37   : > { %355 = vst.msk [vmem:[#allocation2 + $0x70] sm:$0xff] (!%p855_p12), %vm340_vm0, %v1056_v16  ;;  %356 = vst.msk [vmem:[#allocation2 + $0x78] sm:$0xff] (!%p855_p12), %vm340_vm0, %v1056_v16 }
  0x38 PF: > { %v389_v17 = vld [vmem:[%s1164_s24] sm:$0xff]  ;;  %v390_v18 = vld [vmem:[%s1164_s24 + $0x8] sm:$0xff]  ;;  %v391_v19 = vld [vmem:[%s1164_s24 + $0x10] sm:$0xff]  ;;  %vm574_vm1 = vcmask 261120   ;;  %p864_p13 = scmp.ne.s32.totalorder %s1038_s14, 2 }
  0x39   : > { %v405_v20 = vpack.c.bf16 %v390_v18, %v389_v17  ;;  %v392_v21 = vld [vmem:[%s1164_s24 + $0x18] sm:$0xff]  ;;  %v393_v23 = vld [vmem:[%s1164_s24 + $0x20] sm:$0xff]  ;;  %v394_v24 = vld [vmem:[%s1164_s24 + $0x28] sm:$0xff] }
  0x3a   : > { %v406_v22 = vpack.c.bf16 %v392_v21, %v391_v19  ;;  %v395_v25 = vld [vmem:[%s1164_s24 + $0x30] sm:$0xff]  ;;  %v407_v26 = vpack.c.bf16 %v394_v24, %v393_v23  ;;  %v396_v27 = vld [vmem:[%s1164_s24 + $0x38] sm:$0xff]  ;;  %v990_v28 = vld [vmem:[%s1176_s15] sm:$0xff]  }
  0x3b   : > { %883 = vmatprep.subr.bf16.mxu0 %v405_v20  ;;  %915 = vmatprep.subr.bf16.mxu1 %v405_v20  ;;  %v991_v29 = vld [vmem:[%s1176_s15 + $0x20] sm:$0xff]   ;;  %v408_v30 = vpack.c.bf16 %v396_v27, %v395_v25  ;;  %v398_v32 = vld [vmem:[%s1164_s24 + $0x48] sm:$0xff]  ;;  %v399_v34 = vld [vmem:[%s1164_s24 + $0x50] sm:$0xff] }
  0x3c   : > { %884 = vmatpush3.bf16.msra.mxu0 %v405_v20  ;;  %923 = vmatpush3.bf16.msra.mxu1 %v405_v20  ;;  %v397_v31 = vld [vmem:[%s1164_s24 + $0x40] sm:$0xff]  ;;  %v400_v35 = vld [vmem:[%s1164_s24 + $0x58] sm:$0xff]  ;;  %v402_v38 = vld [vmem:[%s1164_s24 + $0x68] sm:$0xff] }
  0x3d   : > { %885 = vmatprep.subr.bf16.mxu0 %v406_v22  ;;  %916 = vmatprep.subr.bf16.mxu1 %v406_v22  ;;  %v409_v33 = vpack.c.bf16 %v398_v32, %v397_v31  ;;  %v410_v36 = vpack.c.bf16 %v400_v35, %v399_v34  ;;  %v401_v37 = vld [vmem:[%s1164_s24 + $0x60] sm:$0xff]  ;;  %v403_v40 = vld [vmem:[%s1164_s24 + $0x70] sm:$0xff]  ;;  %v404_v41 = vld [vmem:[%s1164_s24 + $0x78] sm:$0xff]  ;;  %v1057_v35 = vmov (!%p864_p13), 0  }
  0x3e   : > { %899 = vmatprep.mubr.bf16.mxu0 %v990_v28  ;;  %907 = vmatprep.mubr.bf16.mxu1 %v991_v29  ;;  %v411_v39 = vpack.c.bf16 %v402_v38, %v401_v37  ;;  %v412_v42 = vpack.c.bf16 %v404_v41, %v403_v40  ;;  %v992_v43 = vld [vmem:[%s1176_s15 + $0x8] sm:$0xff]   ;;  %v994_v45 = vld [vmem:[%s1176_s15 + $0x10] sm:$0xff]   ;;  %v996_v47 = vld [vmem:[%s1176_s15 + $0x18] sm:$0xff]  }
  0x3f   : > { %v993_v44 = vld [vmem:[%s1176_s15 + $0x28] sm:$0xff]   ;;  %v995_v46 = vld [vmem:[%s1176_s15 + $0x30] sm:$0xff]   ;;  %v997_v48 = vld [vmem:[%s1176_s15 + $0x38] sm:$0xff]   ;;  %999 = vset.pattern.permute.xlu1 (!%p864_p13), %v1057_v35  ;;  %998 = vset.pattern.permute.xlu0 (!%p864_p13), %v1057_v35 }
  0x40   : > { %886 = vmatpush3.bf16.msra.mxu0 %v406_v22  ;;  %924 = vmatpush3.bf16.msra.mxu1 %v406_v22  ;;  %v359_v49 = vld [vmem:[#allocation2 + $0x10] sm:$0xff]  ;;  %v357_v51 = vld [vmem:[#allocation2] sm:$0xff]  ;;  %v360_v55 = vld [vmem:[#allocation2 + $0x18] sm:$0xff] }
  0x41   : > { %887 = vmatprep.subr.bf16.mxu0 %v407_v26  ;;  %917 = vmatprep.subr.bf16.mxu1 %v407_v26  ;;  %v367_v50 = vld [vmem:[#allocation2 + $0x50] sm:$0xff]  ;;  %v365_v52 = vld [vmem:[#allocation2 + $0x40] sm:$0xff]  ;;  %v368_v56 = vld [vmem:[#allocation2 + $0x58] sm:$0xff] }
  0x42   : > { %v358_v61 = vld [vmem:[#allocation2 + $0x8] sm:$0xff]  ;;  %v363_v9 = vld [vmem:[#allocation2 + $0x30] sm:$0xff]  ;;  %v361_v11 = vld [vmem:[#allocation2 + $0x20] sm:$0xff] }
  0x43   : > { %v366_v62 = vld [vmem:[#allocation2 + $0x48] sm:$0xff]  ;;  %v371_v10 = vld [vmem:[#allocation2 + $0x70] sm:$0xff]  ;;  %v369_v12 = vld [vmem:[#allocation2 + $0x60] sm:$0xff] }
  0x44   : > { %888 = vmatpush3.bf16.msra.mxu0 %v407_v26  ;;  %925 = vmatpush3.bf16.msra.mxu1 %v407_v26  ;;  %v364_v15 = vld [vmem:[#allocation2 + $0x38] sm:$0xff]  ;;  %v362_v21 = vld [vmem:[#allocation2 + $0x28] sm:$0xff]  ;;  %v595_v34 = vld [vmem:[%s1169_s29] sm:$0xff] (!%p864_p13) }
  0x45   : > { %889 = vmatprep.subr.bf16.mxu0 %v408_v30  ;;  %918 = vmatprep.subr.bf16.mxu1 %v408_v30  ;;  %v372_v16 = vld [vmem:[#allocation2 + $0x78] sm:$0xff]  ;;  %v370_v22 = vld [vmem:[#allocation2 + $0x68] sm:$0xff]  ;;  %v601_v41 = vld [vmem:[%s1169_s29 + $0x30] sm:$0xff] (!%p864_p13) }
  0x46   : > { %629 = vperm.xlu0 (!%p864_p13), %998, %v595_v34   ;;  %v596_v37 = vld [vmem:[%s1169_s29 + $0x8] sm:$0xff] (!%p864_p13)  ;;  %v602_v40 = vld [vmem:[%s1169_s29 + $0x38] sm:$0xff] (!%p864_p13) }
  0x47   : > { %v600_v38 = vld [vmem:[%s1169_s29 + $0x28] sm:$0xff] (!%p864_p13) }
  0x48   : > { %890 = vmatpush3.bf16.msra.mxu0 %v408_v30  ;;  %926 = vmatpush3.bf16.msra.mxu1 %v408_v30 }
  0x49   : > { %891 = vmatprep.subr.bf16.mxu0 %v409_v33  ;;  %919 = vmatprep.subr.bf16.mxu1 %v409_v33 }
  0x4a   : > { %634 = vperm.xlu0 (!%p864_p13), %998, %v596_v37  }
  0x4c   : > { %892 = vmatpush3.bf16.msra.mxu0 %v409_v33  ;;  %927 = vmatpush3.bf16.msra.mxu1 %v409_v33  ;;  %v597_v33 = vld [vmem:[%s1169_s29 + $0x10] sm:$0xff] (!%p864_p13) }
  0x4d   : > { %893 = vmatprep.subr.bf16.mxu0 %v410_v36  ;;  %920 = vmatprep.subr.bf16.mxu1 %v410_v36 }
  0x4e   : > { %639 = vperm.xlu1 (!%p864_p13), %999, %v597_v33  }
  0x50   : > { %894 = vmatpush3.bf16.msra.mxu0 %v410_v36  ;;  %928 = vmatpush3.bf16.msra.mxu1 %v410_v36  ;;  %v598_v36 = vld [vmem:[%s1169_s29 + $0x18] sm:$0xff] (!%p864_p13) }
  0x51   : > { %895 = vmatprep.subr.bf16.mxu0 %v411_v39  ;;  %921 = vmatprep.subr.bf16.mxu1 %v411_v39 }
  0x52   : > { %644 = vperm.xlu1 (!%p864_p13), %999, %v598_v36  }
  0x54   : > { %896 = vmatpush3.bf16.msra.mxu0 %v411_v39  ;;  %929 = vmatpush3.bf16.msra.mxu1 %v411_v39  ;;  %v599_v39 = vld [vmem:[%s1169_s29 + $0x20] sm:$0xff] (!%p864_p13) }
  0x55   : > { %897 = vmatprep.subr.bf16.mxu0 %v412_v42  ;;  %922 = vmatprep.subr.bf16.mxu1 %v412_v42 }
  0x56   : > { %654 = vperm.xlu1 (!%p864_p13), %999, %v600_v38   ;;  %649 = vperm.xlu0 (!%p864_p13), %998, %v599_v39  }
  0x58   : > { %898 = vmatpush3.bf16.msra.mxu0 %v412_v42  ;;  %930 = vmatpush3.bf16.msra.mxu1 %v412_v42  ;;  %v604_v42 = vld [vmem:[%s1169_s29 + $0x48] sm:$0xff] (!%p864_p13) }
  0x5a   : > { %664 = vperm.xlu1 (!%p864_p13), %999, %v602_v40   ;;  %659 = vperm.xlu0 (!%p864_p13), %998, %v601_v41  }
  0x5b   : > { %900 = vmatmul.mubr.bf16.vlgmr.msra.gmra.mrb[0].mxu0 %v992_v43  ;;  %908 = vmatmul.mubr.bf16.vlgmr.msra.gmra.mrb[0].mxu1 %v993_v44  ;;  %v603_v43 = vld [vmem:[%s1169_s29 + $0x40] sm:$0xff] (!%p864_p13)  ;;  %v606_v44 = vld [vmem:[%s1169_s29 + $0x58] sm:$0xff] (!%p864_p13) }
  0x5c   : > { %903 = vmatprep.mubr.bf16.mxu0 %v994_v45  ;;  %911 = vmatprep.mubr.bf16.mxu1 %v995_v46  ;;  %v605_v45 = vld [vmem:[%s1169_s29 + $0x50] sm:$0xff] (!%p864_p13)  ;;  %v608_v46 = vld [vmem:[%s1169_s29 + $0x68] sm:$0xff] (!%p864_p13) }
  0x5e   : > { %674 = vperm.xlu1 (!%p864_p13), %999, %v604_v42   ;;  %669 = vperm.xlu0 (!%p864_p13), %998, %v603_v43  }
  0x62   : > { %684 = vperm.xlu1 (!%p864_p13), %999, %v606_v44   ;;  %679 = vperm.xlu0 (!%p864_p13), %998, %v605_v45  }
  0x63   : > { %904 = vmatmul.mubr.bf16.gmra.mrb[4].mxu0 %v996_v47  ;;  %912 = vmatmul.mubr.bf16.gmra.mrb[4].mxu1 %v997_v48  ;;  %v607_v47 = vld [vmem:[%s1169_s29 + $0x60] sm:$0xff] (!%p864_p13)  ;;  %v610_v48 = vld [vmem:[%s1169_s29 + $0x78] sm:$0xff] (!%p864_p13) }
  0x66   : > { %694 = vperm.xlu1 (!%p864_p13), %999, %v608_v46   ;;  %689 = vperm.xlu0 (!%p864_p13), %998, %v607_v47  }
  0x6a   : > { %704 = vperm.xlu1 (!%p864_p13), %999, %v610_v48  }
 0x12e   : > { %v901_v53 = vpop.f32.mrb[0].mxu0  ;;  %v909_v54 = vpop.f32.mrb[0].mxu1 }
 0x12f   : > { %v560_v57 = vadd.f32 %v901_v53, %v359_v49  ;;  %v568_v58 = vadd.f32 %v909_v54, %v367_v50  ;;  %v495_v59 = vpop.f32.mrb[1].mxu0  ;;  %v527_v60 = vpop.f32.mrb[1].mxu1  ;;  %v609_v49 = vld [vmem:[%s1169_s29 + $0x70] sm:$0xff] (!%p864_p13) }
 0x130   : > { %v558_v63 = vadd.f32 %v495_v59, %v357_v51  ;;  %v566_v0 = vadd.f32 %v527_v60, %v365_v52  ;;  %v902_v1 = vpop.f32.mrb[2].mxu0  ;;  %v910_v2 = vpop.f32.mrb[2].mxu1  ;;  %699 = vperm.xlu0 (!%p864_p13), %998, %v609_v49  }
 0x131   : > { %577 = vst.msk [vmem:[#allocation2 + $0x10] sm:$0xff] %vm574_vm1, %v560_v57  ;;  %585 = vst.msk [vmem:[#allocation2 + $0x50] sm:$0xff] %vm574_vm1, %v568_v58  ;;  %v561_v3 = vadd.f32 %v902_v1, %v360_v55  ;;  %v569_v4 = vadd.f32 %v910_v2, %v368_v56  ;;  %v498_v5 = vpop.f32.mrb[3].mxu0  ;;  %v530_v6 = vpop.f32.mrb[3].mxu1 }
 0x132   : > { %575 = vst.msk [vmem:[#allocation2] sm:$0xff] %vm574_vm1, %v558_v63  ;;  %583 = vst.msk [vmem:[#allocation2 + $0x40] sm:$0xff] %vm574_vm1, %v566_v0  ;;  %v559_v7 = vadd.f32 %v498_v5, %v358_v61  ;;  %v567_v8 = vadd.f32 %v530_v6, %v366_v62  ;;  %v640_v52 = vpop.permute.xlu1 (!%p864_p13), %639  ;;  %v630_v53 = vpop.permute.xlu0 (!%p864_p13), %629 }
 0x133   : > { %578 = vst.msk [vmem:[#allocation2 + $0x18] sm:$0xff] %vm574_vm1, %v561_v3  ;;  %586 = vst.msk [vmem:[#allocation2 + $0x58] sm:$0xff] %vm574_vm1, %v569_v4 }
 0x134   : > { %576 = vst.msk [vmem:[#allocation2 + $0x8] sm:$0xff] %vm574_vm1, %v559_v7  ;;  %584 = vst.msk [vmem:[#allocation2 + $0x48] sm:$0xff] %vm574_vm1, %v567_v8 }
 0x136   : > { %v905_v13 = vpop.f32.mrb[4].mxu0  ;;  %v913_v14 = vpop.f32.mrb[4].mxu1  ;;  %594 = sbr.rel (%p864_p13) target bundleno = 435 (0x1b3), region = 81 }
 0x137   : > { %v564_v17 = vadd.f32 %v905_v13, %v363_v9  ;;  %v572_v18 = vadd.f32 %v913_v14, %v371_v10  ;;  %v511_v19 = vpop.f32.mrb[5].mxu0  ;;  %v543_v20 = vpop.f32.mrb[5].mxu1 }
 0x138   : > { %v562_v23 = vadd.f32 %v511_v19, %v361_v11  ;;  %v570_v24 = vadd.f32 %v543_v20, %v369_v12  ;;  %v906_v25 = vpop.f32.mrb[6].mxu0  ;;  %v914_v26 = vpop.f32.mrb[6].mxu1  ;;  %v613_v50 = vld [vmem:[#allocation2 + $0x10] sm:$0xff] (!%p864_p13) }
 0x139   : > { %581 = vst.msk [vmem:[#allocation2 + $0x30] sm:$0xff] %vm574_vm1, %v564_v17  ;;  %589 = vst.msk [vmem:[#allocation2 + $0x70] sm:$0xff] %vm574_vm1, %v572_v18  ;;  %v565_v27 = vadd.f32 %v906_v25, %v364_v15  ;;  %v573_v28 = vadd.f32 %v914_v26, %v372_v16  ;;  %v514_v29 = vpop.f32.mrb[7].mxu0  ;;  %v546_v30 = vpop.f32.mrb[7].mxu1  ;;  %v611_v51 = vld [vmem:[#allocation2] sm:$0xff] (!%p864_p13)  ;;  %v709_v54 = vmul.f32 (!%p864_p13), %v640_v52, %v613_v50  ;;  %v621_v17 = vld [vmem:[#allocation2 + $0x50] sm:$0xff] (!%p864_p13) }
 0x13a   : > { %579 = vst.msk [vmem:[#allocation2 + $0x20] sm:$0xff] %vm574_vm1, %v562_v23  ;;  %587 = vst.msk [vmem:[#allocation2 + $0x60] sm:$0xff] %vm574_vm1, %v570_v24  ;;  %v563_v31 = vadd.f32 %v514_v29, %v362_v21  ;;  %v571_v32 = vadd.f32 %v546_v30, %v370_v22  ;;  %v707_v55 = vmul.f32 (!%p864_p13), %v630_v53, %v611_v51  ;;  %v614_v56 = vld [vmem:[#allocation2 + $0x18] sm:$0xff] (!%p864_p13)  ;;  %v645_v58 = vpop.permute.xlu1 (!%p864_p13), %644  ;;  %v635_v59 = vpop.permute.xlu0 (!%p864_p13), %634  ;;  %v619_v11 = vld [vmem:[#allocation2 + $0x40] sm:$0xff] (!%p864_p13) }
 0x13b   : > { %582 = vst.msk [vmem:[#allocation2 + $0x38] sm:$0xff] %vm574_vm1, %v565_v27  ;;  %590 = vst.msk [vmem:[#allocation2 + $0x78] sm:$0xff] %vm574_vm1, %v573_v28  ;;  %v612_v57 = vld [vmem:[#allocation2 + $0x8] sm:$0xff] (!%p864_p13)  ;;  %v710_v60 = vmul.f32 (!%p864_p13), %v645_v58, %v614_v56  ;;  %v622_v16 = vld [vmem:[#allocation2 + $0x58] sm:$0xff] (!%p864_p13) }
 0x13c   : > { %580 = vst.msk [vmem:[#allocation2 + $0x28] sm:$0xff] %vm574_vm1, %v563_v31  ;;  %588 = vst.msk [vmem:[#allocation2 + $0x68] sm:$0xff] %vm574_vm1, %v571_v32  ;;  %v708_v61 = vmul.f32 (!%p864_p13), %v635_v59, %v612_v57  ;;  %v620_v10 = vld [vmem:[#allocation2 + $0x48] sm:$0xff] (!%p864_p13) }
 0x13d   : > { %725 = vst.msk [vmem:[%s1174_s4 + $0x10] sm:$0xff] %vm574_vm1, %v709_v54  ;;  %723 = vst.msk [vmem:[%s1174_s4] sm:$0xff] %vm574_vm1, %v707_v55 }
 0x13e   : > { %726 = vst.msk [vmem:[%s1174_s4 + $0x18] sm:$0xff] %vm574_vm1, %v710_v60  ;;  %724 = vst.msk [vmem:[%s1174_s4 + $0x8] sm:$0xff] %vm574_vm1, %v708_v61  ;;  %v655_v0 = vpop.permute.xlu1 %654  ;;  %v650_v1 = vpop.permute.xlu0 %649 }
 0x140   : > { %v617_v5 = vld [vmem:[#allocation2 + $0x30] sm:$0xff] }
 0x141   : > { %v615_v63 = vld [vmem:[#allocation2 + $0x20] sm:$0xff]  ;;  %v625_v29 = vld [vmem:[#allocation2 + $0x70] sm:$0xff] }
 0x142   : > { %v711_v3 = vmul.f32 %v650_v1, %v615_v63  ;;  %v618_v4 = vld [vmem:[#allocation2 + $0x38] sm:$0xff]  ;;  %v665_v6 = vpop.permute.xlu1 %664  ;;  %v660_v7 = vpop.permute.xlu0 %659  ;;  %v623_v23 = vld [vmem:[#allocation2 + $0x60] sm:$0xff] }
 0x143   : > { %v616_v62 = vld [vmem:[#allocation2 + $0x28] sm:$0xff]  ;;  %v714_v8 = vmul.f32 %v665_v6, %v618_v4  ;;  %v713_v9 = vmul.f32 %v660_v7, %v617_v5  ;;  %v626_v28 = vld [vmem:[#allocation2 + $0x78] sm:$0xff] }
 0x144   : > { %v712_v2 = vmul.f32 %v655_v0, %v616_v62  ;;  %727 = vst.msk [vmem:[%s1174_s4 + $0x20] sm:$0xff] %vm574_vm1, %v711_v3  ;;  %v624_v22 = vld [vmem:[#allocation2 + $0x68] sm:$0xff] }
 0x145   : > { %730 = vst.msk [vmem:[%s1174_s4 + $0x38] sm:$0xff] %vm574_vm1, %v714_v8  ;;  %729 = vst.msk [vmem:[%s1174_s4 + $0x30] sm:$0xff] %vm574_vm1, %v713_v9 }
 0x146   : > { %728 = vst.msk [vmem:[%s1174_s4 + $0x28] sm:$0xff] %vm574_vm1, %v712_v2  ;;  %v675_v12 = vpop.permute.xlu1 %674  ;;  %v670_v13 = vpop.permute.xlu0 %669 }
 0x147   : > { %v716_v14 = vmul.f32 %v675_v12, %v620_v10  ;;  %v715_v15 = vmul.f32 %v670_v13, %v619_v11 }
 0x149   : > { %732 = vst.msk [vmem:[%s1174_s4 + $0x48] sm:$0xff] %vm574_vm1, %v716_v14  ;;  %731 = vst.msk [vmem:[%s1174_s4 + $0x40] sm:$0xff] %vm574_vm1, %v715_v15 }
 0x14a   : > { %v685_v18 = vpop.permute.xlu1 %684  ;;  %v680_v19 = vpop.permute.xlu0 %679 }
 0x14b   : > { %v718_v20 = vmul.f32 %v685_v18, %v622_v16  ;;  %v717_v21 = vmul.f32 %v680_v19, %v621_v17 }
 0x14d   : > { %734 = vst.msk [vmem:[%s1174_s4 + $0x58] sm:$0xff] %vm574_vm1, %v718_v20  ;;  %733 = vst.msk [vmem:[%s1174_s4 + $0x50] sm:$0xff] %vm574_vm1, %v717_v21 }
 0x14e   : > { %v695_v24 = vpop.permute.xlu1 %694  ;;  %v690_v25 = vpop.permute.xlu0 %689 }
 0x14f   : > { %v720_v26 = vmul.f32 %v695_v24, %v624_v22  ;;  %v719_v27 = vmul.f32 %v690_v25, %v623_v23 }
 0x151   : > { %736 = vst.msk [vmem:[%s1174_s4 + $0x68] sm:$0xff] %vm574_vm1, %v720_v26  ;;  %735 = vst.msk [vmem:[%s1174_s4 + $0x60] sm:$0xff] %vm574_vm1, %v719_v27 }
 0x152   : > { %v705_v30 = vpop.permute.xlu1 %704 }
 0x153   : > { %v722_v32 = vmul.f32 %v705_v30, %v626_v28 }
 0x155   : > { %738 = vst.msk [vmem:[%s1174_s4 + $0x78] sm:$0xff] %vm574_vm1, %v722_v32 }
 0x1af   : > { %v700_v31 = vpop.permute.xlu0 %699 }
 0x1b0   : > { %v721_v33 = vmul.f32 %v700_v31, %v625_v29 }
 0x1b2   : > { %737 = vst.msk [vmem:[%s1174_s4 + $0x70] sm:$0xff] %vm574_vm1, %v721_v33 }
 0x1b3 PF: > { %s13_s18 = sadd.s32 1, %s1054_s18   ;;  %s1309_s12 = smov %s1034_s13 }
 0x1b4   : > { %p10_p0 = scmp.ge.s32.totalorder %s13_s18, 11   ;;  %s1310_s13 = smov %s1129_s25 }
 0x1b5   : > { %s1311_s14 = smov %s1046_s16  ;;  %s1312_s15 = smov %s1050_s17 }
 0x1b6   : > { %s1313_s16 = smov %s1316_s19  ;;  %s1314_s17 = smov %s1320_s20 }
 0x1b7   :  { %12 = sbr.rel (!%p10_p0) target bundleno = 4 (0x4), region = 122 }

// kernel: slog_n_forward.15
= control target key start
LH: loop header
LB: loop body
LE: loop exit
PB: predicated region body
PF: predicated region fallthrough
CT: control target
= control target key end

     0   :  { %s1725_s24 = smov 0   ;;  %s1727_s25 = smov 0   ;;  %s2038_s0 = inlined_call_operand.vmem [shape: bf16[384,384], index: 0, kind: input, shape index: {}]   ;;  %s2039_s1 = inlined_call_operand.vmem [shape: f32[384,16], index: 1, kind: input, shape index: {}]   ;;  %s2040_s2 = inlined_call_operand.vmem [shape: f32[384,16], index: 2, kind: input, shape index: {}]   ;;  %s2041_s3 = inlined_call_operand.vmem [shape: f32[16,32], index: 3, kind: input, shape index: {}]   ;;  %s2042_s4 = inlined_call_operand.vmem [shape: f32[1,32], index: 4, kind: input, shape index: {}]   ;;  %s2043_s5 = inlined_call_operand.vmem [shape: f32[16,32], index: 5, kind: input, shape index: {}]   ;;  %s2044_s6 = inlined_call_operand.vmem [shape: f32[1,32], index: 6, kind: input, shape index: {}]   ;;  %s2045_s7 = inlined_call_operand.vmem [shape: f32[384,32], index: 7, kind: output, shape index: {}]  }
   0x1   :  { %s1729_s26 = smov 0   ;;  %s1731_s27 = smov 0  }
   0x2   :  { %s1733_s28 = smov 0   ;;  %s1735_s29 = smov 0  }
   0x3   :  { %s1737_s30 = smov 0  }
   0x4 LB: > { %s26_s8 = sadd.s32 1, %s1674_s28  ;;  %s29_s9 = sadd.s32 1, %s1678_s29  ;;  %s1682_s30 = sphi %s1737_s30, %s17_s30   ;;  %s1678_s29 = sphi %s1735_s29, %s2051_s29   ;;  %s1674_s28 = sphi %s1733_s28, %s2050_s28   ;;  %s1670_s27 = sphi %s1731_s27, %s2049_s27   ;;  %s1666_s26 = sphi %s1729_s26, %s2048_s26   ;;  %s1662_s25 = sphi %s1727_s25, %s2047_s25   ;;  %s1658_s24 = sphi %s1725_s24, %s2046_s24  }
   0x5   : > { %p27_p0 = scmp.ge.s32.totalorder %s26_s8, 3  ;;  %p45_p1 = scmp.ne.s32.totalorder %s1662_s25, %s1658_s24 }
   0x6   : > { %p46_p2 = scmp.eq.s32.totalorder %s1682_s30, 0  ;;  %s38_s13 = sadd.s32 1, %s1662_s25 }
   0x7   : > { %s2053_s8 = smov (%p27_p0, %s26_s8), 0  ;;  %s2055_s9 = smov (!%p27_p0, %s29_s9), %s1678_s29 }
   0x8   : > { %p47_p3 = por %p46_p2, %p45_p1  ;;  %p31_p4 = scmp.ge.s32.totalorder %s2055_s9, 3 }
   0x9   : > { %s34_s10 = ssub.s32 %s1674_s28, %s2053_s8  ;;  %p1339_p6 = scmp.ge.s32.totalorder %s1682_s30, 9 }
   0xa   : > { %s2057_s9 = smov (%p31_p4, %s2055_s9), 0 }
   0xb   : > { %s33_s11 = ssub.s32 %s1678_s29, %s2057_s9  ;;  %245 = sbr.rel (%p1339_p6) target bundleno = 35 (0x23), region = 32 }
   0xc   : > { %s35_s12 = sor.u32 %s34_s10, %s33_s11 }
   0xd   : > { %p36_p5 = scmp.eq.s32.totalorder %s35_s12, 0 }
   0xf   : > { %s1776_s14 = scalar_select %p36_p5, %s1662_s25, %s38_s13  }
  0x12   : > { %248 = sbr.rel (!%p47_p3) target bundleno = 35 (0x23), region = 36  ;;  %s250_s15 = sand.u32 (%p47_p3), 1, %s1662_s25  }
  0x13   : > { %s1562_s16 = smul.u32 (%p47_p3), 48, %s1678_s29  ;;  %s1340_s17 = sshll.u32 (%p47_p3), %s250_s15, 6 }
  0x14   : > { %s252_s23 = scalar_lea.vmem (%p47_p3), [#allocation3], %s1340_s17 }
  0x15   : > { %s255_s18 = sadd.s32 (%p47_p3), %s1674_s28, %s1562_s16 }
  0x16   : > { %s1343_s19 = sshll.u32 (%p47_p3), %s255_s18, 2 }
  0x17   : > { %s1785_s22 = scalar_lea.vmem (%p47_p3), %s2038_s0, %s1343_s19 }
  0x18   : > { %v273_v0 = vld [vmem:[%s1785_s22] sm:$0xf] (%p47_p3)  ;;  %v275_v1 = vld [vmem:[%s1785_s22 + $0xc] sm:$0xf] (%p47_p3)  ;;  %v277_v2 = vld [vmem:[%s1785_s22 + $0x18] sm:$0xf] (%p47_p3) }
  0x19   : > { %274 = vst [vmem:[%s252_s23] sm:$0xf] %v273_v0  ;;  %276 = vst [vmem:[%s252_s23 + $0x4] sm:$0xf] %v275_v1  ;;  %v279_v3 = vld [vmem:[%s1785_s22 + $0x24] sm:$0xf] }
  0x1a   : > { %278 = vst [vmem:[%s252_s23 + $0x8] sm:$0xf] %v277_v2  ;;  %v281_v4 = vld [vmem:[%s1785_s22 + $0x30] sm:$0xf]  ;;  %v283_v5 = vld [vmem:[%s1785_s22 + $0x3c] sm:$0xf] }
  0x1b   : > { %280 = vst [vmem:[%s252_s23 + $0xc] sm:$0xf] %v279_v3  ;;  %282 = vst [vmem:[%s252_s23 + $0x10] sm:$0xf] %v281_v4  ;;  %v285_v6 = vld [vmem:[%s1785_s22 + $0x48] sm:$0xf] }
  0x1c   : > { %284 = vst [vmem:[%s252_s23 + $0x14] sm:$0xf] %v283_v5  ;;  %v287_v7 = vld [vmem:[%s1785_s22 + $0x54] sm:$0xf]  ;;  %v289_v8 = vld [vmem:[%s1785_s22 + $0x60] sm:$0xf] }
  0x1d   : > { %286 = vst [vmem:[%s252_s23 + $0x18] sm:$0xf] %v285_v6  ;;  %288 = vst [vmem:[%s252_s23 + $0x1c] sm:$0xf] %v287_v7  ;;  %v291_v9 = vld [vmem:[%s1785_s22 + $0x6c] sm:$0xf] }
  0x1e   : > { %290 = vst [vmem:[%s252_s23 + $0x20] sm:$0xf] %v289_v8  ;;  %v293_v10 = vld [vmem:[%s1785_s22 + $0x78] sm:$0xf]  ;;  %v295_v11 = vld [vmem:[%s1785_s22 + $0x84] sm:$0xf] }
  0x1f   : > { %292 = vst [vmem:[%s252_s23 + $0x24] sm:$0xf] %v291_v9  ;;  %294 = vst [vmem:[%s252_s23 + $0x28] sm:$0xf] %v293_v10  ;;  %v297_v12 = vld [vmem:[%s1785_s22 + $0x90] sm:$0xf] }
  0x20   : > { %296 = vst [vmem:[%s252_s23 + $0x2c] sm:$0xf] %v295_v11  ;;  %v299_v13 = vld [vmem:[%s1785_s22 + $0x9c] sm:$0xf]  ;;  %v301_v14 = vld [vmem:[%s1785_s22 + $0xa8] sm:$0xf] }
  0x21   : > { %298 = vst [vmem:[%s252_s23 + $0x30] sm:$0xf] %v297_v12  ;;  %300 = vst [vmem:[%s252_s23 + $0x34] sm:$0xf] %v299_v13  ;;  %v303_v15 = vld [vmem:[%s1785_s22 + $0xb4] sm:$0xf] }
  0x22   : > { %302 = vst [vmem:[%s252_s23 + $0x38] sm:$0xf] %v301_v14  ;;  %304 = vst [vmem:[%s252_s23 + $0x3c] sm:$0xf] %v303_v15 }
  0x23 PF: > { %p1344_p7 = scmp.ge.s32.totalorder %s1682_s30, 1  ;;  %p376_p8 = scmp.lt.s32.totalorder %s1682_s30, 10 }
  0x25   : > { %p377_p9 = pnand %p1344_p7, %p376_p8 }
  0x26   : > { %s383_s10 = sand.u32 (!%p377_p9), 1, %s1658_s24   ;;  %s1346_s11 = sshll.u32 (!%p377_p9), %s1666_s26, 4 }
  0x27   : > { %380 = sbr.rel (%p377_p9) target bundleno = 570 (0x23a), region = 85  ;;  %s1345_s12 = sshll.u32 (!%p377_p9), %s383_s10, 6 }
  0x28   : > { %p426_p10 = scmp.lt.s32.totalorder (!%p377_p9), %s1346_s11, 47  ;;  %s1348_s13 = sshll.u32 (!%p377_p9), %s1670_s27, 4 }
  0x29   : > { %p432_p11 = scmp.lt.s32.totalorder (!%p377_p9), %s1348_s13, 47  ;;  %s1823_s27 = scalar_lea.vmem (!%p377_p9), [#allocation3], %s1345_s12 }
  0x2a   : > { %p1352_p12 = scmp.ne.s32.totalorder (!%p377_p9), %s1666_s26, 0 }
  0x2e   : > { %s2059_s11 = smov (!%p426_p10, %s1346_s11), 47  ;;  %s2061_s13 = smov (!%p432_p11, %s1348_s13), 47 }
  0x2f   : > { %s1347_s15 = sshll.u32 %s2059_s11, 3  ;;  %s1349_s19 = sshll.u32 %s2061_s13, 3  ;;  %vm448_vm0 = vcmask (!%p1352_p12), 130048   ;;  %v1684_v16 = vmov (!%p1352_p12), 0.0  }
  0x30   : > { %s1811_s18 = scalar_lea.vmem %s2039_s1, %s1347_s15  ;;  %s1816_s22 = scalar_lea.vmem %s2040_s2, %s1349_s19  ;;  %449 = vst.msk [vmem:[#allocation2] sm:$0xff] (!%p1352_p12), %vm448_vm0, %v1684_v16  ;;  %450 = vst.msk [vmem:[#allocation2 + $0x8] sm:$0xff] (!%p1352_p12), %vm448_vm0, %v1684_v16 }
  0x31   : > { %s1821_s10 = scalar_lea.vmem %s2045_s7, %s1349_s19  ;;  %447 = sbr.rel (%p1352_p12) target bundleno = 56 (0x38), region = 93  ;;  %451 = vst.msk [vmem:[#allocation2 + $0x10] sm:$0xff] (!%p1352_p12), %vm448_vm0, %v1684_v16  ;;  %452 = vst.msk [vmem:[#allocation2 + $0x18] sm:$0xff] (!%p1352_p12), %vm448_vm0, %v1684_v16 }
  0x32   : > { %453 = vst.msk [vmem:[#allocation2 + $0x20] sm:$0xff] (!%p1352_p12), %vm448_vm0, %v1684_v16  ;;  %454 = vst.msk [vmem:[#allocation2 + $0x28] sm:$0xff] (!%p1352_p12), %vm448_vm0, %v1684_v16 }
  0x33   : > { %455 = vst.msk [vmem:[#allocation2 + $0x30] sm:$0xff] (!%p1352_p12), %vm448_vm0, %v1684_v16  ;;  %456 = vst.msk [vmem:[#allocation2 + $0x38] sm:$0xff] (!%p1352_p12), %vm448_vm0, %v1684_v16 }
  0x34   : > { %457 = vst.msk [vmem:[#allocation2 + $0x40] sm:$0xff] (!%p1352_p12), %vm448_vm0, %v1684_v16  ;;  %458 = vst.msk [vmem:[#allocation2 + $0x48] sm:$0xff] (!%p1352_p12), %vm448_vm0, %v1684_v16 }
  0x35   : > { %459 = vst.msk [vmem:[#allocation2 + $0x50] sm:$0xff] (!%p1352_p12), %vm448_vm0, %v1684_v16  ;;  %460 = vst.msk [vmem:[#allocation2 + $0x58] sm:$0xff] (!%p1352_p12), %vm448_vm0, %v1684_v16 }
  0x36   : > { %461 = vst.msk [vmem:[#allocation2 + $0x60] sm:$0xff] (!%p1352_p12), %vm448_vm0, %v1684_v16  ;;  %462 = vst.msk [vmem:[#allocation2 + $0x68] sm:$0xff] (!%p1352_p12), %vm448_vm0, %v1684_v16 }
  0x37   : > { %463 = vst.msk [vmem:[#allocation2 + $0x70] sm:$0xff] (!%p1352_p12), %vm448_vm0, %v1684_v16  ;;  %464 = vst.msk [vmem:[#allocation2 + $0x78] sm:$0xff] (!%p1352_p12), %vm448_vm0, %v1684_v16 }
  0x38 PF: > { %v497_v17 = vld [vmem:[%s1811_s18] sm:$0xff]  ;;  %v498_v18 = vld [vmem:[%s1811_s18 + $0x8] sm:$0xff]  ;;  %v499_v19 = vld [vmem:[%s1811_s18 + $0x10] sm:$0xff]  ;;  %vm682_vm1 = vcmask 130048   ;;  %p1361_p13 = scmp.ne.s32.totalorder %s1666_s26, 2 }
  0x39   : > { %v513_v20 = vpack.c.bf16 %v498_v18, %v497_v17  ;;  %v500_v21 = vld [vmem:[%s1811_s18 + $0x18] sm:$0xff]  ;;  %v501_v23 = vld [vmem:[%s1811_s18 + $0x20] sm:$0xff]  ;;  %v502_v24 = vld [vmem:[%s1811_s18 + $0x28] sm:$0xff]  ;;  %vm1219_vm2 = vcmask (!%p1361_p13), 261120  }
  0x3a   : > { %v514_v22 = vpack.c.bf16 %v500_v21, %v499_v19  ;;  %v503_v25 = vld [vmem:[%s1811_s18 + $0x30] sm:$0xff]  ;;  %v515_v26 = vpack.c.bf16 %v502_v24, %v501_v23  ;;  %v504_v27 = vld [vmem:[%s1811_s18 + $0x38] sm:$0xff]  ;;  %v1620_v28 = vld [vmem:[%s1823_s27] sm:$0xff]  }
  0x3b   : > { %1450 = vmatprep.subr.bf16.mxu0 %v513_v20  ;;  %1546 = vmatprep.subr.bf16.mxu1 %v513_v20  ;;  %v1621_v29 = vld [vmem:[%s1823_s27 + $0x20] sm:$0xff]   ;;  %v516_v30 = vpack.c.bf16 %v504_v27, %v503_v25  ;;  %v506_v32 = vld [vmem:[%s1811_s18 + $0x48] sm:$0xff]  ;;  %v507_v34 = vld [vmem:[%s1811_s18 + $0x50] sm:$0xff] }
  0x3c   : > { %1451 = vmatpush3.bf16.msra.mxu0 %v513_v20  ;;  %1554 = vmatpush3.bf16.msra.mxu1 %v513_v20  ;;  %v505_v31 = vld [vmem:[%s1811_s18 + $0x40] sm:$0xff]  ;;  %v508_v35 = vld [vmem:[%s1811_s18 + $0x58] sm:$0xff]  ;;  %v510_v38 = vld [vmem:[%s1811_s18 + $0x68] sm:$0xff] }
  0x3d   : > { %1452 = vmatprep.subr.bf16.mxu0 %v514_v22  ;;  %1547 = vmatprep.subr.bf16.mxu1 %v514_v22  ;;  %v517_v33 = vpack.c.bf16 %v506_v32, %v505_v31  ;;  %v518_v36 = vpack.c.bf16 %v508_v35, %v507_v34  ;;  %v509_v37 = vld [vmem:[%s1811_s18 + $0x60] sm:$0xff]  ;;  %v511_v40 = vld [vmem:[%s1811_s18 + $0x70] sm:$0xff]  ;;  %v512_v41 = vld [vmem:[%s1811_s18 + $0x78] sm:$0xff] }
  0x3e   : > { %1466 = vmatprep.mubr.bf16.mxu0 %v1620_v28  ;;  %1474 = vmatprep.mubr.bf16.mxu1 %v1621_v29  ;;  %v519_v39 = vpack.c.bf16 %v510_v38, %v509_v37  ;;  %v520_v42 = vpack.c.bf16 %v512_v41, %v511_v40  ;;  %v1622_v43 = vld [vmem:[%s1823_s27 + $0x8] sm:$0xff]   ;;  %v1624_v45 = vld [vmem:[%s1823_s27 + $0x10] sm:$0xff]   ;;  %v1626_v47 = vld [vmem:[%s1823_s27 + $0x18] sm:$0xff]  }
  0x3f   : > { %v1623_v44 = vld [vmem:[%s1823_s27 + $0x28] sm:$0xff]   ;;  %v1625_v46 = vld [vmem:[%s1823_s27 + $0x30] sm:$0xff]   ;;  %v1627_v48 = vld [vmem:[%s1823_s27 + $0x38] sm:$0xff]  }
  0x40   : > { %1453 = vmatpush3.bf16.msra.mxu0 %v514_v22  ;;  %1555 = vmatpush3.bf16.msra.mxu1 %v514_v22  ;;  %v467_v49 = vld [vmem:[#allocation2 + $0x10] sm:$0xff]  ;;  %v465_v51 = vld [vmem:[#allocation2] sm:$0xff]  ;;  %v468_v55 = vld [vmem:[#allocation2 + $0x18] sm:$0xff] }
  0x41   : > { %1454 = vmatprep.subr.bf16.mxu0 %v515_v26  ;;  %1548 = vmatprep.subr.bf16.mxu1 %v515_v26  ;;  %v475_v50 = vld [vmem:[#allocation2 + $0x50] sm:$0xff]  ;;  %v473_v52 = vld [vmem:[#allocation2 + $0x40] sm:$0xff]  ;;  %v476_v56 = vld [vmem:[#allocation2 + $0x58] sm:$0xff] }
  0x42   : > { %v466_v61 = vld [vmem:[#allocation2 + $0x8] sm:$0xff]  ;;  %v471_v9 = vld [vmem:[#allocation2 + $0x30] sm:$0xff]  ;;  %v469_v11 = vld [vmem:[#allocation2 + $0x20] sm:$0xff] }
  0x43   : > { %v474_v62 = vld [vmem:[#allocation2 + $0x48] sm:$0xff]  ;;  %v479_v10 = vld [vmem:[#allocation2 + $0x70] sm:$0xff]  ;;  %v477_v12 = vld [vmem:[#allocation2 + $0x60] sm:$0xff] }
  0x44   : > { %1455 = vmatpush3.bf16.msra.mxu0 %v515_v26  ;;  %1556 = vmatpush3.bf16.msra.mxu1 %v515_v26  ;;  %v472_v15 = vld [vmem:[#allocation2 + $0x38] sm:$0xff]  ;;  %v470_v21 = vld [vmem:[#allocation2 + $0x28] sm:$0xff]  ;;  %v969_v37 = vld [vmem:[%s2043_s5] sm:$0xff] (!%p1361_p13) }
  0x45   : > { %1456 = vmatprep.subr.bf16.mxu0 %v516_v30  ;;  %1549 = vmatprep.subr.bf16.mxu1 %v516_v30  ;;  %v480_v16 = vld [vmem:[#allocation2 + $0x78] sm:$0xff]  ;;  %v478_v22 = vld [vmem:[#allocation2 + $0x68] sm:$0xff]  ;;  %v953_v40 = vld [vmem:[%s1816_s22] sm:$0xff] (!%p1361_p13) }
  0x46   : > { %v720_v34 = vld [vmem:[%s2041_s3 + $0x8] sm:$0xff] (!%p1361_p13) }
  0x47   : > { %v970_v38 = vld [vmem:[%s2043_s5 + $0x8] sm:$0xff] (!%p1361_p13) }
  0x48   : > { %1457 = vmatpush3.bf16.msra.mxu0 %v516_v30  ;;  %1557 = vmatpush3.bf16.msra.mxu1 %v516_v30 }
  0x49   : > { %1458 = vmatprep.subr.bf16.mxu0 %v517_v33  ;;  %1550 = vmatprep.subr.bf16.mxu1 %v517_v33 }
  0x4c   : > { %1459 = vmatpush3.bf16.msra.mxu0 %v517_v33  ;;  %1558 = vmatpush3.bf16.msra.mxu1 %v517_v33  ;;  %v719_v33 = vld [vmem:[%s2041_s3] sm:$0xff] (!%p1361_p13) }
  0x4d   : > { %1460 = vmatprep.subr.bf16.mxu0 %v518_v36  ;;  %1551 = vmatprep.subr.bf16.mxu1 %v518_v36 }
  0x50   : > { %1461 = vmatpush3.bf16.msra.mxu0 %v518_v36  ;;  %1559 = vmatpush3.bf16.msra.mxu1 %v518_v36  ;;  %v1538_v36 = vpack.c.bf16 (!%p1361_p13), %v720_v34, %v719_v33 }
  0x51   : > { %1462 = vmatprep.subr.bf16.mxu0 %v519_v39  ;;  %1552 = vmatprep.subr.bf16.mxu1 %v519_v39 }
  0x54   : > { %1463 = vmatpush3.bf16.msra.mxu0 %v519_v39  ;;  %1560 = vmatpush3.bf16.msra.mxu1 %v519_v39  ;;  %v1542_v39 = vpack.c.bf16 (!%p1361_p13), %v970_v38, %v969_v37 }
  0x55   : > { %1464 = vmatprep.subr.bf16.mxu0 %v520_v42  ;;  %1553 = vmatprep.subr.bf16.mxu1 %v520_v42 }
  0x58   : > { %1465 = vmatpush3.bf16.msra.mxu0 %v520_v42  ;;  %1561 = vmatpush3.bf16.msra.mxu1 %v520_v42 }
  0x59   : > { %1539 = vmatprep.subr.bf16.mxu0 (!%p1361_p13), %v1538_v36  ;;  %1543 = vmatprep.subr.bf16.mxu1 (!%p1361_p13), %v1542_v39 }
  0x5b   : > { %1467 = vmatmul.mubr.bf16.vlgmr.msra.gmra.mrb[0].mxu0 %v1622_v43  ;;  %1475 = vmatmul.mubr.bf16.vlgmr.msra.gmra.mrb[0].mxu1 %v1623_v44  ;;  %v954_v43 = vld [vmem:[%s1816_s22 + $0x8] sm:$0xff] (!%p1361_p13)  ;;  %v955_v44 = vld [vmem:[%s1816_s22 + $0x10] sm:$0xff] (!%p1361_p13) }
  0x5c   : > { %1470 = vmatprep.mubr.bf16.mxu0 %v1624_v45  ;;  %1478 = vmatprep.mubr.bf16.mxu1 %v1625_v46 }
  0x5d   : > { %1541 = vmatpush3.bf16.msra.mxu0 (!%p1361_p13), %v1538_v36  ;;  %1545 = vmatpush3.bf16.msra.mxu1 (!%p1361_p13), %v1542_v39 }
  0x63   : > { %1471 = vmatmul.mubr.bf16.gmra.mrb[4].mxu0 %v1626_v47  ;;  %1479 = vmatmul.mubr.bf16.gmra.mrb[4].mxu1 %v1627_v48  ;;  %v956_v47 = vld [vmem:[%s1816_s22 + $0x18] sm:$0xff] (!%p1361_p13)  ;;  %v957_v48 = vld [vmem:[%s1816_s22 + $0x20] sm:$0xff] (!%p1361_p13) }
  0x64   : > { %1514 = vmatprep.mubr.msk.f32.mxu1 (!%p1361_p13), %vm682_vm1, %v953_v40 }
 0x12e   : > { %v1468_v53 = vpop.f32.mrb[0].mxu0  ;;  %v1476_v54 = vpop.f32.mrb[0].mxu1 }
 0x12f   : > { %v668_v57 = vadd.f32 %v1468_v53, %v467_v49  ;;  %v676_v58 = vadd.f32 %v1476_v54, %v475_v50  ;;  %v603_v59 = vpop.f32.mrb[1].mxu0  ;;  %v635_v60 = vpop.f32.mrb[1].mxu1  ;;  %1515 = vmatmul.mubr.msk.f32.vlgmr.msra.gmra.mrb[0].mxu1 (!%p1361_p13), %vm682_vm1, %v954_v43 }
 0x130   : > { %v666_v63 = vadd.f32 %v603_v59, %v465_v51  ;;  %v674_v0 = vadd.f32 %v635_v60, %v473_v52  ;;  %v1469_v1 = vpop.f32.mrb[2].mxu0  ;;  %v1477_v2 = vpop.f32.mrb[2].mxu1  ;;  %1517 = vmatprep.mubr.msk.f32.mxu1 (!%p1361_p13), %vm682_vm1, %v955_v44  ;;  %v958_v51 = vld [vmem:[%s1816_s22 + $0x28] sm:$0xff] (!%p1361_p13)  ;;  %v959_v52 = vld [vmem:[%s1816_s22 + $0x30] sm:$0xff] (!%p1361_p13) }
 0x131   : > { %685 = vst.msk [vmem:[#allocation2 + $0x10] sm:$0xff] %vm682_vm1, %v668_v57  ;;  %693 = vst.msk [vmem:[#allocation2 + $0x50] sm:$0xff] %vm682_vm1, %v676_v58  ;;  %v669_v3 = vadd.f32 %v1469_v1, %v468_v55  ;;  %v677_v4 = vadd.f32 %v1477_v2, %v476_v56  ;;  %v606_v5 = vpop.f32.mrb[3].mxu0  ;;  %v638_v6 = vpop.f32.mrb[3].mxu1  ;;  %v960_v55 = vld [vmem:[%s1816_s22 + $0x38] sm:$0xff] (!%p1361_p13)  ;;  %v961_v56 = vld [vmem:[%s1816_s22 + $0x40] sm:$0xff] (!%p1361_p13) }
 0x132   : > { %683 = vst.msk [vmem:[#allocation2] sm:$0xff] %vm682_vm1, %v666_v63  ;;  %691 = vst.msk [vmem:[#allocation2 + $0x40] sm:$0xff] %vm682_vm1, %v674_v0  ;;  %v667_v7 = vadd.f32 %v606_v5, %v466_v61  ;;  %v675_v8 = vadd.f32 %v638_v6, %v474_v62  ;;  %v962_v59 = vld [vmem:[%s1816_s22 + $0x48] sm:$0xff] (!%p1361_p13)  ;;  %v963_v60 = vld [vmem:[%s1816_s22 + $0x50] sm:$0xff] (!%p1361_p13) }
 0x133   : > { %686 = vst.msk [vmem:[#allocation2 + $0x18] sm:$0xff] %vm682_vm1, %v669_v3  ;;  %694 = vst.msk [vmem:[#allocation2 + $0x58] sm:$0xff] %vm682_vm1, %v677_v4  ;;  %1518 = vmatmul.mubr.msk.f32.gmra.mrb[2].mxu1 (!%p1361_p13), %vm682_vm1, %v956_v47  ;;  %v964_v63 = vld [vmem:[%s1816_s22 + $0x58] sm:$0xff] (!%p1361_p13)  ;;  %v965_v0 = vld [vmem:[%s1816_s22 + $0x60] sm:$0xff] (!%p1361_p13) }
 0x134   : > { %684 = vst.msk [vmem:[#allocation2 + $0x8] sm:$0xff] %vm682_vm1, %v667_v7  ;;  %692 = vst.msk [vmem:[#allocation2 + $0x48] sm:$0xff] %vm682_vm1, %v675_v8  ;;  %1520 = vmatprep.mubr.msk.f32.mxu1 (!%p1361_p13), %vm682_vm1, %v957_v48  ;;  %v966_v3 = vld [vmem:[%s1816_s22 + $0x68] sm:$0xff] (!%p1361_p13)  ;;  %v967_v4 = vld [vmem:[%s1816_s22 + $0x70] sm:$0xff] (!%p1361_p13) }
 0x135   : > { %v968_v6 = vld [vmem:[%s1816_s22 + $0x78] sm:$0xff] (!%p1361_p13)  ;;  %v1946_v7 = vld [vmem:[%s2042_s4] ss:$0 sm:$0xff] (!%p1361_p13) }
 0x136   : > { %v1472_v13 = vpop.f32.mrb[4].mxu0  ;;  %v1480_v14 = vpop.f32.mrb[4].mxu1  ;;  %702 = sbr.rel (%p1361_p13) target bundleno = 570 (0x23a), region = 97 }
 0x137   : > { %v672_v17 = vadd.f32 %v1472_v13, %v471_v9  ;;  %v680_v18 = vadd.f32 %v1480_v14, %v479_v10  ;;  %v619_v19 = vpop.f32.mrb[5].mxu0  ;;  %v651_v20 = vpop.f32.mrb[5].mxu1  ;;  %1521 = vmatmul.mubr.msk.f32.gmra.mrb[4].mxu1 (!%p1361_p13), %vm682_vm1, %v958_v51  ;;  %v1951_v9 = vld [vmem:[%s2044_s6] ss:$0 sm:$0xff] (!%p1361_p13) }
 0x138   : > { %v670_v23 = vadd.f32 %v619_v19, %v469_v11  ;;  %v678_v24 = vadd.f32 %v651_v20, %v477_v12  ;;  %v1473_v25 = vpop.f32.mrb[6].mxu0  ;;  %v1481_v26 = vpop.f32.mrb[6].mxu1  ;;  %v705_v42 = vld [vmem:[#allocation2 + $0x10] sm:$0xff] (!%p1361_p13)  ;;  %1523 = vmatprep.mubr.msk.f32.mxu1 (!%p1361_p13), %vm682_vm1, %v959_v52 }
 0x139   : > { %689 = vst.msk [vmem:[#allocation2 + $0x30] sm:$0xff] %vm682_vm1, %v672_v17  ;;  %697 = vst.msk [vmem:[#allocation2 + $0x70] sm:$0xff] %vm682_vm1, %v680_v18  ;;  %v673_v27 = vadd.f32 %v1473_v25, %v472_v15  ;;  %v681_v28 = vadd.f32 %v1481_v26, %v480_v16  ;;  %v622_v29 = vpop.f32.mrb[7].mxu0  ;;  %v654_v30 = vpop.f32.mrb[7].mxu1  ;;  %v703_v35 = vld [vmem:[#allocation2] sm:$0xff] (!%p1361_p13)  ;;  %v713_v58 = vld [vmem:[#allocation2 + $0x50] sm:$0xff] (!%p1361_p13) }
 0x13a   : > { %687 = vst.msk [vmem:[#allocation2 + $0x20] sm:$0xff] %vm682_vm1, %v670_v23  ;;  %695 = vst.msk [vmem:[#allocation2 + $0x60] sm:$0xff] %vm682_vm1, %v678_v24  ;;  %v671_v31 = vadd.f32 %v622_v29, %v470_v21  ;;  %v679_v32 = vadd.f32 %v654_v30, %v478_v22  ;;  %1486 = vmatprep.mubr.msk.f32.mxu0 (!%p1361_p13), %vm682_vm1, %v703_v35  ;;  %v706_v45 = vld [vmem:[#allocation2 + $0x18] sm:$0xff] (!%p1361_p13)  ;;  %v711_v54 = vld [vmem:[#allocation2 + $0x40] sm:$0xff] (!%p1361_p13) }
 0x13b   : > { %690 = vst.msk [vmem:[#allocation2 + $0x38] sm:$0xff] %vm682_vm1, %v673_v27  ;;  %698 = vst.msk [vmem:[#allocation2 + $0x78] sm:$0xff] %vm682_vm1, %v681_v28  ;;  %v704_v41 = vld [vmem:[#allocation2 + $0x8] sm:$0xff] (!%p1361_p13)  ;;  %1524 = vmatmul.mubr.msk.f32.gmra.mrb[6].mxu1 (!%p1361_p13), %vm682_vm1, %v960_v55  ;;  %v714_v61 = vld [vmem:[#allocation2 + $0x58] sm:$0xff] (!%p1361_p13) }
 0x13c   : > { %688 = vst.msk [vmem:[#allocation2 + $0x28] sm:$0xff] %vm682_vm1, %v671_v31  ;;  %696 = vst.msk [vmem:[#allocation2 + $0x68] sm:$0xff] %vm682_vm1, %v679_v32  ;;  %1487 = vmatmul.mubr.msk.f32.vlgmr.msra.gmra.mrb[0].mxu0 (!%p1361_p13), %vm682_vm1, %v704_v41  ;;  %v712_v57 = vld [vmem:[#allocation2 + $0x48] sm:$0xff] (!%p1361_p13)  ;;  %1526 = vmatprep.mubr.msk.f32.mxu1 (!%p1361_p13), %vm682_vm1, %v961_v56 }
 0x13d   : > { %1489 = vmatprep.mubr.msk.f32.mxu0 %vm682_vm1, %v705_v42 }
 0x13f   : > { %1527 = vmatmul.mubr.msk.f32.gmra.mrb[8].mxu1 %vm682_vm1, %v962_v59 }
 0x140   : > { %1490 = vmatmul.mubr.msk.f32.gmra.mrb[2].mxu0 %vm682_vm1, %v706_v45  ;;  %v709_v50 = vld [vmem:[#allocation2 + $0x30] sm:$0xff]  ;;  %1529 = vmatprep.mubr.msk.f32.mxu1 %vm682_vm1, %v963_v60 }
 0x141   : > { %v707_v46 = vld [vmem:[#allocation2 + $0x20] sm:$0xff]  ;;  %v717_v2 = vld [vmem:[#allocation2 + $0x70] sm:$0xff] }
 0x142   : > { %1492 = vmatprep.mubr.msk.f32.mxu0 %vm682_vm1, %v707_v46  ;;  %v710_v53 = vld [vmem:[#allocation2 + $0x38] sm:$0xff]  ;;  %v715_v62 = vld [vmem:[#allocation2 + $0x60] sm:$0xff] }
 0x143   : > { %v708_v49 = vld [vmem:[#allocation2 + $0x28] sm:$0xff]  ;;  %1530 = vmatmul.mubr.msk.f32.gmra.mrb[10].mxu1 %vm682_vm1, %v964_v63  ;;  %v718_v5 = vld [vmem:[#allocation2 + $0x78] sm:$0xff] }
 0x144   : > { %1493 = vmatmul.mubr.msk.f32.gmra.mrb[4].mxu0 %vm682_vm1, %v708_v49  ;;  %v716_v1 = vld [vmem:[#allocation2 + $0x68] sm:$0xff]  ;;  %1532 = vmatprep.mubr.msk.f32.mxu1 %vm682_vm1, %v965_v0 }
 0x145   : > { %1495 = vmatprep.mubr.msk.f32.mxu0 %vm682_vm1, %v709_v50 }
 0x147   : > { %1533 = vmatmul.mubr.msk.f32.gmra.mrb[12].mxu1 %vm682_vm1, %v966_v3 }
 0x148   : > { %1496 = vmatmul.mubr.msk.f32.gmra.mrb[6].mxu0 %vm682_vm1, %v710_v53  ;;  %1535 = vmatprep.mubr.msk.f32.mxu1 %vm682_vm1, %v967_v4 }
 0x149   : > { %1498 = vmatprep.mubr.msk.f32.mxu0 %vm682_vm1, %v711_v54 }
 0x14b   : > { %1536 = vmatmul.mubr.msk.f32.gmra.mrb[14].mxu1 %vm682_vm1, %v968_v6 }
 0x14c   : > { %1499 = vmatmul.mubr.msk.f32.gmra.mrb[8].mxu0 %vm682_vm1, %v712_v57 }
 0x14d   : > { %1501 = vmatprep.mubr.msk.f32.mxu0 %vm682_vm1, %v713_v58 }
 0x150   : > { %1502 = vmatmul.mubr.msk.f32.gmra.mrb[10].mxu0 %vm682_vm1, %v714_v61 }
 0x151   : > { %1504 = vmatprep.mubr.msk.f32.mxu0 %vm682_vm1, %v715_v62 }
 0x154   : > { %1505 = vmatmul.mubr.msk.f32.gmra.mrb[12].mxu0 %vm682_vm1, %v716_v1 }
 0x155   : > { %1507 = vmatprep.mubr.msk.f32.mxu0 %vm682_vm1, %v717_v2 }
 0x158   : > { %1508 = vmatmul.mubr.msk.f32.gmra.mrb[14].mxu0 %vm682_vm1, %v718_v5 }
 0x202   : > { %v1516_v12 = vpop.f32.mrb[0].mxu1 }
 0x203   : > { %v1092_v14 = vpop.f32.mrb[1].mxu1  ;;  %v1098_v16 = vadd.f32 %v1516_v12, %v1951_v9 }
 0x204   : > { %v1093_v19 = vadd.f32 %v1951_v9, %v1092_v14 }
 0x206   : > { %v1519_v23 = vpop.f32.mrb[2].mxu1 }
 0x207   : > { %v1102_v26 = vpop.f32.mrb[3].mxu1  ;;  %v1108_v29 = vadd.f32 %v1519_v23, %v1951_v9 }
 0x208   : > { %v1103_v33 = vadd.f32 %v1951_v9, %v1102_v26 }
 0x20a   : > { %v1522_v38 = vpop.f32.mrb[4].mxu1 }
 0x20b   : > { %v1112_v42 = vpop.f32.mrb[5].mxu1  ;;  %v1118_v46 = vadd.f32 %v1522_v38, %v1951_v9 }
 0x20c   : > { %v1113_v51 = vadd.f32 %v1951_v9, %v1112_v42 }
 0x20e   : > { %v1525_v56 = vpop.f32.mrb[6].mxu1 }
 0x20f   : > { %v1488_v8 = vpop.f32.mrb[0].mxu0  ;;  %v1122_v60 = vpop.f32.mrb[7].mxu1  ;;  %v1128_v0 = vadd.f32 %v1525_v56, %v1951_v9 }
 0x210   : > { %v848_v10 = vadd.f32 %v1488_v8, %v1946_v7  ;;  %v842_v11 = vpop.f32.mrb[1].mxu0  ;;  %v1123_v5 = vadd.f32 %v1951_v9, %v1122_v60 }
 0x211   : > { %v843_v13 = vadd.f32 %v1946_v7, %v842_v11 }
 0x212   : > { %v922_v15 = vmul.f32 0.999995, %v848_v10  ;;  %v1528_v12 = vpop.f32.mrb[8].mxu1 }
 0x213   : > { %v921_v17 = vmul.f32 0.999995, %v843_v13  ;;  %v1491_v18 = vpop.f32.mrb[2].mxu0 }
 0x214   : > { %v938_v20 = vmax.f32 %v922_v15, 0.0  ;;  %v858_v21 = vadd.f32 %v1491_v18, %v1946_v7  ;;  %v852_v22 = vpop.f32.mrb[3].mxu0 }
 0x215   : > { %v937_v24 = vmax.f32 %v921_v17, 0.0  ;;  %v853_v25 = vadd.f32 %v1946_v7, %v852_v22 }
 0x216   : > { %v1172_v27 = vadd.f32 %v1098_v16, %v938_v20  ;;  %v924_v28 = vmul.f32 0.999995, %v858_v21  ;;  %v1132_v16 = vpop.f32.mrb[9].mxu1  ;;  %v1138_v20 = vadd.f32 %v1528_v12, %v1951_v9 }
 0x217   : > { %v1171_v30 = vadd.f32 %v1093_v19, %v937_v24  ;;  %v923_v31 = vmul.f32 0.999995, %v853_v25  ;;  %v1494_v32 = vpop.f32.mrb[4].mxu0  ;;  %v1133_v25 = vadd.f32 %v1951_v9, %v1132_v16 }
 0x218   : > { %v1188_v34 = vmax.f32 %v1172_v27, 0.0  ;;  %v940_v35 = vmax.f32 %v924_v28, 0.0  ;;  %v868_v36 = vadd.f32 %v1494_v32, %v1946_v7  ;;  %v862_v37 = vpop.f32.mrb[5].mxu0 }
 0x219   : > { %v1187_v39 = vmax.f32 %v1171_v30, 0.0  ;;  %v939_v40 = vmax.f32 %v923_v31, 0.0  ;;  %v863_v41 = vadd.f32 %v1946_v7, %v862_v37  ;;  %v1531_v30 = vpop.f32.mrb[10].mxu1 }
 0x21a   : > { %v1204_v43 = vmul.f32 0.999995, %v1188_v34  ;;  %v1174_v44 = vadd.f32 %v1108_v29, %v940_v35  ;;  %v926_v45 = vmul.f32 0.999995, %v868_v36  ;;  %v1142_v34 = vpop.f32.mrb[11].mxu1  ;;  %v1148_v38 = vadd.f32 %v1531_v30, %v1951_v9 }
 0x21b   : > { %v1203_v47 = vmul.f32 0.999995, %v1187_v39  ;;  %v1173_v48 = vadd.f32 %v1103_v33, %v939_v40  ;;  %v925_v49 = vmul.f32 0.999995, %v863_v41  ;;  %v1497_v50 = vpop.f32.mrb[6].mxu0 }
 0x21c   : > { %1221 = vst.msk [vmem:[%s1821_s10 + $0x8] sm:$0xff] %vm1219_vm2, %v1204_v43  ;;  %v1190_v52 = vmax.f32 %v1174_v44, 0.0  ;;  %v942_v53 = vmax.f32 %v926_v45, 0.0  ;;  %v878_v54 = vadd.f32 %v1497_v50, %v1946_v7  ;;  %v872_v55 = vpop.f32.mrb[7].mxu0  ;;  %v1143_v43 = vadd.f32 %v1951_v9, %v1142_v34 }
 0x21d   : > { %1220 = vst.msk [vmem:[%s1821_s10] sm:$0xff] %vm1219_vm2, %v1203_v47  ;;  %v1189_v57 = vmax.f32 %v1173_v48, 0.0  ;;  %v941_v58 = vmax.f32 %v925_v49, 0.0  ;;  %v873_v59 = vadd.f32 %v1946_v7, %v872_v55  ;;  %v1534_v48 = vpop.f32.mrb[12].mxu1 }
 0x21e   : > { %v1206_v61 = vmul.f32 0.999995, %v1190_v52  ;;  %v1176_v62 = vadd.f32 %v1118_v46, %v942_v53  ;;  %v928_v63 = vmul.f32 0.999995, %v878_v54  ;;  %v1152_v52 = vpop.f32.mrb[13].mxu1  ;;  %v1158_v56 = vadd.f32 %v1534_v48, %v1951_v9 }
 0x21f   : > { %v1205_v1 = vmul.f32 0.999995, %v1189_v57  ;;  %v1175_v2 = vadd.f32 %v1113_v51, %v941_v58  ;;  %v927_v3 = vmul.f32 0.999995, %v873_v59  ;;  %v1500_v4 = vpop.f32.mrb[8].mxu0 }
 0x220   : > { %1223 = vst.msk [vmem:[%s1821_s10 + $0x18] sm:$0xff] %vm1219_vm2, %v1206_v61  ;;  %v1192_v6 = vmax.f32 %v1176_v62, 0.0  ;;  %v944_v8 = vmax.f32 %v928_v63, 0.0  ;;  %v888_v10 = vadd.f32 %v1500_v4, %v1946_v7  ;;  %v882_v11 = vpop.f32.mrb[9].mxu0  ;;  %v1153_v61 = vadd.f32 %v1951_v9, %v1152_v52 }
 0x221   : > { %1222 = vst.msk [vmem:[%s1821_s10 + $0x10] sm:$0xff] %vm1219_vm2, %v1205_v1  ;;  %v1191_v13 = vmax.f32 %v1175_v2, 0.0  ;;  %v943_v14 = vmax.f32 %v927_v3, 0.0  ;;  %v883_v15 = vadd.f32 %v1946_v7, %v882_v11  ;;  %v1537_v2 = vpop.f32.mrb[14].mxu1 }
 0x222   : > { %v1208_v17 = vmul.f32 0.999995, %v1192_v6  ;;  %v1178_v18 = vadd.f32 %v1128_v0, %v944_v8  ;;  %v930_v19 = vmul.f32 0.999995, %v888_v10  ;;  %v1162_v6 = vpop.f32.mrb[15].mxu1  ;;  %v1168_v12 = vadd.f32 %v1537_v2, %v1951_v9 }
 0x223   : > { %v1207_v21 = vmul.f32 0.999995, %v1191_v13  ;;  %v1177_v22 = vadd.f32 %v1123_v5, %v943_v14  ;;  %v929_v23 = vmul.f32 0.999995, %v883_v15  ;;  %v1503_v24 = vpop.f32.mrb[10].mxu0  ;;  %v1163_v16 = vadd.f32 %v1951_v9, %v1162_v6 }
 0x224   : > { %1225 = vst.msk [vmem:[%s1821_s10 + $0x28] sm:$0xff] %vm1219_vm2, %v1208_v17  ;;  %v1194_v26 = vmax.f32 %v1178_v18, 0.0  ;;  %v946_v27 = vmax.f32 %v930_v19, 0.0  ;;  %v898_v28 = vadd.f32 %v1503_v24, %v1946_v7  ;;  %v892_v29 = vpop.f32.mrb[11].mxu0 }
 0x225   : > { %1224 = vst.msk [vmem:[%s1821_s10 + $0x20] sm:$0xff] %vm1219_vm2, %v1207_v21  ;;  %v1193_v31 = vmax.f32 %v1177_v22, 0.0  ;;  %v945_v32 = vmax.f32 %v929_v23, 0.0  ;;  %v893_v33 = vadd.f32 %v1946_v7, %v892_v29 }
 0x226   : > { %v1210_v35 = vmul.f32 0.999995, %v1194_v26  ;;  %v1180_v36 = vadd.f32 %v1138_v20, %v946_v27  ;;  %v932_v37 = vmul.f32 0.999995, %v898_v28 }
 0x227   : > { %v1209_v39 = vmul.f32 0.999995, %v1193_v31  ;;  %v1179_v40 = vadd.f32 %v1133_v25, %v945_v32  ;;  %v931_v41 = vmul.f32 0.999995, %v893_v33  ;;  %v1506_v42 = vpop.f32.mrb[12].mxu0 }
 0x228   : > { %1227 = vst.msk [vmem:[%s1821_s10 + $0x38] sm:$0xff] %vm1219_vm2, %v1210_v35  ;;  %v1196_v44 = vmax.f32 %v1180_v36, 0.0  ;;  %v948_v45 = vmax.f32 %v932_v37, 0.0  ;;  %v908_v46 = vadd.f32 %v1506_v42, %v1946_v7  ;;  %v902_v47 = vpop.f32.mrb[13].mxu0 }
 0x229   : > { %1226 = vst.msk [vmem:[%s1821_s10 + $0x30] sm:$0xff] %vm1219_vm2, %v1209_v39  ;;  %v1195_v49 = vmax.f32 %v1179_v40, 0.0  ;;  %v947_v50 = vmax.f32 %v931_v41, 0.0  ;;  %v903_v51 = vadd.f32 %v1946_v7, %v902_v47 }
 0x22a   : > { %v1212_v53 = vmul.f32 0.999995, %v1196_v44  ;;  %v1182_v54 = vadd.f32 %v1148_v38, %v948_v45  ;;  %v934_v55 = vmul.f32 0.999995, %v908_v46 }
 0x22b   : > { %v1211_v57 = vmul.f32 0.999995, %v1195_v49  ;;  %v1181_v58 = vadd.f32 %v1143_v43, %v947_v50  ;;  %v933_v59 = vmul.f32 0.999995, %v903_v51  ;;  %v1509_v60 = vpop.f32.mrb[14].mxu0 }
 0x22c   : > { %1229 = vst.msk [vmem:[%s1821_s10 + $0x48] sm:$0xff] %vm1219_vm2, %v1212_v53  ;;  %v1198_v62 = vmax.f32 %v1182_v54, 0.0  ;;  %v950_v63 = vmax.f32 %v934_v55, 0.0  ;;  %v918_v0 = vadd.f32 %v1509_v60, %v1946_v7  ;;  %v912_v1 = vpop.f32.mrb[15].mxu0 }
 0x22d   : > { %1228 = vst.msk [vmem:[%s1821_s10 + $0x40] sm:$0xff] %vm1219_vm2, %v1211_v57  ;;  %v1197_v3 = vmax.f32 %v1181_v58, 0.0  ;;  %v949_v4 = vmax.f32 %v933_v59, 0.0  ;;  %v913_v5 = vadd.f32 %v1946_v7, %v912_v1 }
 0x22e   : > { %v1214_v8 = vmul.f32 0.999995, %v1198_v62  ;;  %v1184_v10 = vadd.f32 %v1158_v56, %v950_v63  ;;  %v936_v11 = vmul.f32 0.999995, %v918_v0 }
 0x22f   : > { %v1213_v13 = vmul.f32 0.999995, %v1197_v3  ;;  %v1183_v14 = vadd.f32 %v1153_v61, %v949_v4  ;;  %v935_v15 = vmul.f32 0.999995, %v913_v5 }
 0x230   : > { %1231 = vst.msk [vmem:[%s1821_s10 + $0x58] sm:$0xff] %vm1219_vm2, %v1214_v8  ;;  %v1200_v17 = vmax.f32 %v1184_v10, 0.0  ;;  %v952_v18 = vmax.f32 %v936_v11, 0.0 }
 0x231   : > { %1230 = vst.msk [vmem:[%s1821_s10 + $0x50] sm:$0xff] %vm1219_vm2, %v1213_v13  ;;  %v1199_v7 = vmax.f32 %v1183_v14, 0.0  ;;  %v951_v19 = vmax.f32 %v935_v15, 0.0 }
 0x232   : > { %v1216_v20 = vmul.f32 0.999995, %v1200_v17  ;;  %v1186_v21 = vadd.f32 %v1168_v12, %v952_v18 }
 0x233   : > { %v1215_v22 = vmul.f32 0.999995, %v1199_v7  ;;  %v1185_v23 = vadd.f32 %v1163_v16, %v951_v19 }
 0x234   : > { %1233 = vst.msk [vmem:[%s1821_s10 + $0x68] sm:$0xff] %vm1219_vm2, %v1216_v20  ;;  %v1202_v24 = vmax.f32 %v1186_v21, 0.0 }
 0x235   : > { %1232 = vst.msk [vmem:[%s1821_s10 + $0x60] sm:$0xff] %vm1219_vm2, %v1215_v22  ;;  %v1201_v9 = vmax.f32 %v1185_v23, 0.0 }
 0x236   : > { %v1218_v25 = vmul.f32 0.999995, %v1202_v24 }
 0x237   : > { %v1217_v26 = vmul.f32 0.999995, %v1201_v9 }
 0x238   : > { %1235 = vst.msk [vmem:[%s1821_s10 + $0x78] sm:$0xff] %vm1219_vm2, %v1218_v25 }
 0x239   : > { %1234 = vst.msk [vmem:[%s1821_s10 + $0x70] sm:$0xff] %vm1219_vm2, %v1217_v26 }
 0x23a PF: > { %s17_s30 = sadd.s32 1, %s1682_s30   ;;  %s2046_s24 = smov %s1662_s25 }
 0x23b   : > { %p14_p0 = scmp.ge.s32.totalorder %s17_s30, 11   ;;  %s2047_s25 = smov %s1776_s14 }
 0x23c   : > { %s2048_s26 = smov %s1674_s28  ;;  %s2049_s27 = smov %s1678_s29 }
 0x23d   : > { %s2050_s28 = smov %s2053_s8  ;;  %s2051_s29 = smov %s2057_s9 }
 0x23e   :  { %16 = sbr.rel (!%p14_p0) target bundleno = 4 (0x4), region = 138 }

// kernel: slog_n_forward.19
= control target key start
LH: loop header
LB: loop body
LE: loop exit
PB: predicated region body
PF: predicated region fallthrough
CT: control target
= control target key end

     0   :  { %s1748_s24 = smov 0   ;;  %s1750_s25 = smov 0   ;;  %s2073_s0 = inlined_call_operand.vmem [shape: bf16[384,384], index: 0, kind: input, shape index: {}]   ;;  %s2074_s1 = inlined_call_operand.vmem [shape: f32[384,32], index: 1, kind: input, shape index: {}]   ;;  %s2075_s2 = inlined_call_operand.vmem [shape: f32[384,32], index: 2, kind: input, shape index: {}]   ;;  %s2076_s3 = inlined_call_operand.vmem [shape: f32[32,32], index: 3, kind: input, shape index: {}]   ;;  %s2077_s4 = inlined_call_operand.vmem [shape: f32[1,32], index: 4, kind: input, shape index: {}]   ;;  %s2078_s5 = inlined_call_operand.vmem [shape: f32[32,32], index: 5, kind: input, shape index: {}]   ;;  %s2079_s6 = inlined_call_operand.vmem [shape: f32[1,32], index: 6, kind: input, shape index: {}]   ;;  %s2080_s7 = inlined_call_operand.vmem [shape: f32[384,32], index: 7, kind: output, shape index: {}]  }
   0x1   :  { %s1752_s26 = smov 0   ;;  %s1754_s27 = smov 0  }
   0x2   :  { %s1756_s28 = smov 0   ;;  %s1758_s29 = smov 0  }
   0x3   :  { %s1760_s30 = smov 0  }
   0x4 LB: > { %s26_s8 = sadd.s32 1, %s1697_s28  ;;  %s29_s9 = sadd.s32 1, %s1701_s29  ;;  %s1705_s30 = sphi %s1760_s30, %s17_s30   ;;  %s1701_s29 = sphi %s1758_s29, %s2086_s29   ;;  %s1697_s28 = sphi %s1756_s28, %s2085_s28   ;;  %s1693_s27 = sphi %s1754_s27, %s2084_s27   ;;  %s1689_s26 = sphi %s1752_s26, %s2083_s26   ;;  %s1685_s25 = sphi %s1750_s25, %s2082_s25   ;;  %s1681_s24 = sphi %s1748_s24, %s2081_s24  }
   0x5   : > { %p27_p0 = scmp.ge.s32.totalorder %s26_s8, 3  ;;  %p45_p1 = scmp.ne.s32.totalorder %s1685_s25, %s1681_s24 }
   0x6   : > { %p46_p2 = scmp.eq.s32.totalorder %s1705_s30, 0  ;;  %s38_s13 = sadd.s32 1, %s1685_s25 }
   0x7   : > { %s2088_s8 = smov (%p27_p0, %s26_s8), 0  ;;  %s2090_s9 = smov (!%p27_p0, %s29_s9), %s1701_s29 }
   0x8   : > { %p47_p3 = por %p46_p2, %p45_p1  ;;  %p31_p4 = scmp.ge.s32.totalorder %s2090_s9, 3 }
   0x9   : > { %s34_s10 = ssub.s32 %s1697_s28, %s2088_s8  ;;  %p1342_p6 = scmp.ge.s32.totalorder %s1705_s30, 9 }
   0xa   : > { %s2092_s9 = smov (%p31_p4, %s2090_s9), 0 }
   0xb   : > { %s33_s11 = ssub.s32 %s1701_s29, %s2092_s9  ;;  %245 = sbr.rel (%p1342_p6) target bundleno = 35 (0x23), region = 32 }
   0xc   : > { %s35_s12 = sor.u32 %s34_s10, %s33_s11 }
   0xd   : > { %p36_p5 = scmp.eq.s32.totalorder %s35_s12, 0 }
   0xf   : > { %s1799_s14 = scalar_select %p36_p5, %s1685_s25, %s38_s13  }
  0x12   : > { %248 = sbr.rel (!%p47_p3) target bundleno = 35 (0x23), region = 36  ;;  %s250_s15 = sand.u32 (%p47_p3), 1, %s1685_s25  }
  0x13   : > { %s1585_s16 = smul.u32 (%p47_p3), 48, %s1701_s29  ;;  %s1343_s17 = sshll.u32 (%p47_p3), %s250_s15, 6 }
  0x14   : > { %s252_s23 = scalar_lea.vmem (%p47_p3), [#allocation3], %s1343_s17 }
  0x15   : > { %s255_s18 = sadd.s32 (%p47_p3), %s1697_s28, %s1585_s16 }
  0x16   : > { %s1346_s19 = sshll.u32 (%p47_p3), %s255_s18, 2 }
  0x17   : > { %s1808_s22 = scalar_lea.vmem (%p47_p3), %s2073_s0, %s1346_s19 }
  0x18   : > { %v273_v0 = vld [vmem:[%s1808_s22] sm:$0xf] (%p47_p3)  ;;  %v275_v1 = vld [vmem:[%s1808_s22 + $0xc] sm:$0xf] (%p47_p3)  ;;  %v277_v2 = vld [vmem:[%s1808_s22 + $0x18] sm:$0xf] (%p47_p3) }
  0x19   : > { %274 = vst [vmem:[%s252_s23] sm:$0xf] %v273_v0  ;;  %276 = vst [vmem:[%s252_s23 + $0x4] sm:$0xf] %v275_v1  ;;  %v279_v3 = vld [vmem:[%s1808_s22 + $0x24] sm:$0xf] }
  0x1a   : > { %278 = vst [vmem:[%s252_s23 + $0x8] sm:$0xf] %v277_v2  ;;  %v281_v4 = vld [vmem:[%s1808_s22 + $0x30] sm:$0xf]  ;;  %v283_v5 = vld [vmem:[%s1808_s22 + $0x3c] sm:$0xf] }
  0x1b   : > { %280 = vst [vmem:[%s252_s23 + $0xc] sm:$0xf] %v279_v3  ;;  %282 = vst [vmem:[%s252_s23 + $0x10] sm:$0xf] %v281_v4  ;;  %v285_v6 = vld [vmem:[%s1808_s22 + $0x48] sm:$0xf] }
  0x1c   : > { %284 = vst [vmem:[%s252_s23 + $0x14] sm:$0xf] %v283_v5  ;;  %v287_v7 = vld [vmem:[%s1808_s22 + $0x54] sm:$0xf]  ;;  %v289_v8 = vld [vmem:[%s1808_s22 + $0x60] sm:$0xf] }
  0x1d   : > { %286 = vst [vmem:[%s252_s23 + $0x18] sm:$0xf] %v285_v6  ;;  %288 = vst [vmem:[%s252_s23 + $0x1c] sm:$0xf] %v287_v7  ;;  %v291_v9 = vld [vmem:[%s1808_s22 + $0x6c] sm:$0xf] }
  0x1e   : > { %290 = vst [vmem:[%s252_s23 + $0x20] sm:$0xf] %v289_v8  ;;  %v293_v10 = vld [vmem:[%s1808_s22 + $0x78] sm:$0xf]  ;;  %v295_v11 = vld [vmem:[%s1808_s22 + $0x84] sm:$0xf] }
  0x1f   : > { %292 = vst [vmem:[%s252_s23 + $0x24] sm:$0xf] %v291_v9  ;;  %294 = vst [vmem:[%s252_s23 + $0x28] sm:$0xf] %v293_v10  ;;  %v297_v12 = vld [vmem:[%s1808_s22 + $0x90] sm:$0xf] }
  0x20   : > { %296 = vst [vmem:[%s252_s23 + $0x2c] sm:$0xf] %v295_v11  ;;  %v299_v13 = vld [vmem:[%s1808_s22 + $0x9c] sm:$0xf]  ;;  %v301_v14 = vld [vmem:[%s1808_s22 + $0xa8] sm:$0xf] }
  0x21   : > { %298 = vst [vmem:[%s252_s23 + $0x30] sm:$0xf] %v297_v12  ;;  %300 = vst [vmem:[%s252_s23 + $0x34] sm:$0xf] %v299_v13  ;;  %v303_v15 = vld [vmem:[%s1808_s22 + $0xb4] sm:$0xf] }
  0x22   : > { %302 = vst [vmem:[%s252_s23 + $0x38] sm:$0xf] %v301_v14  ;;  %304 = vst [vmem:[%s252_s23 + $0x3c] sm:$0xf] %v303_v15 }
  0x23 PF: > { %p1347_p7 = scmp.ge.s32.totalorder %s1705_s30, 1  ;;  %p376_p8 = scmp.lt.s32.totalorder %s1705_s30, 10 }
  0x25   : > { %p377_p9 = pnand %p1347_p7, %p376_p8 }
  0x26   : > { %s383_s10 = sand.u32 (!%p377_p9), 1, %s1681_s24   ;;  %s1349_s11 = sshll.u32 (!%p377_p9), %s1689_s26, 4 }
  0x27   : > { %380 = sbr.rel (%p377_p9) target bundleno = 570 (0x23a), region = 85  ;;  %s1348_s12 = sshll.u32 (!%p377_p9), %s383_s10, 6 }
  0x28   : > { %p426_p10 = scmp.lt.s32.totalorder (!%p377_p9), %s1349_s11, 47  ;;  %s1351_s13 = sshll.u32 (!%p377_p9), %s1693_s27, 4 }
  0x29   : > { %p432_p11 = scmp.lt.s32.totalorder (!%p377_p9), %s1351_s13, 47  ;;  %s1846_s27 = scalar_lea.vmem (!%p377_p9), [#allocation3], %s1348_s12 }
  0x2a   : > { %p1355_p12 = scmp.ne.s32.totalorder (!%p377_p9), %s1689_s26, 0 }
  0x2e   : > { %s2094_s11 = smov (!%p426_p10, %s1349_s11), 47  ;;  %s2096_s13 = smov (!%p432_p11, %s1351_s13), 47 }
  0x2f   : > { %s1350_s15 = sshll.u32 %s2094_s11, 3  ;;  %s1352_s19 = sshll.u32 %s2096_s13, 3  ;;  %vm448_vm0 = vcmask (!%p1355_p12), 261120   ;;  %v1707_v16 = vmov (!%p1355_p12), 0.0  }
  0x30   : > { %s1834_s18 = scalar_lea.vmem %s2074_s1, %s1350_s15  ;;  %s1839_s22 = scalar_lea.vmem %s2075_s2, %s1352_s19  ;;  %449 = vst.msk [vmem:[#allocation2] sm:$0xff] (!%p1355_p12), %vm448_vm0, %v1707_v16  ;;  %450 = vst.msk [vmem:[#allocation2 + $0x8] sm:$0xff] (!%p1355_p12), %vm448_vm0, %v1707_v16 }
  0x31   : > { %s1844_s10 = scalar_lea.vmem %s2080_s7, %s1352_s19  ;;  %447 = sbr.rel (%p1355_p12) target bundleno = 56 (0x38), region = 93  ;;  %451 = vst.msk [vmem:[#allocation2 + $0x10] sm:$0xff] (!%p1355_p12), %vm448_vm0, %v1707_v16  ;;  %452 = vst.msk [vmem:[#allocation2 + $0x18] sm:$0xff] (!%p1355_p12), %vm448_vm0, %v1707_v16 }
  0x32   : > { %453 = vst.msk [vmem:[#allocation2 + $0x20] sm:$0xff] (!%p1355_p12), %vm448_vm0, %v1707_v16  ;;  %454 = vst.msk [vmem:[#allocation2 + $0x28] sm:$0xff] (!%p1355_p12), %vm448_vm0, %v1707_v16 }
  0x33   : > { %455 = vst.msk [vmem:[#allocation2 + $0x30] sm:$0xff] (!%p1355_p12), %vm448_vm0, %v1707_v16  ;;  %456 = vst.msk [vmem:[#allocation2 + $0x38] sm:$0xff] (!%p1355_p12), %vm448_vm0, %v1707_v16 }
  0x34   : > { %457 = vst.msk [vmem:[#allocation2 + $0x40] sm:$0xff] (!%p1355_p12), %vm448_vm0, %v1707_v16  ;;  %458 = vst.msk [vmem:[#allocation2 + $0x48] sm:$0xff] (!%p1355_p12), %vm448_vm0, %v1707_v16 }
  0x35   : > { %459 = vst.msk [vmem:[#allocation2 + $0x50] sm:$0xff] (!%p1355_p12), %vm448_vm0, %v1707_v16  ;;  %460 = vst.msk [vmem:[#allocation2 + $0x58] sm:$0xff] (!%p1355_p12), %vm448_vm0, %v1707_v16 }
  0x36   : > { %461 = vst.msk [vmem:[#allocation2 + $0x60] sm:$0xff] (!%p1355_p12), %vm448_vm0, %v1707_v16  ;;  %462 = vst.msk [vmem:[#allocation2 + $0x68] sm:$0xff] (!%p1355_p12), %vm448_vm0, %v1707_v16 }
  0x37   : > { %463 = vst.msk [vmem:[#allocation2 + $0x70] sm:$0xff] (!%p1355_p12), %vm448_vm0, %v1707_v16  ;;  %464 = vst.msk [vmem:[#allocation2 + $0x78] sm:$0xff] (!%p1355_p12), %vm448_vm0, %v1707_v16 }
  0x38 PF: > { %v497_v17 = vld [vmem:[%s1834_s18] sm:$0xff]  ;;  %v498_v18 = vld [vmem:[%s1834_s18 + $0x8] sm:$0xff]  ;;  %v499_v19 = vld [vmem:[%s1834_s18 + $0x10] sm:$0xff]  ;;  %vm682_vm1 = vcmask 261120   ;;  %p1364_p13 = scmp.ne.s32.totalorder %s1689_s26, 2 }
  0x39   : > { %v513_v20 = vpack.c.bf16 %v498_v18, %v497_v17  ;;  %v500_v21 = vld [vmem:[%s1834_s18 + $0x18] sm:$0xff]  ;;  %v501_v23 = vld [vmem:[%s1834_s18 + $0x20] sm:$0xff]  ;;  %v502_v24 = vld [vmem:[%s1834_s18 + $0x28] sm:$0xff] }
  0x3a   : > { %v514_v22 = vpack.c.bf16 %v500_v21, %v499_v19  ;;  %v503_v25 = vld [vmem:[%s1834_s18 + $0x30] sm:$0xff]  ;;  %v515_v26 = vpack.c.bf16 %v502_v24, %v501_v23  ;;  %v504_v27 = vld [vmem:[%s1834_s18 + $0x38] sm:$0xff]  ;;  %v1643_v28 = vld [vmem:[%s1846_s27] sm:$0xff]  }
  0x3b   : > { %1457 = vmatprep.subr.bf16.mxu0 %v513_v20  ;;  %1569 = vmatprep.subr.bf16.mxu1 %v513_v20  ;;  %v1644_v29 = vld [vmem:[%s1846_s27 + $0x20] sm:$0xff]   ;;  %v516_v30 = vpack.c.bf16 %v504_v27, %v503_v25  ;;  %v506_v32 = vld [vmem:[%s1834_s18 + $0x48] sm:$0xff]  ;;  %v507_v34 = vld [vmem:[%s1834_s18 + $0x50] sm:$0xff] }
  0x3c   : > { %1458 = vmatpush3.bf16.msra.mxu0 %v513_v20  ;;  %1577 = vmatpush3.bf16.msra.mxu1 %v513_v20  ;;  %v505_v31 = vld [vmem:[%s1834_s18 + $0x40] sm:$0xff]  ;;  %v508_v35 = vld [vmem:[%s1834_s18 + $0x58] sm:$0xff]  ;;  %v510_v38 = vld [vmem:[%s1834_s18 + $0x68] sm:$0xff] }
  0x3d   : > { %1459 = vmatprep.subr.bf16.mxu0 %v514_v22  ;;  %1570 = vmatprep.subr.bf16.mxu1 %v514_v22  ;;  %v517_v33 = vpack.c.bf16 %v506_v32, %v505_v31  ;;  %v518_v36 = vpack.c.bf16 %v508_v35, %v507_v34  ;;  %v509_v37 = vld [vmem:[%s1834_s18 + $0x60] sm:$0xff]  ;;  %v511_v40 = vld [vmem:[%s1834_s18 + $0x70] sm:$0xff]  ;;  %v512_v41 = vld [vmem:[%s1834_s18 + $0x78] sm:$0xff] }
  0x3e   : > { %1473 = vmatprep.mubr.bf16.mxu0 %v1643_v28  ;;  %1481 = vmatprep.mubr.bf16.mxu1 %v1644_v29  ;;  %v519_v39 = vpack.c.bf16 %v510_v38, %v509_v37  ;;  %v520_v42 = vpack.c.bf16 %v512_v41, %v511_v40  ;;  %v1645_v43 = vld [vmem:[%s1846_s27 + $0x8] sm:$0xff]   ;;  %v1647_v45 = vld [vmem:[%s1846_s27 + $0x10] sm:$0xff]   ;;  %v1649_v47 = vld [vmem:[%s1846_s27 + $0x18] sm:$0xff]  }
  0x3f   : > { %v1646_v44 = vld [vmem:[%s1846_s27 + $0x28] sm:$0xff]   ;;  %v1648_v46 = vld [vmem:[%s1846_s27 + $0x30] sm:$0xff]   ;;  %v1650_v48 = vld [vmem:[%s1846_s27 + $0x38] sm:$0xff]  }
  0x40   : > { %1460 = vmatpush3.bf16.msra.mxu0 %v514_v22  ;;  %1578 = vmatpush3.bf16.msra.mxu1 %v514_v22  ;;  %v467_v49 = vld [vmem:[#allocation2 + $0x10] sm:$0xff]  ;;  %v465_v51 = vld [vmem:[#allocation2] sm:$0xff]  ;;  %v468_v55 = vld [vmem:[#allocation2 + $0x18] sm:$0xff] }
  0x41   : > { %1461 = vmatprep.subr.bf16.mxu0 %v515_v26  ;;  %1571 = vmatprep.subr.bf16.mxu1 %v515_v26  ;;  %v475_v50 = vld [vmem:[#allocation2 + $0x50] sm:$0xff]  ;;  %v473_v52 = vld [vmem:[#allocation2 + $0x40] sm:$0xff]  ;;  %v476_v56 = vld [vmem:[#allocation2 + $0x58] sm:$0xff] }
  0x42   : > { %v466_v61 = vld [vmem:[#allocation2 + $0x8] sm:$0xff]  ;;  %v471_v9 = vld [vmem:[#allocation2 + $0x30] sm:$0xff]  ;;  %v469_v11 = vld [vmem:[#allocation2 + $0x20] sm:$0xff] }
  0x43   : > { %v474_v62 = vld [vmem:[#allocation2 + $0x48] sm:$0xff]  ;;  %v479_v10 = vld [vmem:[#allocation2 + $0x70] sm:$0xff]  ;;  %v477_v12 = vld [vmem:[#allocation2 + $0x60] sm:$0xff] }
  0x44   : > { %1462 = vmatpush3.bf16.msra.mxu0 %v515_v26  ;;  %1579 = vmatpush3.bf16.msra.mxu1 %v515_v26  ;;  %v472_v15 = vld [vmem:[#allocation2 + $0x38] sm:$0xff]  ;;  %v470_v21 = vld [vmem:[#allocation2 + $0x28] sm:$0xff]  ;;  %v971_v35 = vld [vmem:[%s2078_s5] sm:$0xff] (!%p1364_p13) }
  0x45   : > { %1463 = vmatprep.subr.bf16.mxu0 %v516_v30  ;;  %1572 = vmatprep.subr.bf16.mxu1 %v516_v30  ;;  %v480_v16 = vld [vmem:[#allocation2 + $0x78] sm:$0xff]  ;;  %v478_v22 = vld [vmem:[#allocation2 + $0x68] sm:$0xff]  ;;  %v721_v38 = vld [vmem:[%s2076_s3 + $0x10] sm:$0xff] (!%p1364_p13) }
  0x46   : > { %v720_v34 = vld [vmem:[%s2076_s3 + $0x8] sm:$0xff] (!%p1364_p13) }
  0x47   : > { %v972_v37 = vld [vmem:[%s2078_s5 + $0x8] sm:$0xff] (!%p1364_p13) }
  0x48   : > { %1464 = vmatpush3.bf16.msra.mxu0 %v516_v30  ;;  %1580 = vmatpush3.bf16.msra.mxu1 %v516_v30  ;;  %v1561_v40 = vpack.c.bf16 (!%p1364_p13), %v972_v37, %v971_v35 }
  0x49   : > { %1465 = vmatprep.subr.bf16.mxu0 %v517_v33  ;;  %1573 = vmatprep.subr.bf16.mxu1 %v517_v33 }
  0x4c   : > { %1466 = vmatpush3.bf16.msra.mxu0 %v517_v33  ;;  %1581 = vmatpush3.bf16.msra.mxu1 %v517_v33  ;;  %v719_v33 = vld [vmem:[%s2076_s3] sm:$0xff] (!%p1364_p13) }
  0x4d   : > { %1467 = vmatprep.subr.bf16.mxu0 %v518_v36  ;;  %1574 = vmatprep.subr.bf16.mxu1 %v518_v36 }
  0x50   : > { %1468 = vmatpush3.bf16.msra.mxu0 %v518_v36  ;;  %1582 = vmatpush3.bf16.msra.mxu1 %v518_v36  ;;  %v1553_v36 = vpack.c.bf16 (!%p1364_p13), %v720_v34, %v719_v33 }
  0x51   : > { %1469 = vmatprep.subr.bf16.mxu0 %v519_v39  ;;  %1575 = vmatprep.subr.bf16.mxu1 %v519_v39 }
  0x54   : > { %1470 = vmatpush3.bf16.msra.mxu0 %v519_v39  ;;  %1583 = vmatpush3.bf16.msra.mxu1 %v519_v39  ;;  %v722_v39 = vld [vmem:[%s2076_s3 + $0x18] sm:$0xff] (!%p1364_p13) }
  0x55   : > { %1471 = vmatprep.subr.bf16.mxu0 %v520_v42  ;;  %1576 = vmatprep.subr.bf16.mxu1 %v520_v42  ;;  %v1557_v41 = vpack.c.bf16 (!%p1364_p13), %v722_v39, %v721_v38 }
  0x58   : > { %1472 = vmatpush3.bf16.msra.mxu0 %v520_v42  ;;  %1584 = vmatpush3.bf16.msra.mxu1 %v520_v42 }
  0x59   : > { %1554 = vmatprep.subr.bf16.mxu0 (!%p1364_p13), %v1553_v36  ;;  %1562 = vmatprep.subr.bf16.mxu1 (!%p1364_p13), %v1561_v40 }
  0x5b   : > { %1474 = vmatmul.mubr.bf16.vlgmr.msra.gmra.mrb[0].mxu0 %v1645_v43  ;;  %1482 = vmatmul.mubr.bf16.vlgmr.msra.gmra.mrb[0].mxu1 %v1646_v44  ;;  %v973_v43 = vld [vmem:[%s2078_s5 + $0x10] sm:$0xff] (!%p1364_p13)  ;;  %v974_v44 = vld [vmem:[%s2078_s5 + $0x18] sm:$0xff] (!%p1364_p13) }
  0x5c   : > { %1477 = vmatprep.mubr.bf16.mxu0 %v1647_v45  ;;  %1485 = vmatprep.mubr.bf16.mxu1 %v1648_v46  ;;  %v1565_v45 = vpack.c.bf16 (!%p1364_p13), %v974_v44, %v973_v43  ;;  %v955_v46 = vld [vmem:[%s1839_s22] sm:$0xff] (!%p1364_p13) }
  0x5d   : > { %1556 = vmatpush3.bf16.msra.mxu0 (!%p1364_p13), %v1553_v36  ;;  %1564 = vmatpush3.bf16.msra.mxu1 (!%p1364_p13), %v1561_v40 }
  0x5e   : > { %1558 = vmatprep.subr.bf16.mxu0 (!%p1364_p13), %v1557_v41  ;;  %1566 = vmatprep.subr.bf16.mxu1 (!%p1364_p13), %v1565_v45 }
  0x61   : > { %1560 = vmatpush3.bf16.msra.mxu0 (!%p1364_p13), %v1557_v41  ;;  %1568 = vmatpush3.bf16.msra.mxu1 (!%p1364_p13), %v1565_v45 }
  0x63   : > { %1478 = vmatmul.mubr.bf16.gmra.mrb[4].mxu0 %v1649_v47  ;;  %1486 = vmatmul.mubr.bf16.gmra.mrb[4].mxu1 %v1650_v48 }
  0x64   : > { %1529 = vmatprep.mubr.msk.f32.mxu1 (!%p1364_p13), %vm682_vm1, %v955_v46 }
 0x12e   : > { %v1475_v53 = vpop.f32.mrb[0].mxu0  ;;  %v1483_v54 = vpop.f32.mrb[0].mxu1 }
 0x12f   : > { %v668_v57 = vadd.f32 %v1475_v53, %v467_v49  ;;  %v676_v58 = vadd.f32 %v1483_v54, %v475_v50  ;;  %v603_v59 = vpop.f32.mrb[1].mxu0  ;;  %v635_v60 = vpop.f32.mrb[1].mxu1  ;;  %v956_v49 = vld [vmem:[%s1839_s22 + $0x8] sm:$0xff] (!%p1364_p13)  ;;  %v957_v50 = vld [vmem:[%s1839_s22 + $0x10] sm:$0xff] (!%p1364_p13)  ;;  %v958_v53 = vld [vmem:[%s1839_s22 + $0x18] sm:$0xff] (!%p1364_p13) }
 0x130   : > { %v666_v63 = vadd.f32 %v603_v59, %v465_v51  ;;  %v674_v0 = vadd.f32 %v635_v60, %v473_v52  ;;  %v1476_v1 = vpop.f32.mrb[2].mxu0  ;;  %v1484_v2 = vpop.f32.mrb[2].mxu1  ;;  %1530 = vmatmul.mubr.msk.f32.vlgmr.msra.gmra.mrb[0].mxu1 (!%p1364_p13), %vm682_vm1, %v956_v49  ;;  %v959_v54 = vld [vmem:[%s1839_s22 + $0x20] sm:$0xff] (!%p1364_p13) }
 0x131   : > { %685 = vst.msk [vmem:[#allocation2 + $0x10] sm:$0xff] %vm682_vm1, %v668_v57  ;;  %693 = vst.msk [vmem:[#allocation2 + $0x50] sm:$0xff] %vm682_vm1, %v676_v58  ;;  %v669_v3 = vadd.f32 %v1476_v1, %v468_v55  ;;  %v677_v4 = vadd.f32 %v1484_v2, %v476_v56  ;;  %v606_v5 = vpop.f32.mrb[3].mxu0  ;;  %v638_v6 = vpop.f32.mrb[3].mxu1  ;;  %1532 = vmatprep.mubr.msk.f32.mxu1 (!%p1364_p13), %vm682_vm1, %v957_v50  ;;  %v960_v57 = vld [vmem:[%s1839_s22 + $0x28] sm:$0xff] (!%p1364_p13)  ;;  %v961_v58 = vld [vmem:[%s1839_s22 + $0x30] sm:$0xff] (!%p1364_p13) }
 0x132   : > { %683 = vst.msk [vmem:[#allocation2] sm:$0xff] %vm682_vm1, %v666_v63  ;;  %691 = vst.msk [vmem:[#allocation2 + $0x40] sm:$0xff] %vm682_vm1, %v674_v0  ;;  %v667_v7 = vadd.f32 %v606_v5, %v466_v61  ;;  %v675_v8 = vadd.f32 %v638_v6, %v474_v62  ;;  %v962_v61 = vld [vmem:[%s1839_s22 + $0x38] sm:$0xff] (!%p1364_p13)  ;;  %v963_v62 = vld [vmem:[%s1839_s22 + $0x40] sm:$0xff] (!%p1364_p13) }
 0x133   : > { %686 = vst.msk [vmem:[#allocation2 + $0x18] sm:$0xff] %vm682_vm1, %v669_v3  ;;  %694 = vst.msk [vmem:[#allocation2 + $0x58] sm:$0xff] %vm682_vm1, %v677_v4  ;;  %v964_v1 = vld [vmem:[%s1839_s22 + $0x48] sm:$0xff] (!%p1364_p13)  ;;  %v965_v2 = vld [vmem:[%s1839_s22 + $0x50] sm:$0xff] (!%p1364_p13) }
 0x134   : > { %684 = vst.msk [vmem:[#allocation2 + $0x8] sm:$0xff] %vm682_vm1, %v667_v7  ;;  %692 = vst.msk [vmem:[#allocation2 + $0x48] sm:$0xff] %vm682_vm1, %v675_v8  ;;  %1533 = vmatmul.mubr.msk.f32.gmra.mrb[2].mxu1 (!%p1364_p13), %vm682_vm1, %v958_v53  ;;  %v966_v5 = vld [vmem:[%s1839_s22 + $0x58] sm:$0xff] (!%p1364_p13)  ;;  %v967_v6 = vld [vmem:[%s1839_s22 + $0x60] sm:$0xff] (!%p1364_p13) }
 0x135   : > { %1535 = vmatprep.mubr.msk.f32.mxu1 (!%p1364_p13), %vm682_vm1, %v959_v54 }
 0x136   : > { %v1479_v13 = vpop.f32.mrb[4].mxu0  ;;  %v1487_v14 = vpop.f32.mrb[4].mxu1  ;;  %702 = sbr.rel (%p1364_p13) target bundleno = 570 (0x23a), region = 97 }
 0x137   : > { %v672_v17 = vadd.f32 %v1479_v13, %v471_v9  ;;  %v680_v18 = vadd.f32 %v1487_v14, %v479_v10  ;;  %v619_v19 = vpop.f32.mrb[5].mxu0  ;;  %v651_v20 = vpop.f32.mrb[5].mxu1  ;;  %v968_v9 = vld [vmem:[%s1839_s22 + $0x68] sm:$0xff] (!%p1364_p13)  ;;  %v969_v10 = vld [vmem:[%s1839_s22 + $0x70] sm:$0xff] (!%p1364_p13)  ;;  %v1981_v13 = vld [vmem:[%s2077_s4] ss:$0 sm:$0xff] (!%p1364_p13) }
 0x138   : > { %v670_v23 = vadd.f32 %v619_v19, %v469_v11  ;;  %v678_v24 = vadd.f32 %v651_v20, %v477_v12  ;;  %v1480_v25 = vpop.f32.mrb[6].mxu0  ;;  %v1488_v26 = vpop.f32.mrb[6].mxu1  ;;  %v705_v48 = vld [vmem:[#allocation2 + $0x10] sm:$0xff] (!%p1364_p13)  ;;  %1536 = vmatmul.mubr.msk.f32.gmra.mrb[4].mxu1 (!%p1364_p13), %vm682_vm1, %v960_v57  ;;  %v970_v12 = vld [vmem:[%s1839_s22 + $0x78] sm:$0xff] (!%p1364_p13) }
 0x139   : > { %689 = vst.msk [vmem:[#allocation2 + $0x30] sm:$0xff] %vm682_vm1, %v672_v17  ;;  %697 = vst.msk [vmem:[#allocation2 + $0x70] sm:$0xff] %vm682_vm1, %v680_v18  ;;  %v673_v27 = vadd.f32 %v1480_v25, %v472_v15  ;;  %v681_v28 = vadd.f32 %v1488_v26, %v480_v16  ;;  %v622_v29 = vpop.f32.mrb[7].mxu0  ;;  %v654_v30 = vpop.f32.mrb[7].mxu1  ;;  %v703_v42 = vld [vmem:[#allocation2] sm:$0xff] (!%p1364_p13)  ;;  %1538 = vmatprep.mubr.msk.f32.mxu1 (!%p1364_p13), %vm682_vm1, %v961_v58  ;;  %v713_v0 = vld [vmem:[#allocation2 + $0x50] sm:$0xff] (!%p1364_p13) }
 0x13a   : > { %687 = vst.msk [vmem:[#allocation2 + $0x20] sm:$0xff] %vm682_vm1, %v670_v23  ;;  %695 = vst.msk [vmem:[#allocation2 + $0x60] sm:$0xff] %vm682_vm1, %v678_v24  ;;  %v671_v31 = vadd.f32 %v622_v29, %v470_v21  ;;  %v679_v32 = vadd.f32 %v654_v30, %v478_v22  ;;  %1497 = vmatprep.mubr.msk.f32.mxu0 (!%p1364_p13), %vm682_vm1, %v703_v42  ;;  %v706_v51 = vld [vmem:[#allocation2 + $0x18] sm:$0xff] (!%p1364_p13)  ;;  %v711_v60 = vld [vmem:[#allocation2 + $0x40] sm:$0xff] (!%p1364_p13) }
 0x13b   : > { %690 = vst.msk [vmem:[#allocation2 + $0x38] sm:$0xff] %vm682_vm1, %v673_v27  ;;  %698 = vst.msk [vmem:[#allocation2 + $0x78] sm:$0xff] %vm682_vm1, %v681_v28  ;;  %v704_v47 = vld [vmem:[#allocation2 + $0x8] sm:$0xff] (!%p1364_p13)  ;;  %v714_v3 = vld [vmem:[#allocation2 + $0x58] sm:$0xff] (!%p1364_p13) }
 0x13c   : > { %688 = vst.msk [vmem:[#allocation2 + $0x28] sm:$0xff] %vm682_vm1, %v671_v31  ;;  %696 = vst.msk [vmem:[#allocation2 + $0x68] sm:$0xff] %vm682_vm1, %v679_v32  ;;  %1498 = vmatmul.mubr.msk.f32.vlgmr.msra.gmra.mrb[0].mxu0 (!%p1364_p13), %vm682_vm1, %v704_v47  ;;  %1539 = vmatmul.mubr.msk.f32.gmra.mrb[6].mxu1 (!%p1364_p13), %vm682_vm1, %v962_v61  ;;  %v712_v63 = vld [vmem:[#allocation2 + $0x48] sm:$0xff] (!%p1364_p13)  ;;  %v1986_v15 = vld [vmem:[%s2079_s6] ss:$0 sm:$0xff] (!%p1364_p13) }
 0x13d   : > { %1500 = vmatprep.mubr.msk.f32.mxu0 %vm682_vm1, %v705_v48  ;;  %1541 = vmatprep.mubr.msk.f32.mxu1 %vm682_vm1, %v963_v62 }
 0x140   : > { %1501 = vmatmul.mubr.msk.f32.gmra.mrb[2].mxu0 %vm682_vm1, %v706_v51  ;;  %v709_v56 = vld [vmem:[#allocation2 + $0x30] sm:$0xff]  ;;  %1542 = vmatmul.mubr.msk.f32.gmra.mrb[8].mxu1 %vm682_vm1, %v964_v1 }
 0x141   : > { %v707_v52 = vld [vmem:[#allocation2 + $0x20] sm:$0xff]  ;;  %1544 = vmatprep.mubr.msk.f32.mxu1 %vm682_vm1, %v965_v2  ;;  %v717_v8 = vld [vmem:[#allocation2 + $0x70] sm:$0xff] }
 0x142   : > { %1503 = vmatprep.mubr.msk.f32.mxu0 %vm682_vm1, %v707_v52  ;;  %v710_v59 = vld [vmem:[#allocation2 + $0x38] sm:$0xff]  ;;  %v715_v4 = vld [vmem:[#allocation2 + $0x60] sm:$0xff] }
 0x143   : > { %v708_v55 = vld [vmem:[#allocation2 + $0x28] sm:$0xff]  ;;  %v718_v11 = vld [vmem:[#allocation2 + $0x78] sm:$0xff] }
 0x144   : > { %1504 = vmatmul.mubr.msk.f32.gmra.mrb[4].mxu0 %vm682_vm1, %v708_v55  ;;  %1545 = vmatmul.mubr.msk.f32.gmra.mrb[10].mxu1 %vm682_vm1, %v966_v5  ;;  %v716_v7 = vld [vmem:[#allocation2 + $0x68] sm:$0xff] }
 0x145   : > { %1506 = vmatprep.mubr.msk.f32.mxu0 %vm682_vm1, %v709_v56  ;;  %1547 = vmatprep.mubr.msk.f32.mxu1 %vm682_vm1, %v967_v6 }
 0x148   : > { %1507 = vmatmul.mubr.msk.f32.gmra.mrb[6].mxu0 %vm682_vm1, %v710_v59  ;;  %1548 = vmatmul.mubr.msk.f32.gmra.mrb[12].mxu1 %vm682_vm1, %v968_v9 }
 0x149   : > { %1509 = vmatprep.mubr.msk.f32.mxu0 %vm682_vm1, %v711_v60  ;;  %1550 = vmatprep.mubr.msk.f32.mxu1 %vm682_vm1, %v969_v10 }
 0x14c   : > { %1510 = vmatmul.mubr.msk.f32.gmra.mrb[8].mxu0 %vm682_vm1, %v712_v63  ;;  %1551 = vmatmul.mubr.msk.f32.gmra.mrb[14].mxu1 %vm682_vm1, %v970_v12 }
 0x14d   : > { %1512 = vmatprep.mubr.msk.f32.mxu0 %vm682_vm1, %v713_v0 }
 0x150   : > { %1513 = vmatmul.mubr.msk.f32.gmra.mrb[10].mxu0 %vm682_vm1, %v714_v3 }
 0x151   : > { %1515 = vmatprep.mubr.msk.f32.mxu0 %vm682_vm1, %v715_v4 }
 0x154   : > { %1516 = vmatmul.mubr.msk.f32.gmra.mrb[12].mxu0 %vm682_vm1, %v716_v7 }
 0x155   : > { %1518 = vmatprep.mubr.msk.f32.mxu0 %vm682_vm1, %v717_v8 }
 0x158   : > { %1519 = vmatmul.mubr.msk.f32.gmra.mrb[14].mxu0 %vm682_vm1, %v718_v11 }
 0x203   : > { %v1531_v18 = vpop.f32.mrb[0].mxu1 }
 0x204   : > { %v1096_v20 = vpop.f32.mrb[1].mxu1  ;;  %v1102_v22 = vadd.f32 %v1531_v18, %v1986_v15 }
 0x205   : > { %v1097_v25 = vadd.f32 %v1986_v15, %v1096_v20 }
 0x207   : > { %v1534_v29 = vpop.f32.mrb[2].mxu1 }
 0x208   : > { %v1106_v32 = vpop.f32.mrb[3].mxu1  ;;  %v1112_v35 = vadd.f32 %v1534_v29, %v1986_v15 }
 0x209   : > { %v1107_v39 = vadd.f32 %v1986_v15, %v1106_v32 }
 0x20b   : > { %v1537_v44 = vpop.f32.mrb[4].mxu1 }
 0x20c   : > { %v1116_v48 = vpop.f32.mrb[5].mxu1  ;;  %v1122_v52 = vadd.f32 %v1537_v44, %v1986_v15 }
 0x20d   : > { %v1117_v57 = vadd.f32 %v1986_v15, %v1116_v48 }
 0x20f   : > { %v1499_v14 = vpop.f32.mrb[0].mxu0  ;;  %v1540_v62 = vpop.f32.mrb[6].mxu1 }
 0x210   : > { %v850_v16 = vadd.f32 %v1499_v14, %v1981_v13  ;;  %v844_v17 = vpop.f32.mrb[1].mxu0  ;;  %v1126_v2 = vpop.f32.mrb[7].mxu1  ;;  %v1132_v6 = vadd.f32 %v1540_v62, %v1986_v15 }
 0x211   : > { %v845_v19 = vadd.f32 %v1981_v13, %v844_v17  ;;  %v1127_v11 = vadd.f32 %v1986_v15, %v1126_v2 }
 0x212   : > { %v924_v21 = vmul.f32 0.999995, %v850_v16 }
 0x213   : > { %v923_v23 = vmul.f32 0.999995, %v845_v19  ;;  %v1502_v24 = vpop.f32.mrb[2].mxu0  ;;  %v1543_v18 = vpop.f32.mrb[8].mxu1 }
 0x214   : > { %v940_v26 = vmax.f32 %v924_v21, 0.0  ;;  %v860_v27 = vadd.f32 %v1502_v24, %v1981_v13  ;;  %v854_v28 = vpop.f32.mrb[3].mxu0 }
 0x215   : > { %v939_v30 = vmax.f32 %v923_v23, 0.0  ;;  %v855_v31 = vadd.f32 %v1981_v13, %v854_v28 }
 0x216   : > { %v1176_v33 = vadd.f32 %v1102_v22, %v940_v26  ;;  %v926_v34 = vmul.f32 0.999995, %v860_v27  ;;  %v1136_v22 = vpop.f32.mrb[9].mxu1  ;;  %v1142_v26 = vadd.f32 %v1543_v18, %v1986_v15 }
 0x217   : > { %v1175_v36 = vadd.f32 %v1097_v25, %v939_v30  ;;  %v925_v37 = vmul.f32 0.999995, %v855_v31  ;;  %v1505_v38 = vpop.f32.mrb[4].mxu0  ;;  %v1137_v31 = vadd.f32 %v1986_v15, %v1136_v22 }
 0x218   : > { %v1192_v40 = vmax.f32 %v1176_v33, 0.0  ;;  %v942_v41 = vmax.f32 %v926_v34, 0.0  ;;  %v870_v42 = vadd.f32 %v1505_v38, %v1981_v13  ;;  %v864_v43 = vpop.f32.mrb[5].mxu0 }
 0x219   : > { %v1191_v45 = vmax.f32 %v1175_v36, 0.0  ;;  %v941_v46 = vmax.f32 %v925_v37, 0.0  ;;  %v865_v47 = vadd.f32 %v1981_v13, %v864_v43  ;;  %v1546_v36 = vpop.f32.mrb[10].mxu1 }
 0x21a   : > { %v1208_v49 = vmul.f32 0.999995, %v1192_v40  ;;  %v1178_v50 = vadd.f32 %v1112_v35, %v942_v41  ;;  %v928_v51 = vmul.f32 0.999995, %v870_v42  ;;  %v1146_v40 = vpop.f32.mrb[11].mxu1  ;;  %v1152_v44 = vadd.f32 %v1546_v36, %v1986_v15 }
 0x21b   : > { %v1207_v53 = vmul.f32 0.999995, %v1191_v45  ;;  %v1177_v54 = vadd.f32 %v1107_v39, %v941_v46  ;;  %v927_v55 = vmul.f32 0.999995, %v865_v47  ;;  %v1508_v56 = vpop.f32.mrb[6].mxu0 }
 0x21c   : > { %1224 = vst.msk [vmem:[%s1844_s10 + $0x8] sm:$0xff] %vm682_vm1, %v1208_v49  ;;  %v1194_v58 = vmax.f32 %v1178_v50, 0.0  ;;  %v944_v59 = vmax.f32 %v928_v51, 0.0  ;;  %v880_v60 = vadd.f32 %v1508_v56, %v1981_v13  ;;  %v874_v61 = vpop.f32.mrb[7].mxu0  ;;  %v1147_v49 = vadd.f32 %v1986_v15, %v1146_v40 }
 0x21d   : > { %1223 = vst.msk [vmem:[%s1844_s10] sm:$0xff] %vm682_vm1, %v1207_v53  ;;  %v1193_v63 = vmax.f32 %v1177_v54, 0.0  ;;  %v943_v0 = vmax.f32 %v927_v55, 0.0  ;;  %v875_v1 = vadd.f32 %v1981_v13, %v874_v61  ;;  %v1549_v54 = vpop.f32.mrb[12].mxu1 }
 0x21e   : > { %v1210_v3 = vmul.f32 0.999995, %v1194_v58  ;;  %v1180_v4 = vadd.f32 %v1122_v52, %v944_v59  ;;  %v930_v5 = vmul.f32 0.999995, %v880_v60  ;;  %v1156_v58 = vpop.f32.mrb[13].mxu1  ;;  %v1162_v62 = vadd.f32 %v1549_v54, %v1986_v15 }
 0x21f   : > { %v1209_v7 = vmul.f32 0.999995, %v1193_v63  ;;  %v1179_v8 = vadd.f32 %v1117_v57, %v943_v0  ;;  %v929_v9 = vmul.f32 0.999995, %v875_v1  ;;  %v1511_v10 = vpop.f32.mrb[8].mxu0 }
 0x220   : > { %1226 = vst.msk [vmem:[%s1844_s10 + $0x18] sm:$0xff] %vm682_vm1, %v1210_v3  ;;  %v1196_v12 = vmax.f32 %v1180_v4, 0.0  ;;  %v946_v14 = vmax.f32 %v930_v5, 0.0  ;;  %v890_v16 = vadd.f32 %v1511_v10, %v1981_v13  ;;  %v884_v17 = vpop.f32.mrb[9].mxu0  ;;  %v1157_v3 = vadd.f32 %v1986_v15, %v1156_v58 }
 0x221   : > { %1225 = vst.msk [vmem:[%s1844_s10 + $0x10] sm:$0xff] %vm682_vm1, %v1209_v7  ;;  %v1195_v19 = vmax.f32 %v1179_v8, 0.0  ;;  %v945_v20 = vmax.f32 %v929_v9, 0.0  ;;  %v885_v21 = vadd.f32 %v1981_v13, %v884_v17  ;;  %v1552_v8 = vpop.f32.mrb[14].mxu1 }
 0x222   : > { %v1212_v23 = vmul.f32 0.999995, %v1196_v12  ;;  %v1182_v24 = vadd.f32 %v1132_v6, %v946_v14  ;;  %v932_v25 = vmul.f32 0.999995, %v890_v16  ;;  %v1166_v12 = vpop.f32.mrb[15].mxu1  ;;  %v1172_v18 = vadd.f32 %v1552_v8, %v1986_v15 }
 0x223   : > { %v1211_v27 = vmul.f32 0.999995, %v1195_v19  ;;  %v1181_v28 = vadd.f32 %v1127_v11, %v945_v20  ;;  %v931_v29 = vmul.f32 0.999995, %v885_v21  ;;  %v1514_v30 = vpop.f32.mrb[10].mxu0  ;;  %v1167_v22 = vadd.f32 %v1986_v15, %v1166_v12 }
 0x224   : > { %1228 = vst.msk [vmem:[%s1844_s10 + $0x28] sm:$0xff] %vm682_vm1, %v1212_v23  ;;  %v1198_v32 = vmax.f32 %v1182_v24, 0.0  ;;  %v948_v33 = vmax.f32 %v932_v25, 0.0  ;;  %v900_v34 = vadd.f32 %v1514_v30, %v1981_v13  ;;  %v894_v35 = vpop.f32.mrb[11].mxu0 }
 0x225   : > { %1227 = vst.msk [vmem:[%s1844_s10 + $0x20] sm:$0xff] %vm682_vm1, %v1211_v27  ;;  %v1197_v37 = vmax.f32 %v1181_v28, 0.0  ;;  %v947_v38 = vmax.f32 %v931_v29, 0.0  ;;  %v895_v39 = vadd.f32 %v1981_v13, %v894_v35 }
 0x226   : > { %v1214_v41 = vmul.f32 0.999995, %v1198_v32  ;;  %v1184_v42 = vadd.f32 %v1142_v26, %v948_v33  ;;  %v934_v43 = vmul.f32 0.999995, %v900_v34 }
 0x227   : > { %v1213_v45 = vmul.f32 0.999995, %v1197_v37  ;;  %v1183_v46 = vadd.f32 %v1137_v31, %v947_v38  ;;  %v933_v47 = vmul.f32 0.999995, %v895_v39  ;;  %v1517_v48 = vpop.f32.mrb[12].mxu0 }
 0x228   : > { %1230 = vst.msk [vmem:[%s1844_s10 + $0x38] sm:$0xff] %vm682_vm1, %v1214_v41  ;;  %v1200_v50 = vmax.f32 %v1184_v42, 0.0  ;;  %v950_v51 = vmax.f32 %v934_v43, 0.0  ;;  %v910_v52 = vadd.f32 %v1517_v48, %v1981_v13  ;;  %v904_v53 = vpop.f32.mrb[13].mxu0 }
 0x229   : > { %1229 = vst.msk [vmem:[%s1844_s10 + $0x30] sm:$0xff] %vm682_vm1, %v1213_v45  ;;  %v1199_v55 = vmax.f32 %v1183_v46, 0.0  ;;  %v949_v56 = vmax.f32 %v933_v47, 0.0  ;;  %v905_v57 = vadd.f32 %v1981_v13, %v904_v53 }
 0x22a   : > { %v1216_v59 = vmul.f32 0.999995, %v1200_v50  ;;  %v1186_v60 = vadd.f32 %v1152_v44, %v950_v51  ;;  %v936_v61 = vmul.f32 0.999995, %v910_v52 }
 0x22b   : > { %v1215_v63 = vmul.f32 0.999995, %v1199_v55  ;;  %v1185_v0 = vadd.f32 %v1147_v49, %v949_v56  ;;  %v935_v1 = vmul.f32 0.999995, %v905_v57  ;;  %v1520_v2 = vpop.f32.mrb[14].mxu0 }
 0x22c   : > { %1232 = vst.msk [vmem:[%s1844_s10 + $0x48] sm:$0xff] %vm682_vm1, %v1216_v59  ;;  %v1202_v4 = vmax.f32 %v1186_v60, 0.0  ;;  %v952_v5 = vmax.f32 %v936_v61, 0.0  ;;  %v920_v6 = vadd.f32 %v1520_v2, %v1981_v13  ;;  %v914_v7 = vpop.f32.mrb[15].mxu0 }
 0x22d   : > { %1231 = vst.msk [vmem:[%s1844_s10 + $0x40] sm:$0xff] %vm682_vm1, %v1215_v63  ;;  %v1201_v9 = vmax.f32 %v1185_v0, 0.0  ;;  %v951_v10 = vmax.f32 %v935_v1, 0.0  ;;  %v915_v11 = vadd.f32 %v1981_v13, %v914_v7 }
 0x22e   : > { %v1218_v14 = vmul.f32 0.999995, %v1202_v4  ;;  %v1188_v16 = vadd.f32 %v1162_v62, %v952_v5  ;;  %v938_v17 = vmul.f32 0.999995, %v920_v6 }
 0x22f   : > { %v1217_v19 = vmul.f32 0.999995, %v1201_v9  ;;  %v1187_v20 = vadd.f32 %v1157_v3, %v951_v10  ;;  %v937_v21 = vmul.f32 0.999995, %v915_v11 }
 0x230   : > { %1234 = vst.msk [vmem:[%s1844_s10 + $0x58] sm:$0xff] %vm682_vm1, %v1218_v14  ;;  %v1204_v23 = vmax.f32 %v1188_v16, 0.0  ;;  %v954_v24 = vmax.f32 %v938_v17, 0.0 }
 0x231   : > { %1233 = vst.msk [vmem:[%s1844_s10 + $0x50] sm:$0xff] %vm682_vm1, %v1217_v19  ;;  %v1203_v13 = vmax.f32 %v1187_v20, 0.0  ;;  %v953_v25 = vmax.f32 %v937_v21, 0.0 }
 0x232   : > { %v1220_v26 = vmul.f32 0.999995, %v1204_v23  ;;  %v1190_v27 = vadd.f32 %v1172_v18, %v954_v24 }
 0x233   : > { %v1219_v28 = vmul.f32 0.999995, %v1203_v13  ;;  %v1189_v29 = vadd.f32 %v1167_v22, %v953_v25 }
 0x234   : > { %1236 = vst.msk [vmem:[%s1844_s10 + $0x68] sm:$0xff] %vm682_vm1, %v1220_v26  ;;  %v1206_v30 = vmax.f32 %v1190_v27, 0.0 }
 0x235   : > { %1235 = vst.msk [vmem:[%s1844_s10 + $0x60] sm:$0xff] %vm682_vm1, %v1219_v28  ;;  %v1205_v15 = vmax.f32 %v1189_v29, 0.0 }
 0x236   : > { %v1222_v31 = vmul.f32 0.999995, %v1206_v30 }
 0x237   : > { %v1221_v32 = vmul.f32 0.999995, %v1205_v15 }
 0x238   : > { %1238 = vst.msk [vmem:[%s1844_s10 + $0x78] sm:$0xff] %vm682_vm1, %v1222_v31 }
 0x239   : > { %1237 = vst.msk [vmem:[%s1844_s10 + $0x70] sm:$0xff] %vm682_vm1, %v1221_v32 }
 0x23a PF: > { %s17_s30 = sadd.s32 1, %s1705_s30   ;;  %s2081_s24 = smov %s1685_s25 }
 0x23b   : > { %p14_p0 = scmp.ge.s32.totalorder %s17_s30, 11   ;;  %s2082_s25 = smov %s1799_s14 }
 0x23c   : > { %s2083_s26 = smov %s1697_s28  ;;  %s2084_s27 = smov %s1701_s29 }
 0x23d   : > { %s2085_s28 = smov %s2088_s8  ;;  %s2086_s29 = smov %s2092_s9 }
 0x23e   :  { %16 = sbr.rel (!%p14_p0) target bundleno = 4 (0x4), region = 138 }

// kernel: slog_n_forward.23
= control target key start
LH: loop header
LB: loop body
LE: loop exit
PB: predicated region body
PF: predicated region fallthrough
CT: control target
= control target key end

     0   :  { %s3080_s0 = inlined_call_operand.vmem [shape: bf16[384,384], index: 0, kind: input, shape index: {}]   ;;  %s3081_s1 = inlined_call_operand.vmem [shape: f32[384,32], index: 1, kind: input, shape index: {}]   ;;  %s3082_s2 = inlined_call_operand.vmem [shape: f32[384,32], index: 2, kind: input, shape index: {}]   ;;  %s3083_s3 = inlined_call_operand.vmem [shape: f32[32,32], index: 3, kind: input, shape index: {}]   ;;  %s3084_s4 = inlined_call_operand.vmem [shape: f32[1,32], index: 4, kind: input, shape index: {}]   ;;  %s3085_s5 = inlined_call_operand.vmem [shape: f32[32,4], index: 5, kind: input, shape index: {}]   ;;  %s3086_s6 = inlined_call_operand.vmem [shape: f32[1,4], index: 6, kind: input, shape index: {}]   ;;  %s3087_s7 = inlined_call_operand.vmem [shape: f32[32,4], index: 7, kind: input, shape index: {}]   ;;  %s3088_s8 = inlined_call_operand.vmem [shape: f32[1,4], index: 8, kind: input, shape index: {}]   ;;  %s3089_s9 = inlined_call_operand.vmem [shape: f32[384,4], index: 9, kind: output, shape index: {}]  }
   0x1   :  { %3091 = sst [smem:[#allocation5_spill]] %s3080_s0 }
   0x2   :  { %s2498_s30 = smov 0   ;;  %s2500_s10 = smov 0  }
   0x3   :  { %s2502_s11 = smov 0   ;;  %s2504_s12 = smov 0  }
   0x4   :  { %s2506_s13 = smov 0   ;;  %s2508_s14 = smov 0  }
   0x5   :  { %s2510_s15 = smov 0  }
   0x6 LB: > { %s28_s16 = sadd.s32 1, %s2437_s13  ;;  %s31_s17 = sadd.s32 1, %s2441_s14  ;;  %s2445_s15 = sphi %s2510_s15, %s19_s15   ;;  %s2441_s14 = sphi %s2508_s14, %s3100_s14   ;;  %s2437_s13 = sphi %s2506_s13, %s3099_s13   ;;  %s2433_s12 = sphi %s2504_s12, %s3098_s12   ;;  %s2429_s11 = sphi %s2502_s11, %s3097_s11   ;;  %s2425_s10 = sphi %s2500_s10, %s3096_s10   ;;  %s2421_s30 = sphi %s2498_s30, %s3095_s30  }
   0x7   : > { %p29_p0 = scmp.ge.s32.totalorder %s28_s16, 3  ;;  %p47_p1 = scmp.ne.s32.totalorder %s2425_s10, %s2421_s30 }
   0x8   : > { %p48_p2 = scmp.eq.s32.totalorder %s2445_s15, 0  ;;  %s40_s21 = sadd.s32 1, %s2425_s10 }
   0x9   : > { %s3102_s16 = smov (%p29_p0, %s28_s16), 0  ;;  %s3104_s17 = smov (!%p29_p0, %s31_s17), %s2441_s14 }
   0xa   : > { %p49_p3 = por %p48_p2, %p47_p1  ;;  %p33_p4 = scmp.ge.s32.totalorder %s3104_s17, 3 }
   0xb   : > { %s36_s18 = ssub.s32 %s2437_s13, %s3102_s16  ;;  %p1857_p6 = scmp.ge.s32.totalorder %s2445_s15, 9 }
   0xc   : > { %s3106_s17 = smov (%p33_p4, %s3104_s17), 0 }
   0xd   : > { %3092 = sst [smem:[#allocation4_spill]] %s3106_s17  ;;  %s35_s19 = ssub.s32 %s2441_s14, %s3106_s17 }
   0xe   : > { %s37_s20 = sor.u32 %s36_s18, %s35_s19  ;;  %295 = sbr.rel (%p1857_p6) target bundleno = 41 (0x29), region = 40 }
   0xf   : > { %p38_p5 = scmp.eq.s32.totalorder %s37_s20, 0 }
  0x11   : > { %s2549_s22 = scalar_select %p38_p5, %s2425_s10, %s40_s21  }
  0x15   : > { %298 = sbr.rel (!%p49_p3) target bundleno = 41 (0x29), region = 44  ;;  %s300_s23 = sand.u32 (%p49_p3), 1, %s2425_s10  }
  0x16   : > { %s2197_s24 = smul.u32 (%p49_p3), 48, %s2441_s14  ;;  %s1858_s25 = sshll.u32 (%p49_p3), %s300_s23, 6 }
  0x17   : > { %s3093_s0 = sld [smem:[#allocation5_spill]] (%p49_p3)  ;;  %s302_s19 = scalar_lea.vmem (%p49_p3), [#allocation3], %s1858_s25 }
  0x18   : > { %s305_s26 = sadd.s32 (%p49_p3), %s2437_s13, %s2197_s24 }
  0x19   : > { %s1861_s27 = sshll.u32 (%p49_p3), %s305_s26, 2 }
  0x1d   : > { %s2558_s18 = scalar_lea.vmem %s3093_s0, %s1861_s27 }
  0x1e   : > { %v323_v0 = vld [vmem:[%s2558_s18] sm:$0xf]  ;;  %v325_v1 = vld [vmem:[%s2558_s18 + $0xc] sm:$0xf]  ;;  %v327_v2 = vld [vmem:[%s2558_s18 + $0x18] sm:$0xf] }
  0x1f   : > { %324 = vst [vmem:[%s302_s19] sm:$0xf] %v323_v0  ;;  %326 = vst [vmem:[%s302_s19 + $0x4] sm:$0xf] %v325_v1  ;;  %v329_v3 = vld [vmem:[%s2558_s18 + $0x24] sm:$0xf] }
  0x20   : > { %328 = vst [vmem:[%s302_s19 + $0x8] sm:$0xf] %v327_v2  ;;  %v331_v4 = vld [vmem:[%s2558_s18 + $0x30] sm:$0xf]  ;;  %v333_v5 = vld [vmem:[%s2558_s18 + $0x3c] sm:$0xf] }
  0x21   : > { %330 = vst [vmem:[%s302_s19 + $0xc] sm:$0xf] %v329_v3  ;;  %332 = vst [vmem:[%s302_s19 + $0x10] sm:$0xf] %v331_v4  ;;  %v335_v6 = vld [vmem:[%s2558_s18 + $0x48] sm:$0xf] }
  0x22   : > { %334 = vst [vmem:[%s302_s19 + $0x14] sm:$0xf] %v333_v5  ;;  %v337_v7 = vld [vmem:[%s2558_s18 + $0x54] sm:$0xf]  ;;  %v339_v8 = vld [vmem:[%s2558_s18 + $0x60] sm:$0xf] }
  0x23   : > { %336 = vst [vmem:[%s302_s19 + $0x18] sm:$0xf] %v335_v6  ;;  %338 = vst [vmem:[%s302_s19 + $0x1c] sm:$0xf] %v337_v7  ;;  %v341_v9 = vld [vmem:[%s2558_s18 + $0x6c] sm:$0xf] }
  0x24   : > { %340 = vst [vmem:[%s302_s19 + $0x20] sm:$0xf] %v339_v8  ;;  %v343_v10 = vld [vmem:[%s2558_s18 + $0x78] sm:$0xf]  ;;  %v345_v11 = vld [vmem:[%s2558_s18 + $0x84] sm:$0xf] }
  0x25   : > { %342 = vst [vmem:[%s302_s19 + $0x24] sm:$0xf] %v341_v9  ;;  %344 = vst [vmem:[%s302_s19 + $0x28] sm:$0xf] %v343_v10  ;;  %v347_v12 = vld [vmem:[%s2558_s18 + $0x90] sm:$0xf] }
  0x26   : > { %346 = vst [vmem:[%s302_s19 + $0x2c] sm:$0xf] %v345_v11  ;;  %v349_v13 = vld [vmem:[%s2558_s18 + $0x9c] sm:$0xf]  ;;  %v351_v14 = vld [vmem:[%s2558_s18 + $0xa8] sm:$0xf] }
  0x27   : > { %348 = vst [vmem:[%s302_s19 + $0x30] sm:$0xf] %v347_v12  ;;  %350 = vst [vmem:[%s302_s19 + $0x34] sm:$0xf] %v349_v13  ;;  %v353_v15 = vld [vmem:[%s2558_s18 + $0xb4] sm:$0xf] }
  0x28   : > { %352 = vst [vmem:[%s302_s19 + $0x38] sm:$0xf] %v351_v14  ;;  %354 = vst [vmem:[%s302_s19 + $0x3c] sm:$0xf] %v353_v15 }
  0x29 PF: > { %p1862_p7 = scmp.ge.s32.totalorder %s2445_s15, 1  ;;  %p426_p8 = scmp.lt.s32.totalorder %s2445_s15, 10 }
  0x2b   : > { %p427_p9 = pnand %p1862_p7, %p426_p8 }
  0x2c   : > { %s433_s20 = sand.u32 (!%p427_p9), 1, %s2421_s30   ;;  %s1864_s21 = sshll.u32 (!%p427_p9), %s2429_s11, 4 }
  0x2d   : > { %430 = sbr.rel (%p427_p9) target bundleno = 1134 (0x46e), region = 93  ;;  %s1863_s23 = sshll.u32 (!%p427_p9), %s433_s20, 6 }
  0x2e   : > { %p480_p10 = scmp.lt.s32.totalorder (!%p427_p9), %s1864_s21, 47  ;;  %s1866_s24 = sshll.u32 (!%p427_p9), %s2433_s12, 4 }
  0x2f   : > { %p486_p11 = scmp.lt.s32.totalorder (!%p427_p9), %s1866_s24, 47  ;;  %s2596_s12 = scalar_lea.vmem (!%p427_p9), [#allocation3], %s1863_s23 }
  0x30   : > { %p1870_p12 = scmp.ne.s32.totalorder (!%p427_p9), %s2429_s11, 0 }
  0x34   : > { %s3108_s21 = smov (!%p480_p10, %s1864_s21), 47  ;;  %s3110_s24 = smov (!%p486_p11, %s1866_s24), 47 }
  0x35   : > { %s1865_s25 = sshll.u32 %s3108_s21, 3  ;;  %s1867_s29 = sshll.u32 %s3110_s24, 3  ;;  %vm502_vm0 = vcmask (!%p1870_p12), 261120   ;;  %v2447_v16 = vmov (!%p1870_p12), 0.0  }
  0x36   : > { %s2584_s28 = scalar_lea.vmem %s3081_s1, %s1865_s25  ;;  %s2589_s0 = scalar_lea.vmem %s3082_s2, %s1867_s29  ;;  %503 = vst.msk [vmem:[#allocation2] sm:$0xff] (!%p1870_p12), %vm502_vm0, %v2447_v16  ;;  %504 = vst.msk [vmem:[#allocation2 + $0x8] sm:$0xff] (!%p1870_p12), %vm502_vm0, %v2447_v16 }
  0x37   : > { %s2594_s20 = scalar_lea.vmem %s3089_s9, %s1867_s29  ;;  %501 = sbr.rel (%p1870_p12) target bundleno = 62 (0x3e), region = 101  ;;  %505 = vst.msk [vmem:[#allocation2 + $0x10] sm:$0xff] (!%p1870_p12), %vm502_vm0, %v2447_v16  ;;  %506 = vst.msk [vmem:[#allocation2 + $0x18] sm:$0xff] (!%p1870_p12), %vm502_vm0, %v2447_v16 }
  0x38   : > { %507 = vst.msk [vmem:[#allocation2 + $0x20] sm:$0xff] (!%p1870_p12), %vm502_vm0, %v2447_v16  ;;  %508 = vst.msk [vmem:[#allocation2 + $0x28] sm:$0xff] (!%p1870_p12), %vm502_vm0, %v2447_v16 }
  0x39   : > { %509 = vst.msk [vmem:[#allocation2 + $0x30] sm:$0xff] (!%p1870_p12), %vm502_vm0, %v2447_v16  ;;  %510 = vst.msk [vmem:[#allocation2 + $0x38] sm:$0xff] (!%p1870_p12), %vm502_vm0, %v2447_v16 }
  0x3a   : > { %511 = vst.msk [vmem:[#allocation2 + $0x40] sm:$0xff] (!%p1870_p12), %vm502_vm0, %v2447_v16  ;;  %512 = vst.msk [vmem:[#allocation2 + $0x48] sm:$0xff] (!%p1870_p12), %vm502_vm0, %v2447_v16 }
  0x3b   : > { %513 = vst.msk [vmem:[#allocation2 + $0x50] sm:$0xff] (!%p1870_p12), %vm502_vm0, %v2447_v16  ;;  %514 = vst.msk [vmem:[#allocation2 + $0x58] sm:$0xff] (!%p1870_p12), %vm502_vm0, %v2447_v16 }
  0x3c   : > { %515 = vst.msk [vmem:[#allocation2 + $0x60] sm:$0xff] (!%p1870_p12), %vm502_vm0, %v2447_v16  ;;  %516 = vst.msk [vmem:[#allocation2 + $0x68] sm:$0xff] (!%p1870_p12), %vm502_vm0, %v2447_v16 }
  0x3d   : > { %517 = vst.msk [vmem:[#allocation2 + $0x70] sm:$0xff] (!%p1870_p12), %vm502_vm0, %v2447_v16  ;;  %518 = vst.msk [vmem:[#allocation2 + $0x78] sm:$0xff] (!%p1870_p12), %vm502_vm0, %v2447_v16 }
  0x3e PF: > { %v551_v17 = vld [vmem:[%s2584_s28] sm:$0xff]  ;;  %v552_v18 = vld [vmem:[%s2584_s28 + $0x8] sm:$0xff]  ;;  %v553_v19 = vld [vmem:[%s2584_s28 + $0x10] sm:$0xff]  ;;  %vm736_vm1 = vcmask 261120   ;;  %p1879_p13 = scmp.ne.s32.totalorder %s2429_s11, 2 }
  0x3f   : > { %v567_v20 = vpack.c.bf16 %v552_v18, %v551_v17  ;;  %v554_v21 = vld [vmem:[%s2584_s28 + $0x18] sm:$0xff]  ;;  %v555_v23 = vld [vmem:[%s2584_s28 + $0x20] sm:$0xff]  ;;  %v556_v24 = vld [vmem:[%s2584_s28 + $0x28] sm:$0xff]  ;;  %vm1545_vm2 = vcmask (!%p1879_p13), 31744  }
  0x40   : > { %v568_v22 = vpack.c.bf16 %v554_v21, %v553_v19  ;;  %v557_v25 = vld [vmem:[%s2584_s28 + $0x30] sm:$0xff]  ;;  %v569_v26 = vpack.c.bf16 %v556_v24, %v555_v23  ;;  %v558_v27 = vld [vmem:[%s2584_s28 + $0x38] sm:$0xff]  ;;  %v2255_v28 = vld [vmem:[%s2596_s12] sm:$0xff]  }
  0x41   : > { %2025 = vmatprep.subr.bf16.mxu0 %v567_v20  ;;  %2177 = vmatprep.subr.bf16.mxu1 %v567_v20  ;;  %v2256_v29 = vld [vmem:[%s2596_s12 + $0x20] sm:$0xff]   ;;  %v570_v30 = vpack.c.bf16 %v558_v27, %v557_v25  ;;  %v560_v32 = vld [vmem:[%s2584_s28 + $0x48] sm:$0xff]  ;;  %v561_v34 = vld [vmem:[%s2584_s28 + $0x50] sm:$0xff] }
  0x42   : > { %2026 = vmatpush3.bf16.msra.mxu0 %v567_v20  ;;  %2185 = vmatpush3.bf16.msra.mxu1 %v567_v20  ;;  %v559_v31 = vld [vmem:[%s2584_s28 + $0x40] sm:$0xff]  ;;  %v562_v35 = vld [vmem:[%s2584_s28 + $0x58] sm:$0xff]  ;;  %v564_v38 = vld [vmem:[%s2584_s28 + $0x68] sm:$0xff] }
  0x43   : > { %2027 = vmatprep.subr.bf16.mxu0 %v568_v22  ;;  %2178 = vmatprep.subr.bf16.mxu1 %v568_v22  ;;  %v571_v33 = vpack.c.bf16 %v560_v32, %v559_v31  ;;  %v572_v36 = vpack.c.bf16 %v562_v35, %v561_v34  ;;  %v563_v37 = vld [vmem:[%s2584_s28 + $0x60] sm:$0xff]  ;;  %v565_v40 = vld [vmem:[%s2584_s28 + $0x70] sm:$0xff]  ;;  %v566_v41 = vld [vmem:[%s2584_s28 + $0x78] sm:$0xff] }
  0x44   : > { %2041 = vmatprep.mubr.bf16.mxu0 %v2255_v28  ;;  %2049 = vmatprep.mubr.bf16.mxu1 %v2256_v29  ;;  %v573_v39 = vpack.c.bf16 %v564_v38, %v563_v37  ;;  %v574_v42 = vpack.c.bf16 %v566_v41, %v565_v40  ;;  %v2257_v43 = vld [vmem:[%s2596_s12 + $0x8] sm:$0xff]   ;;  %v2259_v45 = vld [vmem:[%s2596_s12 + $0x10] sm:$0xff]   ;;  %v2261_v47 = vld [vmem:[%s2596_s12 + $0x18] sm:$0xff]  }
  0x45   : > { %v2258_v44 = vld [vmem:[%s2596_s12 + $0x28] sm:$0xff]   ;;  %v2260_v46 = vld [vmem:[%s2596_s12 + $0x30] sm:$0xff]   ;;  %v2262_v48 = vld [vmem:[%s2596_s12 + $0x38] sm:$0xff]  }
  0x46   : > { %2028 = vmatpush3.bf16.msra.mxu0 %v568_v22  ;;  %2186 = vmatpush3.bf16.msra.mxu1 %v568_v22  ;;  %v521_v49 = vld [vmem:[#allocation2 + $0x10] sm:$0xff]  ;;  %v519_v51 = vld [vmem:[#allocation2] sm:$0xff]  ;;  %v522_v55 = vld [vmem:[#allocation2 + $0x18] sm:$0xff] }
  0x47   : > { %2029 = vmatprep.subr.bf16.mxu0 %v569_v26  ;;  %2179 = vmatprep.subr.bf16.mxu1 %v569_v26  ;;  %v529_v50 = vld [vmem:[#allocation2 + $0x50] sm:$0xff]  ;;  %v527_v52 = vld [vmem:[#allocation2 + $0x40] sm:$0xff]  ;;  %v530_v56 = vld [vmem:[#allocation2 + $0x58] sm:$0xff] }
  0x48   : > { %v520_v61 = vld [vmem:[#allocation2 + $0x8] sm:$0xff]  ;;  %v525_v9 = vld [vmem:[#allocation2 + $0x30] sm:$0xff]  ;;  %v523_v11 = vld [vmem:[#allocation2 + $0x20] sm:$0xff] }
  0x49   : > { %v528_v62 = vld [vmem:[#allocation2 + $0x48] sm:$0xff]  ;;  %v533_v10 = vld [vmem:[#allocation2 + $0x70] sm:$0xff]  ;;  %v531_v12 = vld [vmem:[#allocation2 + $0x60] sm:$0xff] }
  0x4a   : > { %2030 = vmatpush3.bf16.msra.mxu0 %v569_v26  ;;  %2187 = vmatpush3.bf16.msra.mxu1 %v569_v26  ;;  %v526_v15 = vld [vmem:[#allocation2 + $0x38] sm:$0xff]  ;;  %v524_v21 = vld [vmem:[#allocation2 + $0x28] sm:$0xff]  ;;  %v775_v35 = vld [vmem:[%s3083_s3 + $0x10] sm:$0xff] (!%p1879_p13) }
  0x4b   : > { %2031 = vmatprep.subr.bf16.mxu0 %v570_v30  ;;  %2180 = vmatprep.subr.bf16.mxu1 %v570_v30  ;;  %v534_v16 = vld [vmem:[#allocation2 + $0x78] sm:$0xff]  ;;  %v532_v22 = vld [vmem:[#allocation2 + $0x68] sm:$0xff]  ;;  %v1009_v41 = vld [vmem:[%s3085_s5] sm:$0xff] (!%p1879_p13) }
  0x4c   : > { %v774_v34 = vld [vmem:[%s3083_s3 + $0x8] sm:$0xff] (!%p1879_p13)  ;;  %v776_v37 = vld [vmem:[%s3083_s3 + $0x18] sm:$0xff] (!%p1879_p13) }
  0x4e   : > { %2032 = vmatpush3.bf16.msra.mxu0 %v570_v30  ;;  %2188 = vmatpush3.bf16.msra.mxu1 %v570_v30 }
  0x4f   : > { %2033 = vmatprep.subr.bf16.mxu0 %v571_v33  ;;  %2181 = vmatprep.subr.bf16.mxu1 %v571_v33 }
  0x52   : > { %2034 = vmatpush3.bf16.msra.mxu0 %v571_v33  ;;  %2189 = vmatpush3.bf16.msra.mxu1 %v571_v33  ;;  %v773_v33 = vld [vmem:[%s3083_s3] sm:$0xff] (!%p1879_p13) }
  0x53   : > { %2035 = vmatprep.subr.bf16.mxu0 %v572_v36  ;;  %2182 = vmatprep.subr.bf16.mxu1 %v572_v36 }
  0x56   : > { %2036 = vmatpush3.bf16.msra.mxu0 %v572_v36  ;;  %2190 = vmatpush3.bf16.msra.mxu1 %v572_v36  ;;  %v2153_v36 = vpack.c.bf16 (!%p1879_p13), %v774_v34, %v773_v33 }
  0x57   : > { %2037 = vmatprep.subr.bf16.mxu0 %v573_v39  ;;  %2183 = vmatprep.subr.bf16.mxu1 %v573_v39 }
  0x5a   : > { %2038 = vmatpush3.bf16.msra.mxu0 %v573_v39  ;;  %2191 = vmatpush3.bf16.msra.mxu1 %v573_v39  ;;  %v2157_v39 = vpack.c.bf16 (!%p1879_p13), %v776_v37, %v775_v35 }
  0x5b   : > { %2039 = vmatprep.subr.bf16.mxu0 %v574_v42  ;;  %2184 = vmatprep.subr.bf16.mxu1 %v574_v42 }
  0x5e   : > { %2040 = vmatpush3.bf16.msra.mxu0 %v574_v42  ;;  %2192 = vmatpush3.bf16.msra.mxu1 %v574_v42  ;;  %v1010_v42 = vld [vmem:[%s3085_s5 + $0x8] sm:$0xff] (!%p1879_p13) }
  0x5f   : > { %2154 = vmatprep.subr.bf16.mxu0 (!%p1879_p13), %v2153_v36  ;;  %2193 = vmatprep.subr.bf16.mxu1 (!%p1879_p13), %v2153_v36 }
  0x61   : > { %2042 = vmatmul.mubr.bf16.vlgmr.msra.gmra.mrb[0].mxu0 %v2257_v43  ;;  %2050 = vmatmul.mubr.bf16.vlgmr.msra.gmra.mrb[0].mxu1 %v2258_v44 }
  0x62   : > { %2045 = vmatprep.mubr.bf16.mxu0 %v2259_v45  ;;  %2053 = vmatprep.mubr.bf16.mxu1 %v2260_v46  ;;  %v2161_v45 = vpack.c.bf16 (!%p1879_p13), %v1010_v42, %v1009_v41 }
  0x63   : > { %2156 = vmatpush3.bf16.msra.mxu0 (!%p1879_p13), %v2153_v36  ;;  %2195 = vmatpush3.bf16.msra.mxu1 (!%p1879_p13), %v2153_v36 }
  0x64   : > { %2158 = vmatprep.subr.bf16.mxu0 (!%p1879_p13), %v2157_v39  ;;  %2194 = vmatprep.subr.bf16.mxu1 (!%p1879_p13), %v2157_v39 }
  0x67   : > { %2160 = vmatpush3.bf16.msra.mxu0 (!%p1879_p13), %v2157_v39  ;;  %2196 = vmatpush3.bf16.msra.mxu1 (!%p1879_p13), %v2157_v39 }
  0x68   : > { %2162 = vmatprep.subr.bf16.mxu1 (!%p1879_p13), %v2161_v45 }
  0x69   : > { %2046 = vmatmul.mubr.bf16.gmra.mrb[4].mxu0 %v2261_v47  ;;  %2054 = vmatmul.mubr.bf16.gmra.mrb[4].mxu1 %v2262_v48 }
 0x134   : > { %v2043_v53 = vpop.f32.mrb[0].mxu0  ;;  %v2051_v54 = vpop.f32.mrb[0].mxu1 }
 0x135   : > { %v722_v57 = vadd.f32 %v2043_v53, %v521_v49  ;;  %v730_v58 = vadd.f32 %v2051_v54, %v529_v50  ;;  %v657_v59 = vpop.f32.mrb[1].mxu0  ;;  %v689_v60 = vpop.f32.mrb[1].mxu1 }
 0x136   : > { %v720_v63 = vadd.f32 %v657_v59, %v519_v51  ;;  %v728_v0 = vadd.f32 %v689_v60, %v527_v52  ;;  %v2044_v1 = vpop.f32.mrb[2].mxu0  ;;  %v2052_v2 = vpop.f32.mrb[2].mxu1  ;;  %v1012_v59 = vld [vmem:[%s3085_s5 + $0x18] sm:$0xff] (!%p1879_p13) }
 0x137   : > { %739 = vst.msk [vmem:[#allocation2 + $0x10] sm:$0xff] %vm736_vm1, %v722_v57  ;;  %747 = vst.msk [vmem:[#allocation2 + $0x50] sm:$0xff] %vm736_vm1, %v730_v58  ;;  %v723_v3 = vadd.f32 %v2044_v1, %v522_v55  ;;  %v731_v4 = vadd.f32 %v2052_v2, %v530_v56  ;;  %v660_v5 = vpop.f32.mrb[3].mxu0  ;;  %v692_v6 = vpop.f32.mrb[3].mxu1  ;;  %v1011_v58 = vld [vmem:[%s3085_s5 + $0x10] sm:$0xff] (!%p1879_p13)  ;;  %v1232_v1 = vld [vmem:[%s3087_s7 + $0x18] sm:$0xff] (!%p1879_p13) }
 0x138   : > { %737 = vst.msk [vmem:[#allocation2] sm:$0xff] %vm736_vm1, %v720_v63  ;;  %745 = vst.msk [vmem:[#allocation2 + $0x40] sm:$0xff] %vm736_vm1, %v728_v0  ;;  %v721_v7 = vadd.f32 %v660_v5, %v520_v61  ;;  %v729_v8 = vadd.f32 %v692_v6, %v528_v62  ;;  %v2165_v60 = vpack.c.bf16 (!%p1879_p13), %v1012_v59, %v1011_v58  ;;  %v1229_v61 = vld [vmem:[%s3087_s7] sm:$0xff] (!%p1879_p13)  ;;  %v1230_v62 = vld [vmem:[%s3087_s7 + $0x8] sm:$0xff] (!%p1879_p13) }
 0x139   : > { %740 = vst.msk [vmem:[#allocation2 + $0x18] sm:$0xff] %vm736_vm1, %v723_v3  ;;  %748 = vst.msk [vmem:[#allocation2 + $0x58] sm:$0xff] %vm736_vm1, %v731_v4  ;;  %v2169_v63 = vpack.c.bf16 (!%p1879_p13), %v1230_v62, %v1229_v61  ;;  %v1231_v0 = vld [vmem:[%s3087_s7 + $0x10] sm:$0xff] (!%p1879_p13)  ;;  %v1213_v3 = vld [vmem:[%s2589_s0] sm:$0xff] (!%p1879_p13) }
 0x13a   : > { %738 = vst.msk [vmem:[#allocation2 + $0x8] sm:$0xff] %vm736_vm1, %v721_v7  ;;  %746 = vst.msk [vmem:[#allocation2 + $0x48] sm:$0xff] %vm736_vm1, %v729_v8  ;;  %v2173_v2 = vpack.c.bf16 (!%p1879_p13), %v1232_v1, %v1231_v0  ;;  %v1214_v4 = vld [vmem:[%s2589_s0 + $0x8] sm:$0xff] (!%p1879_p13)  ;;  %v1215_v5 = vld [vmem:[%s2589_s0 + $0x10] sm:$0xff] (!%p1879_p13) }
 0x13b   : > { %2170 = vmatprep.subr.bf16.mxu0 (!%p1879_p13), %v2169_v63  ;;  %v1216_v6 = vld [vmem:[%s2589_s0 + $0x18] sm:$0xff] (!%p1879_p13)  ;;  %v1217_v7 = vld [vmem:[%s2589_s0 + $0x20] sm:$0xff] (!%p1879_p13)  ;;  %v1218_v8 = vld [vmem:[%s2589_s0 + $0x28] sm:$0xff] (!%p1879_p13) }
 0x13c   : > { %v2047_v13 = vpop.f32.mrb[4].mxu0  ;;  %v2055_v14 = vpop.f32.mrb[4].mxu1  ;;  %756 = sbr.rel (%p1879_p13) target bundleno = 1134 (0x46e), region = 105 }
 0x13d   : > { %v726_v17 = vadd.f32 %v2047_v13, %v525_v9  ;;  %v734_v18 = vadd.f32 %v2055_v14, %v533_v10  ;;  %v673_v19 = vpop.f32.mrb[5].mxu0  ;;  %v705_v20 = vpop.f32.mrb[5].mxu1  ;;  %v1219_v9 = vld [vmem:[%s2589_s0 + $0x30] sm:$0xff] (!%p1879_p13)  ;;  %v1220_v10 = vld [vmem:[%s2589_s0 + $0x38] sm:$0xff] (!%p1879_p13) }
 0x13e   : > { %v724_v23 = vadd.f32 %v673_v19, %v523_v11  ;;  %v732_v24 = vadd.f32 %v705_v20, %v531_v12  ;;  %v2048_v25 = vpop.f32.mrb[6].mxu0  ;;  %v2056_v26 = vpop.f32.mrb[6].mxu1  ;;  %v759_v46 = vld [vmem:[#allocation2 + $0x10] sm:$0xff] (!%p1879_p13)  ;;  %v1221_v11 = vld [vmem:[%s2589_s0 + $0x40] sm:$0xff] (!%p1879_p13)  ;;  %v1222_v12 = vld [vmem:[%s2589_s0 + $0x48] sm:$0xff] (!%p1879_p13) }
 0x13f   : > { %743 = vst.msk [vmem:[#allocation2 + $0x30] sm:$0xff] %vm736_vm1, %v726_v17  ;;  %751 = vst.msk [vmem:[#allocation2 + $0x70] sm:$0xff] %vm736_vm1, %v734_v18  ;;  %v727_v27 = vadd.f32 %v2048_v25, %v526_v15  ;;  %v735_v28 = vadd.f32 %v2056_v26, %v534_v16  ;;  %v676_v29 = vpop.f32.mrb[7].mxu0  ;;  %v708_v30 = vpop.f32.mrb[7].mxu1  ;;  %v757_v38 = vld [vmem:[#allocation2] sm:$0xff] (!%p1879_p13)  ;;  %v767_v47 = vld [vmem:[#allocation2 + $0x50] sm:$0xff] (!%p1879_p13) }
 0x140   : > { %741 = vst.msk [vmem:[#allocation2 + $0x20] sm:$0xff] %vm736_vm1, %v724_v23  ;;  %749 = vst.msk [vmem:[#allocation2 + $0x60] sm:$0xff] %vm736_vm1, %v732_v24  ;;  %v725_v31 = vadd.f32 %v676_v29, %v524_v21  ;;  %v733_v32 = vadd.f32 %v708_v30, %v532_v22  ;;  %2065 = vmatprep.mubr.msk.f32.mxu0 (!%p1879_p13), %vm736_vm1, %v757_v38  ;;  %v765_v40 = vld [vmem:[#allocation2 + $0x40] sm:$0xff] (!%p1879_p13)  ;;  %v760_v48 = vld [vmem:[#allocation2 + $0x18] sm:$0xff] (!%p1879_p13) }
 0x141   : > { %744 = vst.msk [vmem:[#allocation2 + $0x38] sm:$0xff] %vm736_vm1, %v727_v27  ;;  %752 = vst.msk [vmem:[#allocation2 + $0x78] sm:$0xff] %vm736_vm1, %v735_v28  ;;  %2077 = vmatprep.mubr.msk.f32.mxu1 (!%p1879_p13), %vm736_vm1, %v765_v40  ;;  %v758_v43 = vld [vmem:[#allocation2 + $0x8] sm:$0xff] (!%p1879_p13)  ;;  %v768_v49 = vld [vmem:[#allocation2 + $0x58] sm:$0xff] (!%p1879_p13) }
 0x142   : > { %742 = vst.msk [vmem:[#allocation2 + $0x28] sm:$0xff] %vm736_vm1, %v725_v31  ;;  %750 = vst.msk [vmem:[#allocation2 + $0x68] sm:$0xff] %vm736_vm1, %v733_v32  ;;  %v766_v44 = vld [vmem:[#allocation2 + $0x48] sm:$0xff] (!%p1879_p13)  ;;  %2066 = vmatmul.mubr.msk.f32.vlgmr.msra.gmra.mrb[0].mxu0 (!%p1879_p13), %vm736_vm1, %v758_v43  ;;  %v1223_v13 = vld [vmem:[%s2589_s0 + $0x50] sm:$0xff] (!%p1879_p13) }
 0x143   : > { %2078 = vmatmul.mubr.msk.f32.vlgmr.msra.gmra.mrb[0].mxu1 %vm736_vm1, %v766_v44  ;;  %2068 = vmatprep.mubr.msk.f32.mxu0 %vm736_vm1, %v759_v46  ;;  %v1224_v14 = vld [vmem:[%s2589_s0 + $0x58] sm:$0xff]  ;;  %v1225_v15 = vld [vmem:[%s2589_s0 + $0x60] sm:$0xff]  ;;  %v1226_v16 = vld [vmem:[%s2589_s0 + $0x68] sm:$0xff] }
 0x144   : > { %2080 = vmatprep.mubr.msk.f32.mxu1 %vm736_vm1, %v767_v47  ;;  %2164 = vmatpush3.bf16.msra.mxu1 %v2161_v45  ;;  %v1227_v17 = vld [vmem:[%s2589_s0 + $0x70] sm:$0xff]  ;;  %v1228_v18 = vld [vmem:[%s2589_s0 + $0x78] sm:$0xff]  ;;  %v2743_v19 = vld [vmem:[%s3084_s4] ss:$0 sm:$0xff] }
 0x145   : > { %2166 = vmatprep.subr.bf16.mxu1 %v2165_v60  ;;  %2172 = vmatpush3.bf16.msra.mxu0 %v2169_v63 }
 0x146   : > { %2069 = vmatmul.mubr.msk.f32.gmra.mrb[2].mxu0 %vm736_vm1, %v760_v48  ;;  %v763_v54 = vld [vmem:[#allocation2 + $0x30] sm:$0xff]  ;;  %2174 = vmatprep.subr.bf16.mxu0 %v2173_v2 }
 0x147   : > { %v761_v50 = vld [vmem:[#allocation2 + $0x20] sm:$0xff]  ;;  %2081 = vmatmul.mubr.msk.f32.gmra.mrb[2].mxu1 %vm736_vm1, %v768_v49  ;;  %v771_v55 = vld [vmem:[#allocation2 + $0x70] sm:$0xff] }
 0x148   : > { %v769_v51 = vld [vmem:[#allocation2 + $0x60] sm:$0xff]  ;;  %2071 = vmatprep.mubr.msk.f32.mxu0 %vm736_vm1, %v761_v50  ;;  %v764_v56 = vld [vmem:[#allocation2 + $0x38] sm:$0xff]  ;;  %2168 = vmatpush3.bf16.msra.mxu1 %v2165_v60 }
 0x149   : > { %v762_v52 = vld [vmem:[#allocation2 + $0x28] sm:$0xff]  ;;  %2083 = vmatprep.mubr.msk.f32.mxu1 %vm736_vm1, %v769_v51  ;;  %v772_v57 = vld [vmem:[#allocation2 + $0x78] sm:$0xff]  ;;  %2176 = vmatpush3.bf16.msra.mxu0 %v2173_v2 }
 0x14a   : > { %v770_v53 = vld [vmem:[#allocation2 + $0x68] sm:$0xff]  ;;  %2072 = vmatmul.mubr.msk.f32.gmra.mrb[4].mxu0 %vm736_vm1, %v762_v52 }
 0x14b   : > { %2084 = vmatmul.mubr.msk.f32.gmra.mrb[4].mxu1 %vm736_vm1, %v770_v53  ;;  %2074 = vmatprep.mubr.msk.f32.mxu0 %vm736_vm1, %v763_v54 }
 0x14c   : > { %2086 = vmatprep.mubr.msk.f32.mxu1 %vm736_vm1, %v771_v55 }
 0x14e   : > { %2075 = vmatmul.mubr.msk.f32.gmra.mrb[6].mxu0 %vm736_vm1, %v764_v56 }
 0x14f   : > { %2087 = vmatmul.mubr.msk.f32.gmra.mrb[6].mxu1 %vm736_vm1, %v772_v57  ;;  %2129 = vmatprep.mubr.msk.f32.mxu0 %vm736_vm1, %v1213_v3 }
 0x152   : > { %2130 = vmatmul.mubr.msk.f32.vlgmr.msra.gmra.mrb[8].mxu0 %vm736_vm1, %v1214_v4 }
 0x153   : > { %2132 = vmatprep.mubr.msk.f32.mxu0 %vm736_vm1, %v1215_v5 }
 0x156   : > { %2133 = vmatmul.mubr.msk.f32.gmra.mrb[10].mxu0 %vm736_vm1, %v1216_v6 }
 0x157   : > { %2135 = vmatprep.mubr.msk.f32.mxu0 %vm736_vm1, %v1217_v7 }
 0x15a   : > { %2136 = vmatmul.mubr.msk.f32.gmra.mrb[12].mxu0 %vm736_vm1, %v1218_v8 }
 0x15b   : > { %2138 = vmatprep.mubr.msk.f32.mxu0 %vm736_vm1, %v1219_v9 }
 0x15e   : > { %2139 = vmatmul.mubr.msk.f32.gmra.mrb[14].mxu0 %vm736_vm1, %v1220_v10 }
 0x15f   : > { %2141 = vmatprep.mubr.msk.f32.mxu0 %vm736_vm1, %v1221_v11 }
 0x162   : > { %2142 = vmatmul.mubr.msk.f32.gmra.mrb[16].mxu0 %vm736_vm1, %v1222_v12 }
 0x163   : > { %2144 = vmatprep.mubr.msk.f32.mxu0 %vm736_vm1, %v1223_v13 }
 0x166   : > { %2145 = vmatmul.mubr.msk.f32.gmra.mrb[18].mxu0 %vm736_vm1, %v1224_v14 }
 0x167   : > { %2147 = vmatprep.mubr.msk.f32.mxu0 %vm736_vm1, %v1225_v15 }
 0x16a   : > { %2148 = vmatmul.mubr.msk.f32.gmra.mrb[20].mxu0 %vm736_vm1, %v1226_v16 }
 0x16b   : > { %2150 = vmatprep.mubr.msk.f32.mxu0 %vm736_vm1, %v1227_v17 }
 0x16e   : > { %2151 = vmatmul.mubr.msk.f32.gmra.mrb[22].mxu0 %vm736_vm1, %v1228_v18 }
 0x215   : > { %v2067_v20 = vpop.f32.mrb[0].mxu0 }
 0x216   : > { %v2079_v21 = vpop.f32.mrb[0].mxu1  ;;  %v904_v22 = vadd.f32 %v2067_v20, %v2743_v19  ;;  %v898_v23 = vpop.f32.mrb[1].mxu0 }
 0x217   : > { %v938_v24 = vpop.f32.mrb[1].mxu1  ;;  %v899_v25 = vadd.f32 %v2743_v19, %v898_v23  ;;  %v944_v54 = vadd.f32 %v2079_v21, %v2743_v19 }
 0x218   : > { %v978_v26 = vmul.f32 0.999995, %v904_v22  ;;  %v939_v45 = vadd.f32 %v2743_v19, %v938_v24 }
 0x219   : > { %v977_v27 = vmul.f32 0.999995, %v899_v25  ;;  %v2070_v28 = vpop.f32.mrb[2].mxu0  ;;  %v986_v63 = vmul.f32 0.999995, %v944_v54 }
 0x21a   : > { %v2082_v29 = vpop.f32.mrb[2].mxu1  ;;  %v914_v30 = vadd.f32 %v2070_v28, %v2743_v19  ;;  %v908_v31 = vpop.f32.mrb[3].mxu0  ;;  %v994_v35 = vmax.f32 %v978_v26, 0.0  ;;  %v985_v58 = vmul.f32 0.999995, %v939_v45 }
 0x21b   : > { %v948_v32 = vpop.f32.mrb[3].mxu1  ;;  %v993_v33 = vmax.f32 %v977_v27, 0.0  ;;  %v909_v34 = vadd.f32 %v2743_v19, %v908_v31  ;;  %v954_v0 = vadd.f32 %v2082_v29, %v2743_v19  ;;  %v1002_v5 = vmax.f32 %v986_v63, 0.0 }
 0x21c   : > { %v980_v36 = vmul.f32 0.999995, %v914_v30  ;;  %v949_v59 = vadd.f32 %v2743_v19, %v948_v32  ;;  %v1001_v2 = vmax.f32 %v985_v58, 0.0 }
 0x21d   : > { %v979_v37 = vmul.f32 0.999995, %v909_v34  ;;  %v2073_v38 = vpop.f32.mrb[4].mxu0  ;;  %2097 = vmatprep.mubr.msk.f32.mxu1 %vm736_vm1, %v993_v33  ;;  %v988_v6 = vmul.f32 0.999995, %v954_v0 }
 0x21e   : > { %v2085_v39 = vpop.f32.mrb[4].mxu1  ;;  %v924_v40 = vadd.f32 %v2073_v38, %v2743_v19  ;;  %v918_v41 = vpop.f32.mrb[5].mxu0  ;;  %2098 = vmatmul.mubr.msk.f32.vlgmr.msra.gmra.mrb[8].mxu1 %vm736_vm1, %v994_v35  ;;  %v996_v46 = vmax.f32 %v980_v36, 0.0  ;;  %v987_v3 = vmul.f32 0.999995, %v949_v59 }
 0x21f   : > { %v958_v42 = vpop.f32.mrb[5].mxu1  ;;  %v995_v43 = vmax.f32 %v979_v37, 0.0  ;;  %v919_v44 = vadd.f32 %v2743_v19, %v918_v41  ;;  %v964_v7 = vadd.f32 %v2085_v39, %v2743_v19  ;;  %v1004_v11 = vmax.f32 %v988_v6, 0.0  ;;  %v2812_v36 = vld [vmem:[%s3086_s6] ss:$0 sm:$0xff] }
 0x220   : > { %v982_v47 = vmul.f32 0.999995, %v924_v40  ;;  %v959_v4 = vadd.f32 %v2743_v19, %v958_v42  ;;  %v1003_v8 = vmax.f32 %v987_v3, 0.0 }
 0x221   : > { %v981_v48 = vmul.f32 0.999995, %v919_v44  ;;  %v2076_v49 = vpop.f32.mrb[6].mxu0  ;;  %2100 = vmatprep.mubr.msk.f32.mxu1 %vm736_vm1, %v995_v43  ;;  %v990_v12 = vmul.f32 0.999995, %v964_v7 }
 0x222   : > { %v2088_v50 = vpop.f32.mrb[6].mxu1  ;;  %v998_v51 = vmax.f32 %v982_v47, 0.0  ;;  %v934_v52 = vadd.f32 %v2076_v49, %v2743_v19  ;;  %v928_v53 = vpop.f32.mrb[7].mxu0  ;;  %2101 = vmatmul.mubr.msk.f32.gmra.mrb[10].mxu1 %vm736_vm1, %v996_v46  ;;  %v989_v9 = vmul.f32 0.999995, %v959_v4 }
 0x223   : > { %v968_v55 = vpop.f32.mrb[7].mxu1  ;;  %v997_v56 = vmax.f32 %v981_v48, 0.0  ;;  %v929_v57 = vadd.f32 %v2743_v19, %v928_v53  ;;  %v974_v13 = vadd.f32 %v2088_v50, %v2743_v19  ;;  %v1006_v16 = vmax.f32 %v990_v12, 0.0 }
 0x224   : > { %v984_v60 = vmul.f32 0.999995, %v934_v52  ;;  %v969_v10 = vadd.f32 %v2743_v19, %v968_v55  ;;  %v1005_v14 = vmax.f32 %v989_v9, 0.0 }
 0x225   : > { %v983_v61 = vmul.f32 0.999995, %v929_v57  ;;  %2103 = vmatprep.mubr.msk.f32.mxu1 %vm736_vm1, %v997_v56  ;;  %v992_v17 = vmul.f32 0.999995, %v974_v13  ;;  %v2777_v21 = vpop.f32.mrb[8].mxu0 }
 0x226   : > { %v1000_v62 = vmax.f32 %v984_v60, 0.0  ;;  %2104 = vmatmul.mubr.msk.f32.gmra.mrb[12].mxu1 %vm736_vm1, %v998_v51  ;;  %v991_v15 = vmul.f32 0.999995, %v969_v10  ;;  %v2779_v19 = vpop.f32.mrb[9].mxu0 }
 0x227   : > { %v999_v1 = vmax.f32 %v983_v61, 0.0  ;;  %v1008_v20 = vmax.f32 %v992_v17, 0.0 }
 0x228   : > { %v1007_v18 = vmax.f32 %v991_v15, 0.0  ;;  %v2829_v15 = vld [vmem:[%s3088_s8] ss:$0 sm:$0xff] }
 0x229   : > { %2106 = vmatprep.mubr.msk.f32.mxu1 %vm736_vm1, %v999_v1  ;;  %v2781_v22 = vpop.f32.mrb[10].mxu0 }
 0x22a   : > { %2107 = vmatmul.mubr.msk.f32.gmra.mrb[14].mxu1 %vm736_vm1, %v1000_v62  ;;  %v2783_v23 = vpop.f32.mrb[11].mxu0 }
 0x22b   : > { %2109 = vmatprep.mubr.msk.f32.mxu1 %vm736_vm1, %v1001_v2 }
 0x22d   : > { %v2785_v24 = vpop.f32.mrb[12].mxu0 }
 0x22e   : > { %2110 = vmatmul.mubr.msk.f32.gmra.mrb[16].mxu1 %vm736_vm1, %v1002_v5  ;;  %v2787_v25 = vpop.f32.mrb[13].mxu0 }
 0x22f   : > { %2112 = vmatprep.mubr.msk.f32.mxu1 %vm736_vm1, %v1003_v8 }
 0x231   : > { %v2789_v26 = vpop.f32.mrb[14].mxu0 }
 0x232   : > { %2113 = vmatmul.mubr.msk.f32.gmra.mrb[18].mxu1 %vm736_vm1, %v1004_v11  ;;  %v2791_v27 = vpop.f32.mrb[15].mxu0 }
 0x233   : > { %2115 = vmatprep.mubr.msk.f32.mxu1 %vm736_vm1, %v1005_v14 }
 0x235   : > { %v2793_v28 = vpop.f32.mrb[16].mxu0 }
 0x236   : > { %2116 = vmatmul.mubr.msk.f32.gmra.mrb[20].mxu1 %vm736_vm1, %v1006_v16  ;;  %v2795_v29 = vpop.f32.mrb[17].mxu0 }
 0x237   : > { %2118 = vmatprep.mubr.msk.f32.mxu1 %vm736_vm1, %v1007_v18 }
 0x239   : > { %v2797_v30 = vpop.f32.mrb[18].mxu0 }
 0x23a   : > { %2119 = vmatmul.mubr.msk.f32.gmra.mrb[22].mxu1 %vm736_vm1, %v1008_v20  ;;  %v2799_v31 = vpop.f32.mrb[19].mxu0 }
 0x23d   : > { %v2801_v32 = vpop.f32.mrb[20].mxu0 }
 0x23e   : > { %v2803_v33 = vpop.f32.mrb[21].mxu0 }
 0x241   : > { %v2805_v34 = vpop.f32.mrb[22].mxu0 }
 0x242   : > { %v2807_v35 = vpop.f32.mrb[23].mxu0 }
 0x2f1   : > { %v2099_v37 = vpop.f32.mrb[8].mxu1 }
 0x2f2   : > { %v1140_v38 = vadd.f32 %v2099_v37, %v2812_v36  ;;  %v1134_v39 = vpop.f32.mrb[9].mxu1 }
 0x2f3   : > { %v1135_v40 = vadd.f32 %v2812_v36, %v1134_v39 }
 0x2f4   : > { %v1932_v41 = vmul.f32 -1.442695, %v1140_v38 }
 0x2f5   : > { %v1931_v42 = vmul.f32 -1.442695, %v1135_v40  ;;  %v2102_v43 = vpop.f32.mrb[10].mxu1 }
 0x2f6   : > { %2263 = vpow2.f32 %v1932_v41  ;;  %v1150_v44 = vadd.f32 %v2102_v43, %v2812_v36  ;;  %v1144_v45 = vpop.f32.mrb[11].mxu1 }
 0x2f7   : > { %2265 = vpow2.f32 %v1931_v42  ;;  %v1145_v46 = vadd.f32 %v2812_v36, %v1144_v45  ;;  %v1360_v42 = vadd.f32 %v2777_v21, %v2829_v15 }
 0x2f8   : > { %v1934_v47 = vmul.f32 -1.442695, %v1150_v44  ;;  %v1355_v44 = vadd.f32 %v2829_v15, %v2779_v19 }
 0x2f9   : > { %v1933_v48 = vmul.f32 -1.442695, %v1145_v46  ;;  %v2105_v49 = vpop.f32.mrb[12].mxu1 }
 0x2fa   : > { %2267 = vpow2.f32 %v1934_v47  ;;  %v1160_v50 = vadd.f32 %v2105_v49, %v2812_v36  ;;  %v1154_v51 = vpop.f32.mrb[13].mxu1 }
 0x2fb   : > { %2269 = vpow2.f32 %v1933_v48  ;;  %v1155_v52 = vadd.f32 %v2812_v36, %v1154_v51 }
 0x2fc   : > { %v1936_v53 = vmul.f32 -1.442695, %v1160_v50 }
 0x2fd   : > { %v1935_v54 = vmul.f32 -1.442695, %v1155_v52  ;;  %v2108_v55 = vpop.f32.mrb[14].mxu1 }
 0x2fe   : > { %2271 = vpow2.f32 %v1936_v53  ;;  %v1170_v56 = vadd.f32 %v2108_v55, %v2812_v36  ;;  %v1164_v57 = vpop.f32.mrb[15].mxu1  ;;  %v1370_v53 = vadd.f32 %v2781_v22, %v2829_v15 }
 0x2ff   : > { %2273 = vpow2.f32 %v1935_v54  ;;  %v1165_v58 = vadd.f32 %v2812_v36, %v1164_v57 }
 0x300   : > { %v2264_v59 = vpop.eup %2263  ;;  %v1938_v60 = vmul.f32 -1.442695, %v1170_v56  ;;  %v1365_v56 = vadd.f32 %v2829_v15, %v2783_v23 }
 0x301   : > { %v2266_v61 = vpop.eup %2265  ;;  %v1482_v62 = vadd.f32 1.0, %v2264_v59  ;;  %v1937_v63 = vmul.f32 -1.442695, %v1165_v58  ;;  %v2111_v0 = vpop.f32.mrb[16].mxu1 }
 0x302   : > { %v1481_v1 = vadd.f32 1.0, %v2266_v61  ;;  %2275 = vpow2.f32 %v1938_v60  ;;  %v1180_v2 = vadd.f32 %v2111_v0, %v2812_v36  ;;  %v1174_v3 = vpop.f32.mrb[17].mxu1 }
 0x303   : > { %2277 = vrcp.f32 %v1482_v62  ;;  %v1175_v4 = vadd.f32 %v2812_v36, %v1174_v3 }
 0x304   : > { %v2268_v5 = vpop.eup %2267  ;;  %2279 = vrcp.f32 %v1481_v1  ;;  %v1940_v6 = vmul.f32 -1.442695, %v1180_v2  ;;  %v1375_v2 = vadd.f32 %v2829_v15, %v2787_v25  ;;  %v1390_v25 = vadd.f32 %v2789_v26, %v2829_v15 }
 0x305   : > { %v2270_v7 = vpop.eup %2269  ;;  %v1484_v8 = vadd.f32 1.0, %v2268_v5  ;;  %2281 = vpow2.f32 %v1937_v63  ;;  %v1939_v9 = vmul.f32 -1.442695, %v1175_v4  ;;  %v2114_v10 = vpop.f32.mrb[18].mxu1 }
 0x306   : > { %v1483_v11 = vadd.f32 1.0, %v2270_v7  ;;  %2283 = vpow2.f32 %v1940_v6  ;;  %v1190_v12 = vadd.f32 %v2114_v10, %v2812_v36  ;;  %v1184_v13 = vpop.f32.mrb[19].mxu1 }
 0x307   : > { %2285 = vrcp.f32 %v1484_v8  ;;  %v1185_v14 = vadd.f32 %v2812_v36, %v1184_v13 }
 0x308   : > { %v2272_v16 = vpop.eup %2271  ;;  %2287 = vrcp.f32 %v1483_v11  ;;  %v1942_v17 = vmul.f32 -1.442695, %v1190_v12 }
 0x309   : > { %v2274_v18 = vpop.eup %2273  ;;  %v1486_v20 = vadd.f32 1.0, %v2272_v16  ;;  %2289 = vpow2.f32 %v1939_v9  ;;  %v1941_v37 = vmul.f32 -1.442695, %v1185_v14  ;;  %v2117_v38 = vpop.f32.mrb[20].mxu1 }
 0x30a   : > { %v1485_v39 = vadd.f32 1.0, %v2274_v18  ;;  %2291 = vpow2.f32 %v1942_v17  ;;  %v1200_v40 = vadd.f32 %v2117_v38, %v2812_v36  ;;  %v1194_v41 = vpop.f32.mrb[21].mxu1  ;;  %v1400_v38 = vadd.f32 %v2793_v28, %v2829_v15 }
 0x30b   : > { %2293 = vrcp.f32 %v1486_v20  ;;  %v1195_v43 = vadd.f32 %v2812_v36, %v1194_v41  ;;  %v1385_v20 = vadd.f32 %v2829_v15, %v2791_v27  ;;  %v1395_v27 = vadd.f32 %v2829_v15, %v2795_v29 }
 0x30c   : > { %v2276_v45 = vpop.eup %2275  ;;  %2295 = vrcp.f32 %v1485_v39  ;;  %v1944_v46 = vmul.f32 -1.442695, %v1200_v40  ;;  %v1410_v28 = vadd.f32 %v2797_v30, %v2829_v15 }
 0x30d   : > { %v2278_v47 = vpop.eup %2277  ;;  %v1488_v48 = vadd.f32 1.0, %v2276_v45  ;;  %2297 = vpow2.f32 %v1941_v37  ;;  %v1943_v49 = vmul.f32 -1.442695, %v1195_v43  ;;  %v2120_v50 = vpop.f32.mrb[22].mxu1 }
 0x30e   : > { %v2280_v51 = vpop.eup %2279  ;;  %2299 = vpow2.f32 %v1944_v46  ;;  %v1210_v52 = vadd.f32 %v2120_v50, %v2812_v36  ;;  %v1204_v21 = vpop.f32.mrb[23].mxu1  ;;  %v2840_v54 = vadd.f32 %v2278_v47, %v1360_v42 }
 0x30f   : > { %v2282_v19 = vpop.eup %2281  ;;  %2301 = vrcp.f32 %v1488_v48  ;;  %v1205_v55 = vadd.f32 %v2812_v36, %v1204_v21  ;;  %v2845_v57 = vadd.f32 %v2280_v51, %v1355_v44  ;;  %v1380_v36 = vadd.f32 %v2785_v24, %v2829_v15 }
 0x310   : > { %v2284_v58 = vpop.eup %2283  ;;  %v1487_v59 = vadd.f32 1.0, %v2282_v19  ;;  %2303 = vpow2.f32 %v1943_v49  ;;  %v1946_v60 = vmul.f32 -1.442695, %v1210_v52  ;;  %v1549_v61 = vsel %vm1545_vm2, %v2840_v54, -inf }
 0x311   : > { %v2286_v62 = vpop.eup %2285  ;;  %v1490_v22 = vadd.f32 1.0, %v2284_v58  ;;  %v1945_v63 = vmul.f32 -1.442695, %v1205_v55  ;;  %1550 = vmax.xlane.f32.xlu0 %v1549_v61  ;;  %v1546_v7 = vsel %vm1545_vm2, %v2845_v57, -inf  ;;  %v1405_v21 = vadd.f32 %v2829_v15, %v2799_v31 }
 0x312   : > { %v2288_v0 = vpop.eup %2287  ;;  %2305 = vrcp.f32 %v1487_v59  ;;  %v2851_v1 = vadd.f32 %v2286_v62, %v1370_v53  ;;  %v1420_v53 = vadd.f32 %v2801_v32, %v2829_v15  ;;  %v1415_v58 = vadd.f32 %v2829_v15, %v2803_v33 }
 0x313   : > { %v2290_v23 = vpop.eup %2289  ;;  %2307 = vrcp.f32 %v1490_v22  ;;  %v2855_v3 = vadd.f32 %v2288_v0, %v1365_v56  ;;  %v1430_v22 = vadd.f32 %v2805_v34, %v2829_v15  ;;  %v1425_v0 = vadd.f32 %v2829_v15, %v2807_v35 }
 0x314   : > { %v2292_v4 = vpop.eup %2291  ;;  %v1489_v5 = vadd.f32 1.0, %v2290_v23  ;;  %2309 = vpow2.f32 %v1946_v60  ;;  %v1555_v6 = vsel %vm1545_vm2, %v2851_v1, -inf }
 0x315   : > { %v2294_v8 = vpop.eup %2293  ;;  %v1492_v24 = vadd.f32 1.0, %v2292_v4  ;;  %2311 = vpow2.f32 %v1945_v63  ;;  %1556 = vmax.xlane.f32.xlu1 %v1555_v6  ;;  %1547 = vmax.xlane.f32.xlu0 %v1546_v7  ;;  %v1552_v16 = vsel %vm1545_vm2, %v2855_v3, -inf }
 0x316   : > { %v2296_v9 = vpop.eup %2295  ;;  %2313 = vrcp.f32 %v1489_v5  ;;  %v2863_v10 = vadd.f32 %v2294_v8, %v1380_v36 }
 0x317   : > { %v2298_v11 = vpop.eup %2297  ;;  %2315 = vrcp.f32 %v1492_v24  ;;  %v2865_v12 = vadd.f32 %v2296_v9, %v1375_v2 }
 0x318   : > { %v2300_v13 = vpop.eup %2299  ;;  %v1491_v14 = vadd.f32 1.0, %v2298_v11  ;;  %v1561_v42 = vsel %vm1545_vm2, %v2863_v10, -inf }
 0x319   : > { %v2302_v17 = vpop.eup %2301  ;;  %v1494_v18 = vadd.f32 1.0, %v2300_v13  ;;  %1553 = vmax.xlane.f32.xlu1 %v1552_v16  ;;  %v1558_v26 = vsel %vm1545_vm2, %v2865_v12, -inf }
 0x31a   : > { %v2304_v37 = vpop.eup %2303  ;;  %2317 = vrcp.f32 %v1491_v14  ;;  %1559 = vmax.xlane.f32.xlu0 %v1558_v26  ;;  %v2875_v39 = vadd.f32 %v2302_v17, %v1390_v25 }
 0x31b   : > { %2319 = vrcp.f32 %v1494_v18  ;;  %v1493_v40 = vadd.f32 1.0, %v2304_v37 }
 0x31c   : > { %v2306_v41 = vpop.eup %2305  ;;  %v1567_v29 = vsel %vm1545_vm2, %v2875_v39, -inf }
 0x31d   : > { %v2308_v43 = vpop.eup %2307  ;;  %2321 = vrcp.f32 %v1493_v40  ;;  %1562 = vmax.xlane.f32.xlu1 %v1561_v42  ;;  %v2881_v44 = vadd.f32 %v2306_v41, %v1385_v20 }
 0x31e   : > { %v2310_v45 = vpop.eup %2309  ;;  %v2885_v46 = vadd.f32 %v2308_v43, %v1400_v38 }
 0x31f   : > { %v2312_v47 = vpop.eup %2311  ;;  %v1496_v48 = vadd.f32 1.0, %v2310_v45  ;;  %v1564_v49 = vsel %vm1545_vm2, %v2881_v44, -inf }
 0x320   : > { %v2314_v50 = vpop.eup %2313  ;;  %v1495_v51 = vadd.f32 1.0, %v2312_v47  ;;  %1565 = vmax.xlane.f32.xlu0 %v1564_v49  ;;  %v1573_v31 = vsel %vm1545_vm2, %v2885_v46, -inf }
 0x321   : > { %v2316_v52 = vpop.eup %2315  ;;  %2323 = vrcp.f32 %v1496_v48  ;;  %1568 = vmax.xlane.f32.xlu1 %v1567_v29  ;;  %v2893_v30 = vadd.f32 %v2314_v50, %v1395_v27 }
 0x322   : > { %2325 = vrcp.f32 %v1495_v51  ;;  %v2897_v19 = vadd.f32 %v2316_v52, %v1410_v28 }
 0x323   : > { %v1570_v55 = vsel %vm1545_vm2, %v2893_v30, -inf }
 0x324   : > { %v2318_v56 = vpop.eup %2317  ;;  %1571 = vmax.xlane.f32.xlu0 %v1570_v55  ;;  %v1579_v33 = vsel %vm1545_vm2, %v2897_v19, -inf }
 0x325   : > { %v2320_v59 = vpop.eup %2319  ;;  %1574 = vmax.xlane.f32.xlu1 %v1573_v31  ;;  %v2905_v60 = vadd.f32 %v2318_v56, %v1405_v21 }
 0x326   : > { %v2907_v61 = vadd.f32 %v2320_v59, %v1420_v53 }
 0x327   : > { %v2322_v32 = vpop.eup %2321  ;;  %v1576_v62 = vsel %vm1545_vm2, %v2905_v60, -inf }
 0x328   : > { %1577 = vmax.xlane.f32.xlu0 %v1576_v62  ;;  %v2915_v63 = vadd.f32 %v2322_v32, %v1415_v58  ;;  %v1585_v4 = vsel %vm1545_vm2, %v2907_v61, -inf }
 0x329   : > { %1580 = vmax.xlane.f32.xlu1 %v1579_v33 }
 0x32a   : > { %v1582_v36 = vsel %vm1545_vm2, %v2915_v63, -inf }
 0x32b   : > { %v2324_v23 = vpop.eup %2323 }
 0x32c   : > { %v2326_v2 = vpop.eup %2325  ;;  %1583 = vmax.xlane.f32.xlu0 %v1582_v36  ;;  %v2923_v5 = vadd.f32 %v2324_v23, %v1430_v22 }
 0x32d   : > { %1586 = vmax.xlane.f32.xlu1 %v1585_v4  ;;  %v2925_v34 = vadd.f32 %v2326_v2, %v1425_v0 }
 0x32e   : > { %v1591_v35 = vsel %vm1545_vm2, %v2923_v5, -inf }
 0x32f   : > { %v1588_v6 = vsel %vm1545_vm2, %v2925_v34, -inf }
 0x330   : > { %1589 = vmax.xlane.f32.xlu0 %v1588_v6 }
 0x331   : > { %1592 = vmax.xlane.f32.xlu1 %v1591_v35 }
 0x39e   : > { %v1551_v15 = vpop.xlane.xlu0 %1550 }
 0x39f   : > { %v2932_v7 = vsub.f32 %v2840_v54, %v1551_v15 }
 0x3a1   : > { %v1612_v8 = vmul.f32 1.442695, %v2932_v7 }
 0x3a2   : > { %v1557_v24 = vpop.xlane.xlu1 %1556  ;;  %v1548_v9 = vpop.xlane.xlu0 %1547 }
 0x3a3   : > { %2327 = vpow2.f32 %v1612_v8  ;;  %v2936_v25 = vsub.f32 %v2851_v1, %v1557_v24  ;;  %v2939_v11 = vsub.f32 %v2845_v57, %v1548_v9 }
 0x3a5   : > { %v1616_v13 = vmul.f32 1.442695, %v2936_v25  ;;  %v1610_v14 = vmul.f32 1.442695, %v2939_v11 }
 0x3a6   : > { %v1554_v16 = vpop.xlane.xlu1 %1553 }
 0x3a7   : > { %2329 = vpow2.f32 %v1616_v13  ;;  %v2944_v54 = vsub.f32 %v2855_v3, %v1554_v16  ;;  %v1560_v17 = vpop.xlane.xlu0 %1559 }
 0x3a8   : > { %2331 = vpow2.f32 %v1610_v14  ;;  %v2947_v18 = vsub.f32 %v2865_v12, %v1560_v17 }
 0x3a9   : > { %v1614_v1 = vmul.f32 1.442695, %v2944_v54 }
 0x3aa   : > { %v1618_v20 = vmul.f32 1.442695, %v2947_v18  ;;  %v1563_v57 = vpop.xlane.xlu1 %1562 }
 0x3ab   : > { %2333 = vpow2.f32 %v1614_v1  ;;  %v2952_v26 = vsub.f32 %v2863_v10, %v1563_v57 }
 0x3ac   : > { %2335 = vpow2.f32 %v1618_v20 }
 0x3ad   : > { %v2328_v37 = vpop.eup %2327  ;;  %v1620_v38 = vmul.f32 1.442695, %v2952_v26  ;;  %v1566_v40 = vpop.xlane.xlu0 %1565 }
 0x3ae   : > { %v2956_v3 = vsub.f32 %v2881_v44, %v1566_v40  ;;  %v1569_v41 = vpop.xlane.xlu1 %1568  ;;  %v1645_v12 = vsel %vm1545_vm2, %v2328_v37, 0.0 }
 0x3af   : > { %2337 = vpow2.f32 %v1620_v38  ;;  %v2960_v42 = vsub.f32 %v2875_v39, %v1569_v41  ;;  %1646 = vadd.xlane.f32.xlu1 %v1645_v12 }
 0x3b0   : > { %v1622_v43 = vmul.f32 1.442695, %v2956_v3 }
 0x3b1   : > { %v2330_v10 = vpop.eup %2329  ;;  %v1624_v27 = vmul.f32 1.442695, %v2960_v42  ;;  %v1572_v45 = vpop.xlane.xlu0 %1571 }
 0x3b2   : > { %v2332_v28 = vpop.eup %2331  ;;  %2339 = vpow2.f32 %v1622_v43  ;;  %v2965_v47 = vsub.f32 %v2893_v30, %v1572_v45  ;;  %v1575_v44 = vpop.xlane.xlu1 %1574  ;;  %v1651_v48 = vsel %vm1545_vm2, %v2330_v10, 0.0 }
 0x3b3   : > { %2341 = vpow2.f32 %v1624_v27  ;;  %v2969_v49 = vsub.f32 %v2885_v46, %v1575_v44  ;;  %1652 = vadd.xlane.f32.xlu1 %v1651_v48  ;;  %v1642_v39 = vsel %vm1545_vm2, %v2332_v28, 0.0 }
 0x3b4   : > { %v1626_v50 = vmul.f32 1.442695, %v2965_v47  ;;  %1643 = vadd.xlane.f32.xlu0 %v1642_v39 }
 0x3b5   : > { %v2334_v51 = vpop.eup %2333  ;;  %v1628_v29 = vmul.f32 1.442695, %v2969_v49  ;;  %v1578_v52 = vpop.xlane.xlu0 %1577 }
 0x3b6   : > { %2343 = vpow2.f32 %v1626_v50  ;;  %v2975_v21 = vsub.f32 %v2905_v60, %v1578_v52  ;;  %v1581_v30 = vpop.xlane.xlu1 %1580  ;;  %v1648_v53 = vsel %vm1545_vm2, %v2334_v51, 0.0  ;;  %v2336_v55 = vpop.eup %2335 }
 0x3b7   : > { %2345 = vpow2.f32 %v1628_v29  ;;  %v2979_v46 = vsub.f32 %v2897_v19, %v1581_v30  ;;  %v1654_v19 = vsel %vm1545_vm2, %v2336_v55, 0.0 }
 0x3b8   : > { %v1630_v56 = vmul.f32 1.442695, %v2975_v21  ;;  %1649 = vadd.xlane.f32.xlu0 %v1648_v53 }
 0x3b9   : > { %v2338_v58 = vpop.eup %2337  ;;  %v1632_v31 = vmul.f32 1.442695, %v2979_v46  ;;  %v1584_v59 = vpop.xlane.xlu0 %1583 }
 0x3ba   : > { %2347 = vpow2.f32 %v1630_v56  ;;  %v2984_v32 = vsub.f32 %v2915_v63, %v1584_v59  ;;  %v1587_v60 = vpop.xlane.xlu1 %1586  ;;  %v1657_v62 = vsel %vm1545_vm2, %v2338_v58, 0.0 }
 0x3bb   : > { %2349 = vpow2.f32 %v1632_v31  ;;  %v2988_v22 = vsub.f32 %v2907_v61, %v1587_v60  ;;  %1658 = vadd.xlane.f32.xlu1 %v1657_v62 }
 0x3bc   : > { %v2340_v33 = vpop.eup %2339  ;;  %v1634_v0 = vmul.f32 1.442695, %v2984_v32  ;;  %1655 = vadd.xlane.f32.xlu0 %v1654_v19 }
 0x3bd   : > { %v2342_v36 = vpop.eup %2341  ;;  %v1636_v23 = vmul.f32 1.442695, %v2988_v22  ;;  %v1590_v2 = vpop.xlane.xlu0 %1589  ;;  %v1660_v35 = vsel %vm1545_vm2, %v2340_v33, 0.0 }
 0x3be   : > { %2351 = vpow2.f32 %v1634_v0  ;;  %v2994_v63 = vsub.f32 %v2925_v34, %v1590_v2  ;;  %v1593_v4 = vpop.xlane.xlu1 %1592  ;;  %v1663_v6 = vsel %vm1545_vm2, %v2342_v36, 0.0 }
 0x3bf   : > { %2353 = vpow2.f32 %v1636_v23  ;;  %v2998_v61 = vsub.f32 %v2923_v5, %v1593_v4  ;;  %1664 = vadd.xlane.f32.xlu1 %v1663_v6 }
 0x3c0   : > { %v2344_v15 = vpop.eup %2343  ;;  %v1638_v8 = vmul.f32 1.442695, %v2994_v63  ;;  %1661 = vadd.xlane.f32.xlu0 %v1660_v35 }
 0x3c1   : > { %v2346_v24 = vpop.eup %2345  ;;  %v1640_v9 = vmul.f32 1.442695, %v2998_v61  ;;  %v1666_v13 = vsel %vm1545_vm2, %v2344_v15, 0.0 }
 0x3c2   : > { %2355 = vpow2.f32 %v1638_v8  ;;  %v1669_v34 = vsel %vm1545_vm2, %v2346_v24, 0.0 }
 0x3c3   : > { %2357 = vpow2.f32 %v1640_v9  ;;  %1670 = vadd.xlane.f32.xlu1 %v1669_v34 }
 0x3c4   : > { %v2348_v14 = vpop.eup %2347  ;;  %1667 = vadd.xlane.f32.xlu0 %v1666_v13 }
 0x3c5   : > { %v2350_v5 = vpop.eup %2349  ;;  %v1672_v17 = vsel %vm1545_vm2, %v2348_v14, 0.0 }
 0x3c6   : > { %v1675_v16 = vsel %vm1545_vm2, %v2350_v5, 0.0 }
 0x3c7   : > { %1676 = vadd.xlane.f32.xlu1 %v1675_v16 }
 0x3c8   : > { %v2352_v1 = vpop.eup %2351  ;;  %1673 = vadd.xlane.f32.xlu0 %v1672_v17 }
 0x3c9   : > { %v2354_v20 = vpop.eup %2353  ;;  %v1678_v37 = vsel %vm1545_vm2, %v2352_v1, 0.0 }
 0x3ca   : > { %v1681_v57 = vsel %vm1545_vm2, %v2354_v20, 0.0 }
 0x3cb   : > { %1682 = vadd.xlane.f32.xlu1 %v1681_v57 }
 0x3cc   : > { %v2356_v38 = vpop.eup %2355  ;;  %1679 = vadd.xlane.f32.xlu0 %v1678_v37 }
 0x3cd   : > { %v2358_v40 = vpop.eup %2357  ;;  %v1684_v12 = vsel %vm1545_vm2, %v2356_v38, 0.0 }
 0x3ce   : > { %v1687_v41 = vsel %vm1545_vm2, %v2358_v40, 0.0 }
 0x3cf   : > { %1688 = vadd.xlane.f32.xlu1 %v1687_v41 }
 0x3d0   : > { %1685 = vadd.xlane.f32.xlu0 %v1684_v12 }
 0x43c   : > { %v1647_v43 = vpop.xlane.xlu1 %1646 }
 0x43d   : > { %2359 = vlog2.f32 %v1647_v43 }
 0x440   : > { %v1653_v10 = vpop.xlane.xlu1 %1652 }
 0x441   : > { %2361 = vlog2.f32 %v1653_v10  ;;  %v1644_v27 = vpop.xlane.xlu0 %1643 }
 0x442   : > { %2363 = vlog2.f32 %v1644_v27 }
 0x445   : > { %v1650_v45 = vpop.xlane.xlu0 %1649 }
 0x446   : > { %2365 = vlog2.f32 %v1650_v45 }
 0x447   : > { %v2360_v28 = vpop.eup %2359 }
 0x448   : > { %v1693_v44 = vmul.f32 0.6931472, %v2360_v28  ;;  %v1659_v48 = vpop.xlane.xlu1 %1658 }
 0x449   : > { %2367 = vlog2.f32 %v1659_v48  ;;  %v1656_v39 = vpop.xlane.xlu0 %1655 }
 0x44a   : > { %v1723_v50 = vsub.f32 %v2932_v7, %v1693_v44  ;;  %2369 = vlog2.f32 %v1656_v39 }
 0x44b   : > { %v2362_v51 = vpop.eup %2361 }
 0x44c   : > { %v2364_v29 = vpop.eup %2363  ;;  %1739 = vst.msk [vmem:[%s2594_s20 + $0x8] sm:$0xff] %vm1545_vm2, %v1723_v50  ;;  %v1697_v52 = vmul.f32 0.6931472, %v2362_v51  ;;  %v1665_v30 = vpop.xlane.xlu1 %1664 }
 0x44d   : > { %v1691_v53 = vmul.f32 0.6931472, %v2364_v29  ;;  %2371 = vlog2.f32 %v1665_v30  ;;  %v1662_v55 = vpop.xlane.xlu0 %1661 }
 0x44e   : > { %v1725_v56 = vsub.f32 %v2936_v25, %v1697_v52  ;;  %2373 = vlog2.f32 %v1662_v55 }
 0x44f   : > { %v1722_v58 = vsub.f32 %v2939_v11, %v1691_v53 }
 0x450   : > { %v2366_v31 = vpop.eup %2365  ;;  %1741 = vst.msk [vmem:[%s2594_s20 + $0x18] sm:$0xff] %vm1545_vm2, %v1725_v56  ;;  %v1671_v7 = vpop.xlane.xlu1 %1670 }
 0x451   : > { %1738 = vst.msk [vmem:[%s2594_s20] sm:$0xff] %vm1545_vm2, %v1722_v58  ;;  %v1695_v59 = vmul.f32 0.6931472, %v2366_v31  ;;  %2375 = vlog2.f32 %v1671_v7  ;;  %v1668_v60 = vpop.xlane.xlu0 %1667 }
 0x452   : > { %2377 = vlog2.f32 %v1668_v60 }
 0x453   : > { %v2368_v62 = vpop.eup %2367  ;;  %v1724_v19 = vsub.f32 %v2944_v54, %v1695_v59 }
 0x454   : > { %v2370_v25 = vpop.eup %2369  ;;  %v1701_v33 = vmul.f32 0.6931472, %v2368_v62  ;;  %v1677_v0 = vpop.xlane.xlu1 %1676 }
 0x455   : > { %1740 = vst.msk [vmem:[%s2594_s20 + $0x10] sm:$0xff] %vm1545_vm2, %v1724_v19  ;;  %v1699_v11 = vmul.f32 0.6931472, %v2370_v25  ;;  %2379 = vlog2.f32 %v1677_v0  ;;  %v1674_v36 = vpop.xlane.xlu0 %1673 }
 0x456   : > { %v1727_v23 = vsub.f32 %v2952_v26, %v1701_v33  ;;  %2381 = vlog2.f32 %v1674_v36 }
 0x457   : > { %v2372_v2 = vpop.eup %2371  ;;  %v1726_v4 = vsub.f32 %v2947_v18, %v1699_v11 }
 0x458   : > { %v2374_v6 = vpop.eup %2373  ;;  %1743 = vst.msk [vmem:[%s2594_s20 + $0x28] sm:$0xff] %vm1545_vm2, %v1727_v23  ;;  %v1705_v54 = vmul.f32 0.6931472, %v2372_v2  ;;  %v1683_v35 = vpop.xlane.xlu1 %1682 }
 0x459   : > { %1742 = vst.msk [vmem:[%s2594_s20 + $0x20] sm:$0xff] %vm1545_vm2, %v1726_v4  ;;  %v1703_v15 = vmul.f32 0.6931472, %v2374_v6  ;;  %2383 = vlog2.f32 %v1683_v35  ;;  %v1680_v8 = vpop.xlane.xlu0 %1679 }
 0x45a   : > { %v1729_v24 = vsub.f32 %v2960_v42, %v1705_v54  ;;  %2385 = vlog2.f32 %v1680_v8 }
 0x45b   : > { %v2376_v26 = vpop.eup %2375  ;;  %v1728_v9 = vsub.f32 %v2956_v3, %v1703_v15 }
 0x45c   : > { %v2378_v18 = vpop.eup %2377  ;;  %1745 = vst.msk [vmem:[%s2594_s20 + $0x38] sm:$0xff] %vm1545_vm2, %v1729_v24  ;;  %v1709_v34 = vmul.f32 0.6931472, %v2376_v26  ;;  %v1689_v13 = vpop.xlane.xlu1 %1688 }
 0x45d   : > { %1744 = vst.msk [vmem:[%s2594_s20 + $0x30] sm:$0xff] %vm1545_vm2, %v1728_v9  ;;  %v1707_v14 = vmul.f32 0.6931472, %v2378_v18  ;;  %2387 = vlog2.f32 %v1689_v13  ;;  %v1686_v5 = vpop.xlane.xlu0 %1685 }
 0x45e   : > { %v1731_v42 = vsub.f32 %v2969_v49, %v1709_v34  ;;  %2389 = vlog2.f32 %v1686_v5 }
 0x45f   : > { %v2380_v16 = vpop.eup %2379  ;;  %v1730_v17 = vsub.f32 %v2965_v47, %v1707_v14 }
 0x460   : > { %v2382_v3 = vpop.eup %2381  ;;  %1747 = vst.msk [vmem:[%s2594_s20 + $0x48] sm:$0xff] %vm1545_vm2, %v1731_v42  ;;  %v1713_v1 = vmul.f32 0.6931472, %v2380_v16 }
 0x461   : > { %1746 = vst.msk [vmem:[%s2594_s20 + $0x40] sm:$0xff] %vm1545_vm2, %v1730_v17  ;;  %v1711_v20 = vmul.f32 0.6931472, %v2382_v3 }
 0x462   : > { %v1733_v57 = vsub.f32 %v2979_v46, %v1713_v1 }
 0x463   : > { %v2384_v37 = vpop.eup %2383  ;;  %v1732_v38 = vsub.f32 %v2975_v21, %v1711_v20 }
 0x464   : > { %v2386_v49 = vpop.eup %2385  ;;  %1749 = vst.msk [vmem:[%s2594_s20 + $0x58] sm:$0xff] %vm1545_vm2, %v1733_v57  ;;  %v1717_v47 = vmul.f32 0.6931472, %v2384_v37 }
 0x465   : > { %1748 = vst.msk [vmem:[%s2594_s20 + $0x50] sm:$0xff] %vm1545_vm2, %v1732_v38  ;;  %v1715_v40 = vmul.f32 0.6931472, %v2386_v49 }
 0x466   : > { %v1735_v41 = vsub.f32 %v2988_v22, %v1717_v47 }
 0x467   : > { %v2388_v12 = vpop.eup %2387  ;;  %v1734_v43 = vsub.f32 %v2984_v32, %v1715_v40 }
 0x468   : > { %v2390_v10 = vpop.eup %2389  ;;  %1751 = vst.msk [vmem:[%s2594_s20 + $0x68] sm:$0xff] %vm1545_vm2, %v1735_v41  ;;  %v1721_v46 = vmul.f32 0.6931472, %v2388_v12 }
 0x469   : > { %1750 = vst.msk [vmem:[%s2594_s20 + $0x60] sm:$0xff] %vm1545_vm2, %v1734_v43  ;;  %v1719_v21 = vmul.f32 0.6931472, %v2390_v10 }
 0x46a   : > { %v1737_v27 = vsub.f32 %v2998_v61, %v1721_v46 }
 0x46b   : > { %v1736_v45 = vsub.f32 %v2994_v63, %v1719_v21 }
 0x46c   : > { %1753 = vst.msk [vmem:[%s2594_s20 + $0x78] sm:$0xff] %vm1545_vm2, %v1737_v27 }
 0x46d   : > { %1752 = vst.msk [vmem:[%s2594_s20 + $0x70] sm:$0xff] %vm1545_vm2, %v1736_v45 }
 0x46e PF: > { %s19_s15 = sadd.s32 1, %s2445_s15   ;;  %s3094_s21 = sld [smem:[#allocation4_spill]] }
 0x46f   : > { %p16_p0 = scmp.ge.s32.totalorder %s19_s15, 11   ;;  %s3095_s30 = smov %s2425_s10 }
 0x470   : > { %s3096_s10 = smov %s2549_s22  ;;  %s3097_s11 = smov %s2437_s13 }
 0x471   : > { %s3098_s12 = smov %s2441_s14  ;;  %s3099_s13 = smov %s3102_s16 }
 0x472   :  { %18 = sbr.rel (!%p16_p0) target bundleno = 6 (0x6), region = 146 }
 0x474   : > { %s3100_s14 = smov %s3094_s21 }

</bundles_post_ra>
